<compile_context>
chip_gen: v7x
topology: tpu7x:2x2x1
jax: 0.10.0
libtpu: 0.0.40
codegen_flags: <defaults>
</compile_context>

<pallas_src>
import functools

import jax
import jax.numpy as jnp
from jax import lax
from jax.experimental import pallas as pl
from jax.experimental.pallas import tpu as pltpu

F32 = jnp.float32
BF16 = jnp.bfloat16
SELU_ALPHA = 1.6732632423543772
SELU_SCALE = 1.0507009873554805
LN_EPS = 1e-5
BN_EPS = 1e-5
MAX_POS_EMB = 512      # lucidrains ConformerBlock attention default
ROW_TILE = 512         # row tile for all (B*n, D) kernels (sweep 256-1024)
PROJ_ROW_TILE = 256    # smaller tile for the wide fused qkv+rel projection


def _selu(y):
    return SELU_SCALE * jnp.where(
        y > 0, y, SELU_ALPHA * (jnp.exp(jnp.minimum(y, 0.0)) - 1.0))


# --------------------------------------------------------------------------
# Fused  [pre-norm] -> [pre-act] -> matmul -> [act] -> [residual] -> [post-LN]
# --------------------------------------------------------------------------

def _fused_linear_kernel(*refs, pre, pre_act, act, res_scale, post_ln):
    refs = list(refs)
    x_ref = refs.pop(0)
    if pre is not None:
        p1_ref = refs.pop(0)
        p2_ref = refs.pop(0)
    w_ref = refs.pop(0)       # bf16 (pre-cast on host)
    b_ref = refs.pop(0)
    if res_scale is not None:
        r_ref = refs.pop(0)
    if post_ln:
        g2_ref = refs.pop(0)
        b2_ref = refs.pop(0)
    o_ref = refs.pop(0)

    x = x_ref[...]
    if pre == "ln":
        mu = jnp.mean(x, axis=-1, keepdims=True)
        var = jnp.mean(jnp.square(x - mu), axis=-1, keepdims=True)
        x = (x - mu) * lax.rsqrt(var + LN_EPS) * p1_ref[...] + p2_ref[...]
    elif pre == "affine":                       # BatchNorm apply (scale/shift)
        x = x * p1_ref[...] + p2_ref[...]
    if pre_act == "swish":
        x = x * jax.nn.sigmoid(x)

    y = jnp.dot(x.astype(BF16), w_ref[...],
                preferred_element_type=jnp.float32)
    y = y + b_ref[...]

    if act == "silu":
        y = y * jax.nn.sigmoid(y)
    elif act == "selu":
        y = _selu(y)
    elif act == "glu":
        half = y.shape[-1] // 2
        y = y[:, :half] * jax.nn.sigmoid(y[:, half:])

    if res_scale is not None:
        y = r_ref[...] + res_scale * y

    if post_ln:
        mu = jnp.mean(y, axis=-1, keepdims=True)
        var = jnp.mean(jnp.square(y - mu), axis=-1, keepdims=True)
        y = (y - mu) * lax.rsqrt(var + LN_EPS) * g2_ref[...] + b2_ref[...]

    o_ref[...] = y.astype(o_ref.dtype)


def fused_linear(x, w, b, *, pre=None, pre_params=None, pre_act=None,
                 act=None, residual=None, res_scale=1.0, post_ln=None,
                 tm=ROW_TILE, out_dtype=F32):
    M, K = x.shape
    N = w.shape[1]
    n_out = N // 2 if act == "glu" else N
    tm = min(tm, M)
    grid = (pl.cdiv(M, tm),)

    operands = [x]
    in_specs = [pl.BlockSpec((tm, K), lambda i: (i, 0))]
    if pre is not None:
        p1, p2 = pre_params
        operands += [p1.reshape(1, K), p2.reshape(1, K)]
        in_specs += [pl.BlockSpec((1, K), lambda i: (0, 0)),
                     pl.BlockSpec((1, K), lambda i: (0, 0))]
    operands += [w, b.reshape(1, N)]
    in_specs += [pl.BlockSpec((K, N), lambda i: (0, 0)),
                 pl.BlockSpec((1, N), lambda i: (0, 0))]
    rs = None
    if residual is not None:
        rs = float(res_scale)
        operands.append(residual)
        in_specs.append(pl.BlockSpec((tm, n_out), lambda i: (i, 0)))
    if post_ln is not None:
        g2, b2 = post_ln
        operands += [g2.reshape(1, n_out), b2.reshape(1, n_out)]
        in_specs += [pl.BlockSpec((1, n_out), lambda i: (0, 0)),
                     pl.BlockSpec((1, n_out), lambda i: (0, 0))]

    kernel = functools.partial(_fused_linear_kernel, pre=pre, pre_act=pre_act,
                               act=act, res_scale=rs,
                               post_ln=post_ln is not None)
    return pl.pallas_call(
        kernel,
        out_shape=jax.ShapeDtypeStruct((M, n_out), out_dtype),
        grid=grid,
        in_specs=in_specs,
        out_specs=pl.BlockSpec((tm, n_out), lambda i: (i, 0)),
        compiler_params=pltpu.CompilerParams(
            dimension_semantics=("parallel",)),
    )(*operands)


# --------------------------------------------------------------------------
# first_bn (BatchNorm2d(1), batch stats) + SELU + positional-embedding add.
# The two BN scalars (mean, inv-std) live in SMEM.
# --------------------------------------------------------------------------

def _bn_selu_pos_kernel(x_ref, pe_ref, st_ref, o_ref):
    mean = st_ref[0]
    inv = st_ref[1]
    y = (x_ref[...] - mean) * inv
    o_ref[...] = _selu(y) + pe_ref[...]


def bn2d_selu_posadd(x3d, pe, stats):
    B, T, E = x3d.shape
    tt = min(T, 512)
    return pl.pallas_call(
        _bn_selu_pos_kernel,
        out_shape=jax.ShapeDtypeStruct((B, T, E), F32),
        grid=(B, pl.cdiv(T, tt)),
        in_specs=[pl.BlockSpec((1, tt, E), lambda b, t: (b, t, 0)),
                  pl.BlockSpec((tt, E), lambda b, t: (t, 0)),
                  pl.BlockSpec(memory_space=pltpu.MemorySpace.SMEM)],
        out_specs=pl.BlockSpec((1, tt, E), lambda b, t: (b, t, 0)),
        compiler_params=pltpu.CompilerParams(
            dimension_semantics=("parallel", "parallel")),
    )(x3d, pe, stats)


# --------------------------------------------------------------------------
# Depthwise 1-D conv over time + per-program partial BatchNorm1d statistics
# (sum / sum-of-squares), reduced afterwards in XLA so the grid stays parallel.
# --------------------------------------------------------------------------

def _dwconv_stats_kernel(x_ref, w_ref, b_ref, o_ref, st_ref, *, n, ksize):
    x = x_ref[0]                                    # (n + ksize - 1, C)
    acc = jnp.zeros((n, x.shape[1]), jnp.float32)
    for k in range(ksize):                          # static K-tap loop (VPU)
        acc = acc + x[k:k + n, :].astype(jnp.float32) * w_ref[k:k + 1, :]
    y = acc + b_ref[...]
    o_ref[0] = y
    st_ref[0] = jnp.concatenate(
        [jnp.sum(y, axis=0, keepdims=True),
         jnp.sum(y * y, axis=0, keepdims=True)], axis=0)


def depthwise_conv_stats(x_padded, w, b, n):
    B, n_pad, C = x_padded.shape
    K = w.shape[0]
    return pl.pallas_call(
        functools.partial(_dwconv_stats_kernel, n=n, ksize=K),
        out_shape=(jax.ShapeDtypeStruct((B, n, C), F32),
                   jax.ShapeDtypeStruct((B, 2, C), F32)),
        grid=(B,),
        in_specs=[pl.BlockSpec((1, n_pad, C), lambda i: (i, 0, 0)),
                  pl.BlockSpec((K, C), lambda i: (0, 0)),
                  pl.BlockSpec((1, C), lambda i: (0, 0))],
        out_specs=(pl.BlockSpec((1, n, C), lambda i: (i, 0, 0)),
                   pl.BlockSpec((1, 2, C), lambda i: (i, 0, 0))),
        compiler_params=pltpu.CompilerParams(
            dimension_semantics=("parallel",)),
    )(x_padded, w, b.reshape(1, C))


# --------------------------------------------------------------------------
# Multi-head self-attention with precomputed Shaw relative-position scores.
# q/k/v stay in (B, n, heads*dh) layout; bias stays in (B, n, H, n) layout
# (no host transpose); heads are looped statically in-kernel.
# --------------------------------------------------------------------------

def _attn_kernel(qkv_ref, bias_ref, o_ref, *, heads, dh, scale):
    x = qkv_ref[0]                                  # (n, 3*d) bf16
    d = heads * dh
    outs = []
    for h in range(heads):                          # static head loop
        q = x[:, h * dh:(h + 1) * dh]
        k = x[:, d + h * dh:d + (h + 1) * dh]
        v = x[:, 2 * d + h * dh:2 * d + (h + 1) * dh]
        dots = lax.dot_general(q, k, (((1,), (1,)), ((), ())),
                               preferred_element_type=jnp.float32)
        bias_h = bias_ref[0, :, h, :].astype(jnp.float32)         # (n, n)
        logits = (dots + bias_h) * scale
        m = jnp.max(logits, axis=-1, keepdims=True)
        p = jnp.exp(logits - m)
        denom = jnp.sum(p, axis=-1, keepdims=True)
        p = p * pl.reciprocal(denom, approx=True)
        outs.append(jnp.dot(p.astype(BF16), v,
                            preferred_element_type=jnp.float32))
    o_ref[0] = jnp.concatenate(outs, axis=-1).astype(o_ref.dtype)


def mhsa(qkv, pos_bias, *, heads, dh, scale):
    # TODO(synk): for long sequences this should be KV-tiled (flash-style) with
    # the relative-position shift applied inside the tile loop, so the
    # (1, n, H, n) bias block and per-head (n, n) logits stay bounded on v7x's
    # 64 MiB VMEM; at the sequence lengths used here full blocks fit.
    B, n, width = qkv.shape
    d = heads * dh
    return pl.pallas_call(
        functools.partial(_attn_kernel, heads=heads, dh=dh, scale=scale),
        out_shape=jax.ShapeDtypeStruct((B, n, d), BF16),
        grid=(B,),
        in_specs=[pl.BlockSpec((1, n, width), lambda b: (b, 0, 0)),
                  pl.BlockSpec((1, n, heads, n), lambda b: (b, 0, 0, 0))],
        out_specs=pl.BlockSpec((1, n, d), lambda b: (b, 0, 0)),
        compiler_params=pltpu.CompilerParams(
            dimension_semantics=("parallel",)),
    )(qkv, pos_bias)


# ----------------------------- parameters / glue -----------------------------

def calc_same_padding(kernel_size):
    pad = kernel_size // 2
    return (pad, pad - (kernel_size + 1) % 2)


def sinusoidal_embedding(n_channels, dim):
    pos = jnp.arange(n_channels, dtype=F32)[:, None]
    i = jnp.arange(dim)
    denom = jnp.power(jnp.float32(10000.0), (2.0 * (i // 2).astype(F32)) / dim)
    pe = pos / denom
    return jnp.where((i % 2) == 0, jnp.sin(pe), jnp.cos(pe)).astype(F32)


def rel_window(n):
    lo = max(0, MAX_POS_EMB - (n - 1))
    hi = min(2 * MAX_POS_EMB, MAX_POS_EMB + (n - 1))
    return lo, hi


def init_params(key, *, in_dim, emb, heads, ff_mult, exp_fac, kernel_size,
                n_encoders):
    dh = emb // heads
    ffd = emb * ff_mult
    cin = emb * exp_fac
    keys = list(jax.random.split(key, 3 + 11 * n_encoders))
    it = iter(keys)

    def nrm(shape, std=0.02):
        return (std * jax.random.normal(next(it), shape)).astype(F32)

    params = {
        "ll_w": nrm((in_dim, emb)), "ll_b": jnp.zeros((emb,), F32),
        "pe": sinusoidal_embedding(10000, emb),
        "class_token": jax.random.uniform(next(it), (1, emb), F32),
        "fc5_w": nrm((emb, 2)), "fc5_b": jnp.zeros((2,), F32),
        "blocks": [],
    }
    for _ in range(n_encoders):
        blk = {
            "ff1_ln_g": jnp.ones((emb,), F32), "ff1_ln_b": jnp.zeros((emb,), F32),
            "ff1_w1": nrm((emb, ffd)), "ff1_b1": jnp.zeros((ffd,), F32),
            "ff1_w2": nrm((ffd, emb)), "ff1_b2": jnp.zeros((emb,), F32),
            "attn_ln_g": jnp.ones((emb,), F32), "attn_ln_b": jnp.zeros((emb,), F32),
            "wq": nrm((emb, emb)),              # to_q (no bias)
            "wkv": nrm((emb, 2 * emb)),         # to_kv (no bias)
            "wo": nrm((emb, emb)), "bo": jnp.zeros((emb,), F32),
            "rel_pos": nrm((2 * MAX_POS_EMB + 1, dh), std=1.0),
            "conv_ln_g": jnp.ones((emb,), F32), "conv_ln_b": jnp.zeros((emb,), F32),
            "pw1_w": nrm((emb, 2 * cin)), "pw1_b": jnp.zeros((2 * cin,), F32),
            "dw_w": nrm((kernel_size, cin)), "dw_b": jnp.zeros((cin,), F32),
            "pw2_w": nrm((cin, emb)), "pw2_b": jnp.zeros((emb,), F32),
            "ff2_ln_g": jnp.ones((emb,), F32), "ff2_ln_b": jnp.zeros((emb,), F32),
            "ff2_w1": nrm((emb, ffd)), "ff2_b1": jnp.zeros((ffd,), F32),
            "ff2_w2": nrm((ffd, emb)), "ff2_b2": jnp.zeros((emb,), F32),
            "post_ln_g": jnp.ones((emb,), F32), "post_ln_b": jnp.zeros((emb,), F32),
        }
        params["blocks"].append(blk)
    return params


def prepare_params(params, *, n, heads):
    """One-time, per-sequence-length parameter prep: bf16 weight casts plus the
    Shaw rel-pos table folded into extra columns of the fused q/k/v projection
    weight (W_s = Wq @ rel_used.T), so nothing parameter-only runs per forward."""
    prep = {
        "ll_w": params["ll_w"].astype(BF16), "ll_b": params["ll_b"],
        "pe": params["pe"], "class_token": params["class_token"],
        "fc5_w": params["fc5_w"], "fc5_b": params["fc5_b"],
        "blocks": [],
    }
    for p in params["blocks"]:
        d = p["wq"].shape[0]
        dh = d // heads
        lo, hi = rel_window(n)
        ru = hi - lo + 1
        rel_used = p["rel_pos"][lo:hi + 1]                         # (ru, dh)
        w_s = jnp.einsum("khd,rd->khr", p["wq"].reshape(d, heads, dh),
                         rel_used).reshape(d, heads * ru)
        w_qkvr = jnp.concatenate([p["wq"], p["wkv"], w_s], axis=1)
        blk = {
            "ff1_ln_g": p["ff1_ln_g"], "ff1_ln_b": p["ff1_ln_b"],
            "ff1_w1": p["ff1_w1"].astype(BF16), "ff1_b1": p["ff1_b1"],
            "ff1_w2": p["ff1_w2"].astype(BF16), "ff1_b2": p["ff1_b2"],
            "attn_ln_g": p["attn_ln_g"], "attn_ln_b": p["attn_ln_b"],
            "w_qkvr": w_qkvr.astype(BF16),
            "qkvr_b": jnp.zeros((w_qkvr.shape[1],), F32),
            "wo": p["wo"].astype(BF16), "bo": p["bo"],
            "conv_ln_g": p["conv_ln_g"], "conv_ln_b": p["conv_ln_b"],
            "pw1_w": p["pw1_w"].astype(BF16), "pw1_b": p["pw1_b"],
            "dw_w": p["dw_w"], "dw_b": p["dw_b"],
            "pw2_w": p["pw2_w"].astype(BF16), "pw2_b": p["pw2_b"],
            "ff2_ln_g": p["ff2_ln_g"], "ff2_ln_b": p["ff2_ln_b"],
            "ff2_w1": p["ff2_w1"].astype(BF16), "ff2_b1": p["ff2_b1"],
            "ff2_w2": p["ff2_w2"].astype(BF16), "ff2_b2": p["ff2_b2"],
            "post_ln_g": p["post_ln_g"], "post_ln_b": p["post_ln_b"],
        }
        prep["blocks"].append(blk)
    return prep


def conformer_block(x2d, p, *, B, n, heads, kernel_size):
    d = x2d.shape[1]
    dh = d // heads
    scale = dh ** -0.5
    lo, hi = rel_window(n)
    ru = hi - lo + 1
    assert p["w_qkvr"].shape[1] == 3 * d + heads * ru, (
        "prepare_params was built for a different sequence length")

    # --- FeedForward 1 (pre-norm, half-step residual), LN fused into W1 ---
    h = fused_linear(x2d, p["ff1_w1"], p["ff1_b1"], pre="ln",
                     pre_params=(p["ff1_ln_g"], p["ff1_ln_b"]), act="silu",
                     out_dtype=BF16)
    x2d = fused_linear(h, p["ff1_w2"], p["ff1_b2"],
                       residual=x2d, res_scale=0.5)

    # --- MHSA (pre-norm): q, k, v and the Shaw rel-pos scores all come out of
    # one fused MXU matmul (rel table folded into w_qkvr at prep time). -------
    proj = fused_linear(x2d, p["w_qkvr"], p["qkvr_b"], pre="ln",
                        pre_params=(p["attn_ln_g"], p["attn_ln_b"]),
                        tm=PROJ_ROW_TILE, out_dtype=BF16)
    qkv = proj[:, :3 * d].reshape(B, n, 3 * d)                 # bf16
    s = proj[:, 3 * d:].reshape(B, n, heads, ru)               # q . rel scores

    # Per-distance scores -> per-(i, j) bias.  Gather stays in (B, n, H, n)
    # layout (bf16, no transpose); the attention kernel slices per head.
    seq = jnp.arange(n)
    dist = jnp.clip(seq[:, None] - seq[None, :], -MAX_POS_EMB,
                    MAX_POS_EMB) + MAX_POS_EMB - lo            # (n, n) in [0, ru)
    idx = jnp.broadcast_to(dist[None, :, None, :], (B, n, heads, n))
    pos_bias = jnp.take_along_axis(s, idx, axis=-1)            # (B, n, H, n)

    ao = mhsa(qkv, pos_bias, heads=heads, dh=dh, scale=scale)  # (B, n, d) bf16
    x2d = fused_linear(ao.reshape(B * n, d), p["wo"], p["bo"],
                       residual=x2d, res_scale=1.0)

    # --- Convolution module --------------------------------------------------
    h = fused_linear(x2d, p["pw1_w"], p["pw1_b"], pre="ln",
                     pre_params=(p["conv_ln_g"], p["conv_ln_b"]), act="glu",
                     out_dtype=BF16)
    cin = h.shape[1]
    pad_l, pad_r = calc_same_padding(kernel_size)
    h3 = jnp.pad(h.reshape(B, n, cin), ((0, 0), (pad_l, pad_r), (0, 0)))
    conv, stats = depthwise_conv_stats(h3, p["dw_w"], p["dw_b"], n)
    ssum = jnp.sum(stats, axis=0)                              # (2, cin)
    cnt = jnp.float32(B * n)
    mean = ssum[0] / cnt
    var = ssum[1] / cnt - mean * mean
    inv = lax.rsqrt(var + BN_EPS)
    # BatchNorm1d apply + Swish + pointwise-conv-2 + residual, all fused.
    x2d = fused_linear(conv.reshape(B * n, cin), p["pw2_w"], p["pw2_b"],
                       pre="affine", pre_params=(inv, -mean * inv),
                       pre_act="swish", residual=x2d, res_scale=1.0)

    # --- FeedForward 2 + post-norm (post-LN fused into the residual store) ---
    h = fused_linear(x2d, p["ff2_w1"], p["ff2_b1"], pre="ln",
                     pre_params=(p["ff2_ln_g"], p["ff2_ln_b"]), act="silu",
                     out_dtype=BF16)
    x2d = fused_linear(h, p["ff2_w2"], p["ff2_b2"],
                       residual=x2d, res_scale=0.5,
                       post_ln=(p["post_ln_g"], p["post_ln_b"]))
    return x2d


def model_forward(ssl_feat, params, *, heads, kernel_size):
    # TODO(synk): SSLModel (fairseq wav2vec2 XLSR-300M checkpoint load) has no
    # in-script equivalent; the kernels consume its (B, T, 1024) feature output.
    B, T, Fdim = ssl_feat.shape
    emb = params["ll_w"].shape[1]

    y = fused_linear(ssl_feat.reshape(B * T, Fdim),
                     params["ll_w"], params["ll_b"])           # LL projection
    # first_bn = BatchNorm2d(1), batch statistics over every element of the
    # single channel (cheap XLA reduction); normalize + SELU + positional-
    # embedding add fused in one Pallas pass (scalars via SMEM).
    mean = jnp.mean(y)
    inv = lax.rsqrt(jnp.var(y) + BN_EPS)
    stats = jnp.stack([mean, inv])                             # (2,) f32
    pe = params["pe"][:T]                                      # (T, emb)
    x = bn2d_selu_posadd(y.reshape(B, T, emb), pe, stats)      # (B, T, emb)

    cls = jnp.broadcast_to(params["class_token"], (B, 1, emb))
    x = jnp.concatenate([cls, x], axis=1)                      # (B, T+1, emb)
    n = T + 1
    x2d = x.reshape(B * n, emb)
    for blk in params["blocks"]:
        x2d = conformer_block(x2d, blk, B=B, n=n, heads=heads,
                              kernel_size=kernel_size)
    x = x2d.reshape(B, n, emb)
    embedding = x[:, 0, :]
    out = embedding @ params["fc5_w"] + params["fc5_b"]        # fc5: plain XLA
    return out, None


if __name__ == "__main__":
    B, T, IN_DIM = 2, 8, 1024
    # emb=128 is the module default and keeps every row-kernel output lane-dense.
    EMB, HEADS, FF_MULT, EXP_FAC, KSIZE, N_ENC = 128, 4, 4, 2, 16, 1

    key = jax.random.PRNGKey(0)
    kp, kx = jax.random.split(key)
    raw_params = init_params(kp, in_dim=IN_DIM, emb=EMB, heads=HEADS,
                             ff_mult=FF_MULT, exp_fac=EXP_FAC,
                             kernel_size=KSIZE, n_encoders=N_ENC)
    # One-time prep (outside jit): bf16 weights + rel-pos folding for n = T + 1.
    params = prepare_params(raw_params, n=T + 1, heads=HEADS)

    # input: SSL feature stand-in, layout (batch, time, feature)
    ssl_feat = jax.random.normal(kx, (B, T, IN_DIM), F32)

    fwd = jax.jit(functools.partial(model_forward, heads=HEADS,
                                    kernel_size=KSIZE))
    out, attn = fwd(ssl_feat, params)
    out = jax.block_until_ready(out)
    assert out.shape == (B, 2) and attn is None
    print("KERNEL_OK")
</pallas_src>

<mosaic_0001>
module attributes {stable_mosaic.version = 11 : i64} {
  func.func @_fused_linear_kernel(%arg0: i32, %arg1: memref<16x1024xf32, #tpu.memory_space<vmem>>, %arg2: memref<1024x128xbf16, #tpu.memory_space<vmem>>, %arg3: memref<1x128xf32, #tpu.memory_space<vmem>>, %arg4: memref<16x128xf32, #tpu.memory_space<vmem>>) attributes {dimension_semantics = [#tpu.dimension_semantics<parallel>], iteration_bounds = array<i64: 1>, scalar_prefetch = 0 : i64, scratch_operands = 0 : i64, tpu.core_type = #tpu.core_type<tc>, window_params = [{transform_indices = @transform_0, window_bounds = array<i64: 16, 1024>}, {pipeline_mode = #tpu.pipeline_mode<synchronous>, transform_indices = @transform_1, window_bounds = array<i64: 1024, 128>}, {pipeline_mode = #tpu.pipeline_mode<synchronous>, transform_indices = @transform_2, window_bounds = array<i64: 1, 128>}, {transform_indices = @transform_3, window_bounds = array<i64: 16, 128>}]} {
    %c0 = arith.constant 0 : index
    %c0_0 = arith.constant 0 : index
    %0 = vector.load %arg1[%c0, %c0_0] : memref<16x1024xf32, #tpu.memory_space<vmem>>, vector<16x1024xf32>
    %1 = arith.truncf %0 : vector<16x1024xf32> to vector<16x1024xbf16>
    %c0_1 = arith.constant 0 : index
    %c0_2 = arith.constant 0 : index
    %2 = vector.load %arg2[%c0_1, %c0_2] : memref<1024x128xbf16, #tpu.memory_space<vmem>>, vector<1024x128xbf16>
    %cst = arith.constant dense<0.000000e+00> : vector<16x128xf32>
    %3 = tpu.matmul %1, %2, %cst {dimension_numbers = #tpu.dot_dimension_numbers<[1], [0], [0], [1], [0, 0, 1, 1], [], []>} : vector<16x1024xbf16>, vector<1024x128xbf16>, vector<16x128xf32> -> vector<16x128xf32>
    %c0_3 = arith.constant 0 : index
    %c0_4 = arith.constant 0 : index
    %4 = vector.load %arg3[%c0_3, %c0_4] : memref<1x128xf32, #tpu.memory_space<vmem>>, vector<1x128xf32>
    %5 = vector.broadcast %4 : vector<1x128xf32> to vector<16x128xf32>
    %6 = arith.addf %3, %5 : vector<16x128xf32>
    %c0_5 = arith.constant 0 : index
    %c0_6 = arith.constant 0 : index
    %7 = vector.load %arg4[%c0_5, %c0_6] : memref<16x128xf32, #tpu.memory_space<vmem>>, vector<16x128xf32>
    tpu.vector_store %arg4[%c0_5, %c0_6], %6 {strides = array<i32>} : memref<16x128xf32, #tpu.memory_space<vmem>>, vector<16x128xf32>,
    return
  }
  func.func @transform_0(%arg0: i32) -> (i32, i32) {
    %c0_i32 = arith.constant 0 : i32
    %c0_i32_0 = arith.constant 0 : i32
    return %arg0, %c0_i32 : i32, i32
  }
  func.func @transform_1(%arg0: i32) -> (i32, i32) {
    %c0_i32 = arith.constant 0 : i32
    %c0_i32_0 = arith.constant 0 : i32
    %c0_i32_1 = arith.constant 0 : i32
    return %c0_i32, %c0_i32_0 : i32, i32
  }
  func.func @transform_2(%arg0: i32) -> (i32, i32) {
    %c0_i32 = arith.constant 0 : i32
    %c0_i32_0 = arith.constant 0 : i32
    %c0_i32_1 = arith.constant 0 : i32
    return %c0_i32, %c0_i32_0 : i32, i32
  }
  func.func @transform_3(%arg0: i32) -> (i32, i32) {
    %c0_i32 = arith.constant 0 : i32
    %c0_i32_0 = arith.constant 0 : i32
    return %arg0, %c0_i32 : i32, i32
  }
}

module attributes {stable_mosaic.version = 11 : i64} {
  func.func @_bn_selu_pos_kernel(%arg0: i32, %arg1: i32, %arg2: memref<1x8x128xf32, #tpu.memory_space<vmem>>, %arg3: memref<8x128xf32, #tpu.memory_space<vmem>>, %arg4: memref<2xf32, #tpu.memory_space<smem>>, %arg5: memref<1x8x128xf32, #tpu.memory_space<vmem>>) attributes {dimension_semantics = [#tpu.dimension_semantics<parallel>, #tpu.dimension_semantics<parallel>], iteration_bounds = array<i64: 2, 1>, scalar_prefetch = 0 : i64, scratch_operands = 0 : i64, tpu.core_type = #tpu.core_type<tc>, window_params = [{transform_indices = @transform_0, window_bounds = array<i64: 1, 8, 128>}, {transform_indices = @transform_1, window_bounds = array<i64: 8, 128>}, {transform_indices = @transform_2, window_bounds = array<i64: 2>}, {transform_indices = @transform_3, window_bounds = array<i64: 1, 8, 128>}]} {
    %c0 = arith.constant 0 : index
    %0 = memref.load %arg4[%c0] : memref<2xf32, #tpu.memory_space<smem>>
    %c1 = arith.constant 1 : index
    %1 = memref.load %arg4[%c1] : memref<2xf32, #tpu.memory_space<smem>>
    %c0_0 = arith.constant 0 : index
    %c0_1 = arith.constant 0 : index
    %c0_2 = arith.constant 0 : index
    %2 = vector.load %arg2[%c0_0, %c0_1, %c0_2] : memref<1x8x128xf32, #tpu.memory_space<vmem>>, vector<1x8x128xf32>
    %3 = vector.broadcast %0 : f32 to vector<1x8x128xf32>
    %4 = arith.subf %2, %3 : vector<1x8x128xf32>
    %5 = vector.broadcast %1 : f32 to vector<1x8x128xf32>
    %6 = arith.mulf %4, %5 : vector<1x8x128xf32>
    %cst = arith.constant 0.000000e+00 : f32
    %7 = vector.broadcast %cst : f32 to vector<1x8x128xf32>
    %8 = arith.cmpf ogt, %6, %7 : vector<1x8x128xf32>
    %cst_3 = arith.constant 0.000000e+00 : f32
    %9 = vector.broadcast %cst_3 : f32 to vector<1x8x128xf32>
    %10 = arith.minimumf %6, %9 : vector<1x8x128xf32>
    %11 = math.exp %10 : vector<1x8x128xf32>
    %cst_4 = arith.constant 1.000000e+00 : f32
    %12 = vector.broadcast %cst_4 : f32 to vector<1x8x128xf32>
    %13 = arith.subf %11, %12 : vector<1x8x128xf32>
    %cst_5 = arith.constant 1.67326319 : f32
    %14 = vector.broadcast %cst_5 : f32 to vector<1x8x128xf32>
    %15 = arith.mulf %14, %13 : vector<1x8x128xf32>
    %16 = arith.select %8, %6, %15 : vector<1x8x128xi1>, vector<1x8x128xf32>
    %cst_6 = arith.constant 1.05070102 : f32
    %17 = vector.broadcast %cst_6 : f32 to vector<1x8x128xf32>
    %18 = arith.mulf %17, %16 : vector<1x8x128xf32>
    %c0_7 = arith.constant 0 : index
    %c0_8 = arith.constant 0 : index
    %19 = vector.load %arg3[%c0_7, %c0_8] : memref<8x128xf32, #tpu.memory_space<vmem>>, vector<8x128xf32>
    %20 = vector.shape_cast %19 : vector<8x128xf32> to vector<1x8x128xf32>
    %21 = arith.addf %18, %20 : vector<1x8x128xf32>
    %c0_9 = arith.constant 0 : index
    %c0_10 = arith.constant 0 : index
    %c0_11 = arith.constant 0 : index
    %22 = vector.load %arg5[%c0_9, %c0_10, %c0_11] : memref<1x8x128xf32, #tpu.memory_space<vmem>>, vector<1x8x128xf32>
    tpu.vector_store %arg5[%c0_9, %c0_10, %c0_11], %21 {strides = array<i32>} : memref<1x8x128xf32, #tpu.memory_space<vmem>>, vector<1x8x128xf32>,
    return
  }
  func.func @transform_0(%arg0: i32, %arg1: i32) -> (i32, i32, i32) {
    %c0_i32 = arith.constant 0 : i32
    %c0_i32_0 = arith.constant 0 : i32
    return %arg0, %arg1, %c0_i32 : i32, i32, i32
  }
  func.func @transform_1(%arg0: i32, %arg1: i32) -> (i32, i32) {
    %c0_i32 = arith.constant 0 : i32
    %c0_i32_0 = arith.constant 0 : i32
    return %arg1, %c0_i32 : i32, i32
  }
  func.func @transform_2(%arg0: i32, %arg1: i32) -> i32 {
    %c0_i32 = arith.constant 0 : i32
    %c0_i32_0 = arith.constant 0 : i32
    return %c0_i32 : i32
  }
  func.func @transform_3(%arg0: i32, %arg1: i32) -> (i32, i32, i32) {
    %c0_i32 = arith.constant 0 : i32
    %c0_i32_0 = arith.constant 0 : i32
    return %arg0, %arg1, %c0_i32 : i32, i32, i32
  }
}

module attributes {stable_mosaic.version = 11 : i64} {
  func.func @_fused_linear_kernel(%arg0: i32, %arg1: memref<18x128xf32, #tpu.memory_space<vmem>>, %arg2: memref<1x128xf32, #tpu.memory_space<vmem>>, %arg3: memref<1x128xf32, #tpu.memory_space<vmem>>, %arg4: memref<128x512xbf16, #tpu.memory_space<vmem>>, %arg5: memref<1x512xf32, #tpu.memory_space<vmem>>, %arg6: memref<18x512xbf16, #tpu.memory_space<vmem>>) attributes {dimension_semantics = [#tpu.dimension_semantics<parallel>], iteration_bounds = array<i64: 1>, scalar_prefetch = 0 : i64, scratch_operands = 0 : i64, tpu.core_type = #tpu.core_type<tc>, window_params = [{transform_indices = @transform_0, window_bounds = array<i64: 18, 128>}, {pipeline_mode = #tpu.pipeline_mode<synchronous>, transform_indices = @transform_1, window_bounds = array<i64: 1, 128>}, {pipeline_mode = #tpu.pipeline_mode<synchronous>, transform_indices = @transform_2, window_bounds = array<i64: 1, 128>}, {pipeline_mode = #tpu.pipeline_mode<synchronous>, transform_indices = @transform_3, window_bounds = array<i64: 128, 512>}, {pipeline_mode = #tpu.pipeline_mode<synchronous>, transform_indices = @transform_4, window_bounds = array<i64: 1, 512>}, {transform_indices = @transform_5, window_bounds = array<i64: 18, 512>}]} {
    %c0 = arith.constant 0 : index
    %c0_0 = arith.constant 0 : index
    %0 = vector.load %arg1[%c0, %c0_0] : memref<18x128xf32, #tpu.memory_space<vmem>>, vector<18x128xf32>
    %cst = arith.constant dense<0.000000e+00> : vector<18xf32>
    %1 = vector.multi_reduction <add>, %0, %cst [1] : vector<18x128xf32> to vector<18xf32>
    %2 = vector.shape_cast %1 : vector<18xf32> to vector<18x1xf32>
    %cst_1 = arith.constant 1.280000e+02 : f32
    %3 = vector.broadcast %cst_1 : f32 to vector<18x1xf32>
    %4 = arith.divf %2, %3 : vector<18x1xf32>
    %5 = vector.broadcast %4 : vector<18x1xf32> to vector<18x128xf32>
    %6 = arith.subf %0, %5 : vector<18x128xf32>
    %7 = arith.mulf %6, %6 : vector<18x128xf32>
    %cst_2 = arith.constant dense<0.000000e+00> : vector<18xf32>
    %8 = vector.multi_reduction <add>, %7, %cst_2 [1] : vector<18x128xf32> to vector<18xf32>
    %9 = vector.shape_cast %8 : vector<18xf32> to vector<18x1xf32>
    %cst_3 = arith.constant 1.280000e+02 : f32
    %10 = vector.broadcast %cst_3 : f32 to vector<18x1xf32>
    %11 = arith.divf %9, %10 : vector<18x1xf32>
    %12 = vector.broadcast %4 : vector<18x1xf32> to vector<18x128xf32>
    %13 = arith.subf %0, %12 : vector<18x128xf32>
    %cst_4 = arith.constant 9.99999974E-6 : f32
    %14 = vector.broadcast %cst_4 : f32 to vector<18x1xf32>
    %15 = arith.addf %11, %14 : vector<18x1xf32>
    %16 = math.rsqrt %15 : vector<18x1xf32>
    %17 = vector.broadcast %16 : vector<18x1xf32> to vector<18x128xf32>
    %18 = arith.mulf %13, %17 : vector<18x128xf32>
    %c0_5 = arith.constant 0 : index
    %c0_6 = arith.constant 0 : index
    %19 = vector.load %arg2[%c0_5, %c0_6] : memref<1x128xf32, #tpu.memory_space<vmem>>, vector<1x128xf32>
    %20 = vector.broadcast %19 : vector<1x128xf32> to vector<18x128xf32>
    %21 = arith.mulf %18, %20 : vector<18x128xf32>
    %c0_7 = arith.constant 0 : index
    %c0_8 = arith.constant 0 : index
    %22 = vector.load %arg3[%c0_7, %c0_8] : memref<1x128xf32, #tpu.memory_space<vmem>>, vector<1x128xf32>
    %23 = vector.broadcast %22 : vector<1x128xf32> to vector<18x128xf32>
    %24 = arith.addf %21, %23 : vector<18x128xf32>
    %25 = arith.truncf %24 : vector<18x128xf32> to vector<18x128xbf16>
    %c0_9 = arith.constant 0 : index
    %c0_10 = arith.constant 0 : index
    %26 = vector.load %arg4[%c0_9, %c0_10] : memref<128x512xbf16, #tpu.memory_space<vmem>>, vector<128x512xbf16>
    %cst_11 = arith.constant dense<0.000000e+00> : vector<18x512xf32>
    %27 = tpu.matmul %25, %26, %cst_11 {dimension_numbers = #tpu.dot_dimension_numbers<[1], [0], [0], [1], [0, 0, 1, 1], [], []>} : vector<18x128xbf16>, vector<128x512xbf16>, vector<18x512xf32> -> vector<18x512xf32>
    %c0_12 = arith.constant 0 : index
    %c0_13 = arith.constant 0 : index
    %28 = vector.load %arg5[%c0_12, %c0_13] : memref<1x512xf32, #tpu.memory_space<vmem>>, vector<1x512xf32>
    %29 = vector.broadcast %28 : vector<1x512xf32> to vector<18x512xf32>
    %30 = arith.addf %27, %29 : vector<18x512xf32>
    %31 = arith.negf %30 : vector<18x512xf32>
    %32 = math.exp %31 : vector<18x512xf32>
    %cst_14 = arith.constant 1.000000e+00 : f32
    %33 = vector.broadcast %cst_14 : f32 to vector<18x512xf32>
    %34 = arith.addf %33, %32 : vector<18x512xf32>
    %35 = arith.divf %33, %34 : vector<18x512xf32>
    %36 = arith.mulf %30, %35 : vector<18x512xf32>
    %37 = arith.truncf %36 : vector<18x512xf32> to vector<18x512xbf16>
    %c0_15 = arith.constant 0 : index
    %c0_16 = arith.constant 0 : index
    %38 = vector.load %arg6[%c0_15, %c0_16] : memref<18x512xbf16, #tpu.memory_space<vmem>>, vector<18x512xbf16>
    tpu.vector_store %arg6[%c0_15, %c0_16], %37 {strides = array<i32>} : memref<18x512xbf16, #tpu.memory_space<vmem>>, vector<18x512xbf16>,
    return
  }
  func.func @transform_0(%arg0: i32) -> (i32, i32) {
    %c0_i32 = arith.constant 0 : i32
    %c0_i32_0 = arith.constant 0 : i32
    return %arg0, %c0_i32 : i32, i32
  }
  func.func @transform_1(%arg0: i32) -> (i32, i32) {
    %c0_i32 = arith.constant 0 : i32
    %c0_i32_0 = arith.constant 0 : i32
    %c0_i32_1 = arith.constant 0 : i32
    return %c0_i32, %c0_i32_0 : i32, i32
  }
  func.func @transform_2(%arg0: i32) -> (i32, i32) {
    %c0_i32 = arith.constant 0 : i32
    %c0_i32_0 = arith.constant 0 : i32
    %c0_i32_1 = arith.constant 0 : i32
    return %c0_i32, %c0_i32_0 : i32, i32
  }
  func.func @transform_3(%arg0: i32) -> (i32, i32) {
    %c0_i32 = arith.constant 0 : i32
    %c0_i32_0 = arith.constant 0 : i32
    %c0_i32_1 = arith.constant 0 : i32
    return %c0_i32, %c0_i32_0 : i32, i32
  }
  func.func @transform_4(%arg0: i32) -> (i32, i32) {
    %c0_i32 = arith.constant 0 : i32
    %c0_i32_0 = arith.constant 0 : i32
    %c0_i32_1 = arith.constant 0 : i32
    return %c0_i32, %c0_i32_0 : i32, i32
  }
  func.func @transform_5(%arg0: i32) -> (i32, i32) {
    %c0_i32 = arith.constant 0 : i32
    %c0_i32_0 = arith.constant 0 : i32
    return %arg0, %c0_i32 : i32, i32
  }
}

module attributes {stable_mosaic.version = 11 : i64} {
  func.func @_fused_linear_kernel(%arg0: i32, %arg1: memref<18x512xbf16, #tpu.memory_space<vmem>>, %arg2: memref<512x128xbf16, #tpu.memory_space<vmem>>, %arg3: memref<1x128xf32, #tpu.memory_space<vmem>>, %arg4: memref<18x128xf32, #tpu.memory_space<vmem>>, %arg5: memref<18x128xf32, #tpu.memory_space<vmem>>) attributes {dimension_semantics = [#tpu.dimension_semantics<parallel>], iteration_bounds = array<i64: 1>, scalar_prefetch = 0 : i64, scratch_operands = 0 : i64, tpu.core_type = #tpu.core_type<tc>, window_params = [{transform_indices = @transform_0, window_bounds = array<i64: 18, 512>}, {pipeline_mode = #tpu.pipeline_mode<synchronous>, transform_indices = @transform_1, window_bounds = array<i64: 512, 128>}, {pipeline_mode = #tpu.pipeline_mode<synchronous>, transform_indices = @transform_2, window_bounds = array<i64: 1, 128>}, {transform_indices = @transform_3, window_bounds = array<i64: 18, 128>}, {transform_indices = @transform_4, window_bounds = array<i64: 18, 128>}]} {
    %c0 = arith.constant 0 : index
    %c0_0 = arith.constant 0 : index
    %0 = vector.load %arg1[%c0, %c0_0] : memref<18x512xbf16, #tpu.memory_space<vmem>>, vector<18x512xbf16>
    %c0_1 = arith.constant 0 : index
    %c0_2 = arith.constant 0 : index
    %1 = vector.load %arg2[%c0_1, %c0_2] : memref<512x128xbf16, #tpu.memory_space<vmem>>, vector<512x128xbf16>
    %cst = arith.constant dense<0.000000e+00> : vector<18x128xf32>
    %2 = tpu.matmul %0, %1, %cst {dimension_numbers = #tpu.dot_dimension_numbers<[1], [0], [0], [1], [0, 0, 1, 1], [], []>} : vector<18x512xbf16>, vector<512x128xbf16>, vector<18x128xf32> -> vector<18x128xf32>
    %c0_3 = arith.constant 0 : index
    %c0_4 = arith.constant 0 : index
    %3 = vector.load %arg3[%c0_3, %c0_4] : memref<1x128xf32, #tpu.memory_space<vmem>>, vector<1x128xf32>
    %4 = vector.broadcast %3 : vector<1x128xf32> to vector<18x128xf32>
    %5 = arith.addf %2, %4 : vector<18x128xf32>
    %c0_5 = arith.constant 0 : index
    %c0_6 = arith.constant 0 : index
    %6 = vector.load %arg4[%c0_5, %c0_6] : memref<18x128xf32, #tpu.memory_space<vmem>>, vector<18x128xf32>
    %cst_7 = arith.constant 5.000000e-01 : f32
    %7 = vector.broadcast %cst_7 : f32 to vector<18x128xf32>
    %8 = arith.mulf %7, %5 : vector<18x128xf32>
    %9 = arith.addf %6, %8 : vector<18x128xf32>
    %c0_8 = arith.constant 0 : index
    %c0_9 = arith.constant 0 : index
    %10 = vector.load %arg5[%c0_8, %c0_9] : memref<18x128xf32, #tpu.memory_space<vmem>>, vector<18x128xf32>
    tpu.vector_store %arg5[%c0_8, %c0_9], %9 {strides = array<i32>} : memref<18x128xf32, #tpu.memory_space<vmem>>, vector<18x128xf32>,
    return
  }
  func.func @transform_0(%arg0: i32) -> (i32, i32) {
    %c0_i32 = arith.constant 0 : i32
    %c0_i32_0 = arith.constant 0 : i32
    return %arg0, %c0_i32 : i32, i32
  }
  func.func @transform_1(%arg0: i32) -> (i32, i32) {
    %c0_i32 = arith.constant 0 : i32
    %c0_i32_0 = arith.constant 0 : i32
    %c0_i32_1 = arith.constant 0 : i32
    return %c0_i32, %c0_i32_0 : i32, i32
  }
  func.func @transform_2(%arg0: i32) -> (i32, i32) {
    %c0_i32 = arith.constant 0 : i32
    %c0_i32_0 = arith.constant 0 : i32
    %c0_i32_1 = arith.constant 0 : i32
    return %c0_i32, %c0_i32_0 : i32, i32
  }
  func.func @transform_3(%arg0: i32) -> (i32, i32) {
    %c0_i32 = arith.constant 0 : i32
    %c0_i32_0 = arith.constant 0 : i32
    return %arg0, %c0_i32 : i32, i32
  }
  func.func @transform_4(%arg0: i32) -> (i32, i32) {
    %c0_i32 = arith.constant 0 : i32
    %c0_i32_0 = arith.constant 0 : i32
    return %arg0, %c0_i32 : i32, i32
  }
}

module attributes {stable_mosaic.version = 11 : i64} {
  func.func @_fused_linear_kernel(%arg0: i32, %arg1: memref<18x128xf32, #tpu.memory_space<vmem>>, %arg2: memref<1x128xf32, #tpu.memory_space<vmem>>, %arg3: memref<1x128xf32, #tpu.memory_space<vmem>>, %arg4: memref<128x452xbf16, #tpu.memory_space<vmem>>, %arg5: memref<1x452xf32, #tpu.memory_space<vmem>>, %arg6: memref<18x452xbf16, #tpu.memory_space<vmem>>) attributes {dimension_semantics = [#tpu.dimension_semantics<parallel>], iteration_bounds = array<i64: 1>, scalar_prefetch = 0 : i64, scratch_operands = 0 : i64, tpu.core_type = #tpu.core_type<tc>, window_params = [{transform_indices = @transform_0, window_bounds = array<i64: 18, 128>}, {pipeline_mode = #tpu.pipeline_mode<synchronous>, transform_indices = @transform_1, window_bounds = array<i64: 1, 128>}, {pipeline_mode = #tpu.pipeline_mode<synchronous>, transform_indices = @transform_2, window_bounds = array<i64: 1, 128>}, {pipeline_mode = #tpu.pipeline_mode<synchronous>, transform_indices = @transform_3, window_bounds = array<i64: 128, 452>}, {pipeline_mode = #tpu.pipeline_mode<synchronous>, transform_indices = @transform_4, window_bounds = array<i64: 1, 452>}, {transform_indices = @transform_5, window_bounds = array<i64: 18, 452>}]} {
    %c0 = arith.constant 0 : index
    %c0_0 = arith.constant 0 : index
    %0 = vector.load %arg1[%c0, %c0_0] : memref<18x128xf32, #tpu.memory_space<vmem>>, vector<18x128xf32>
    %cst = arith.constant dense<0.000000e+00> : vector<18xf32>
    %1 = vector.multi_reduction <add>, %0, %cst [1] : vector<18x128xf32> to vector<18xf32>
    %2 = vector.shape_cast %1 : vector<18xf32> to vector<18x1xf32>
    %cst_1 = arith.constant 1.280000e+02 : f32
    %3 = vector.broadcast %cst_1 : f32 to vector<18x1xf32>
    %4 = arith.divf %2, %3 : vector<18x1xf32>
    %5 = vector.broadcast %4 : vector<18x1xf32> to vector<18x128xf32>
    %6 = arith.subf %0, %5 : vector<18x128xf32>
    %7 = arith.mulf %6, %6 : vector<18x128xf32>
    %cst_2 = arith.constant dense<0.000000e+00> : vector<18xf32>
    %8 = vector.multi_reduction <add>, %7, %cst_2 [1] : vector<18x128xf32> to vector<18xf32>
    %9 = vector.shape_cast %8 : vector<18xf32> to vector<18x1xf32>
    %cst_3 = arith.constant 1.280000e+02 : f32
    %10 = vector.broadcast %cst_3 : f32 to vector<18x1xf32>
    %11 = arith.divf %9, %10 : vector<18x1xf32>
    %12 = vector.broadcast %4 : vector<18x1xf32> to vector<18x128xf32>
    %13 = arith.subf %0, %12 : vector<18x128xf32>
    %cst_4 = arith.constant 9.99999974E-6 : f32
    %14 = vector.broadcast %cst_4 : f32 to vector<18x1xf32>
    %15 = arith.addf %11, %14 : vector<18x1xf32>
    %16 = math.rsqrt %15 : vector<18x1xf32>
    %17 = vector.broadcast %16 : vector<18x1xf32> to vector<18x128xf32>
    %18 = arith.mulf %13, %17 : vector<18x128xf32>
    %c0_5 = arith.constant 0 : index
    %c0_6 = arith.constant 0 : index
    %19 = vector.load %arg2[%c0_5, %c0_6] : memref<1x128xf32, #tpu.memory_space<vmem>>, vector<1x128xf32>
    %20 = vector.broadcast %19 : vector<1x128xf32> to vector<18x128xf32>
    %21 = arith.mulf %18, %20 : vector<18x128xf32>
    %c0_7 = arith.constant 0 : index
    %c0_8 = arith.constant 0 : index
    %22 = vector.load %arg3[%c0_7, %c0_8] : memref<1x128xf32, #tpu.memory_space<vmem>>, vector<1x128xf32>
    %23 = vector.broadcast %22 : vector<1x128xf32> to vector<18x128xf32>
    %24 = arith.addf %21, %23 : vector<18x128xf32>
    %25 = arith.truncf %24 : vector<18x128xf32> to vector<18x128xbf16>
    %c0_9 = arith.constant 0 : index
    %c0_10 = arith.constant 0 : index
    %26 = vector.load %arg4[%c0_9, %c0_10] : memref<128x452xbf16, #tpu.memory_space<vmem>>, vector<128x452xbf16>
    %cst_11 = arith.constant dense<0.000000e+00> : vector<18x452xf32>
    %27 = tpu.matmul %25, %26, %cst_11 {dimension_numbers = #tpu.dot_dimension_numbers<[1], [0], [0], [1], [0, 0, 1, 1], [], []>} : vector<18x128xbf16>, vector<128x452xbf16>, vector<18x452xf32> -> vector<18x452xf32>
    %c0_12 = arith.constant 0 : index
    %c0_13 = arith.constant 0 : index
    %28 = vector.load %arg5[%c0_12, %c0_13] : memref<1x452xf32, #tpu.memory_space<vmem>>, vector<1x452xf32>
    %29 = vector.broadcast %28 : vector<1x452xf32> to vector<18x452xf32>
    %30 = arith.addf %27, %29 : vector<18x452xf32>
    %31 = arith.truncf %30 : vector<18x452xf32> to vector<18x452xbf16>
    %c0_14 = arith.constant 0 : index
    %c0_15 = arith.constant 0 : index
    %32 = vector.load %arg6[%c0_14, %c0_15] : memref<18x452xbf16, #tpu.memory_space<vmem>>, vector<18x452xbf16>
    tpu.vector_store %arg6[%c0_14, %c0_15], %31 {strides = array<i32>} : memref<18x452xbf16, #tpu.memory_space<vmem>>, vector<18x452xbf16>,
    return
  }
  func.func @transform_0(%arg0: i32) -> (i32, i32) {
    %c0_i32 = arith.constant 0 : i32
    %c0_i32_0 = arith.constant 0 : i32
    return %arg0, %c0_i32 : i32, i32
  }
  func.func @transform_1(%arg0: i32) -> (i32, i32) {
    %c0_i32 = arith.constant 0 : i32
    %c0_i32_0 = arith.constant 0 : i32
    %c0_i32_1 = arith.constant 0 : i32
    return %c0_i32, %c0_i32_0 : i32, i32
  }
  func.func @transform_2(%arg0: i32) -> (i32, i32) {
    %c0_i32 = arith.constant 0 : i32
    %c0_i32_0 = arith.constant 0 : i32
    %c0_i32_1 = arith.constant 0 : i32
    return %c0_i32, %c0_i32_0 : i32, i32
  }
  func.func @transform_3(%arg0: i32) -> (i32, i32) {
    %c0_i32 = arith.constant 0 : i32
    %c0_i32_0 = arith.constant 0 : i32
    %c0_i32_1 = arith.constant 0 : i32
    return %c0_i32, %c0_i32_0 : i32, i32
  }
  func.func @transform_4(%arg0: i32) -> (i32, i32) {
    %c0_i32 = arith.constant 0 : i32
    %c0_i32_0 = arith.constant 0 : i32
    %c0_i32_1 = arith.constant 0 : i32
    return %c0_i32, %c0_i32_0 : i32, i32
  }
  func.func @transform_5(%arg0: i32) -> (i32, i32) {
    %c0_i32 = arith.constant 0 : i32
    %c0_i32_0 = arith.constant 0 : i32
    return %arg0, %c0_i32 : i32, i32
  }
}

module attributes {stable_mosaic.version = 11 : i64} {
  func.func @_attn_kernel(%arg0: i32, %arg1: memref<1x9x384xbf16, #tpu.memory_space<vmem>>, %arg2: memref<1x9x4x9xbf16, #tpu.memory_space<vmem>>, %arg3: memref<1x9x128xbf16, #tpu.memory_space<vmem>>) attributes {dimension_semantics = [#tpu.dimension_semantics<parallel>], iteration_bounds = array<i64: 2>, scalar_prefetch = 0 : i64, scratch_operands = 0 : i64, tpu.core_type = #tpu.core_type<tc>, window_params = [{transform_indices = @transform_0, window_bounds = array<i64: 1, 9, 384>}, {transform_indices = @transform_1, window_bounds = array<i64: 1, 9, 4, 9>}, {transform_indices = @transform_2, window_bounds = array<i64: 1, 9, 128>}]} {
    %c0 = arith.constant 0 : index
    %c0_0 = arith.constant 0 : index
    %c0_1 = arith.constant 0 : index
    %0 = vector.load %arg1[%c0, %c0_0, %c0_1] : memref<1x9x384xbf16, #tpu.memory_space<vmem>>, vector<1x9x384xbf16>
    %1 = vector.shape_cast %0 : vector<1x9x384xbf16> to vector<9x384xbf16>
    %2 = vector.extract_strided_slice %1 {offsets = [0, 0], sizes = [9, 32], strides = [1, 1]} : vector<9x384xbf16> to vector<9x32xbf16>
    %3 = vector.extract_strided_slice %1 {offsets = [0, 128], sizes = [9, 32], strides = [1, 1]} : vector<9x384xbf16> to vector<9x32xbf16>
    %4 = vector.extract_strided_slice %1 {offsets = [0, 256], sizes = [9, 32], strides = [1, 1]} : vector<9x384xbf16> to vector<9x32xbf16>
    %cst = arith.constant dense<0.000000e+00> : vector<9x9xf32>
    %5 = tpu.matmul %2, %3, %cst {dimension_numbers = #tpu.dot_dimension_numbers<[1], [1], [0], [0], [0, 0, 1, 0], [], []>} : vector<9x32xbf16>, vector<9x32xbf16>, vector<9x9xf32> -> vector<9x9xf32>
    %c0_2 = arith.constant 0 : index
    %c0_3 = arith.constant 0 : index
    %c0_4 = arith.constant 0 : index
    %c0_5 = arith.constant 0 : index
    %6 = vector.load %arg2[%c0_2, %c0_3, %c0_4, %c0_5] : memref<1x9x4x9xbf16, #tpu.memory_space<vmem>>, vector<1x9x1x9xbf16>
    %7 = vector.shape_cast %6 : vector<1x9x1x9xbf16> to vector<9x9xbf16>
    %8 = arith.extf %7 : vector<9x9xbf16> to vector<9x9xf32>
    %9 = arith.addf %5, %8 : vector<9x9xf32>
    %cst_6 = arith.constant 0.176776692 : f32
    %10 = vector.broadcast %cst_6 : f32 to vector<9x9xf32>
    %11 = arith.mulf %9, %10 : vector<9x9xf32>
    %cst_7 = arith.constant dense<0xFF800000> : vector<9xf32>
    %12 = vector.multi_reduction <maximumf>, %11, %cst_7 [1] : vector<9x9xf32> to vector<9xf32>
    %13 = vector.shape_cast %12 : vector<9xf32> to vector<9x1xf32>
    %14 = vector.broadcast %13 : vector<9x1xf32> to vector<9x9xf32>
    %15 = arith.subf %11, %14 : vector<9x9xf32>
    %16 = math.exp %15 : vector<9x9xf32>
    %cst_8 = arith.constant dense<0.000000e+00> : vector<9xf32>
    %17 = vector.multi_reduction <add>, %16, %cst_8 [1] : vector<9x9xf32> to vector<9xf32>
    %18 = vector.shape_cast %17 : vector<9xf32> to vector<9x1xf32>
    %19 = tpu.reciprocal %18 {approx = true} : vector<9x1xf32> -> vector<9x1xf32>
    %20 = vector.broadcast %19 : vector<9x1xf32> to vector<9x9xf32>
    %21 = arith.mulf %16, %20 : vector<9x9xf32>
    %22 = arith.truncf %21 : vector<9x9xf32> to vector<9x9xbf16>
    %cst_9 = arith.constant dense<0.000000e+00> : vector<9x32xf32>
    %23 = tpu.matmul %22, %4, %cst_9 {dimension_numbers = #tpu.dot_dimension_numbers<[1], [0], [0], [1], [0, 0, 1, 1], [], []>} : vector<9x9xbf16>, vector<9x32xbf16>, vector<9x32xf32> -> vector<9x32xf32>
    %24 = vector.extract_strided_slice %1 {offsets = [0, 32], sizes = [9, 32], strides = [1, 1]} : vector<9x384xbf16> to vector<9x32xbf16>
    %25 = vector.extract_strided_slice %1 {offsets = [0, 160], sizes = [9, 32], strides = [1, 1]} : vector<9x384xbf16> to vector<9x32xbf16>
    %26 = vector.extract_strided_slice %1 {offsets = [0, 288], sizes = [9, 32], strides = [1, 1]} : vector<9x384xbf16> to vector<9x32xbf16>
    %cst_10 = arith.constant dense<0.000000e+00> : vector<9x9xf32>
    %27 = tpu.matmul %24, %25, %cst_10 {dimension_numbers = #tpu.dot_dimension_numbers<[1], [1], [0], [0], [0, 0, 1, 0], [], []>} : vector<9x32xbf16>, vector<9x32xbf16>, vector<9x9xf32> -> vector<9x9xf32>
    %c0_11 = arith.constant 0 : index
    %c0_12 = arith.constant 0 : index
    %c1 = arith.constant 1 : index
    %c0_13 = arith.constant 0 : index
    %28 = vector.load %arg2[%c0_11, %c0_12, %c1, %c0_13] : memref<1x9x4x9xbf16, #tpu.memory_space<vmem>>, vector<1x9x1x9xbf16>
    %29 = vector.shape_cast %28 : vector<1x9x1x9xbf16> to vector<9x9xbf16>
    %30 = arith.extf %29 : vector<9x9xbf16> to vector<9x9xf32>
    %31 = arith.addf %27, %30 : vector<9x9xf32>
    %cst_14 = arith.constant 0.176776692 : f32
    %32 = vector.broadcast %cst_14 : f32 to vector<9x9xf32>
    %33 = arith.mulf %31, %32 : vector<9x9xf32>
    %cst_15 = arith.constant dense<0xFF800000> : vector<9xf32>
    %34 = vector.multi_reduction <maximumf>, %33, %cst_15 [1] : vector<9x9xf32> to vector<9xf32>
    %35 = vector.shape_cast %34 : vector<9xf32> to vector<9x1xf32>
    %36 = vector.broadcast %35 : vector<9x1xf32> to vector<9x9xf32>
    %37 = arith.subf %33, %36 : vector<9x9xf32>
    %38 = math.exp %37 : vector<9x9xf32>
    %cst_16 = arith.constant dense<0.000000e+00> : vector<9xf32>
    %39 = vector.multi_reduction <add>, %38, %cst_16 [1] : vector<9x9xf32> to vector<9xf32>
    %40 = vector.shape_cast %39 : vector<9xf32> to vector<9x1xf32>
    %41 = tpu.reciprocal %40 {approx = true} : vector<9x1xf32> -> vector<9x1xf32>
    %42 = vector.broadcast %41 : vector<9x1xf32> to vector<9x9xf32>
    %43 = arith.mulf %38, %42 : vector<9x9xf32>
    %44 = arith.truncf %43 : vector<9x9xf32> to vector<9x9xbf16>
    %cst_17 = arith.constant dense<0.000000e+00> : vector<9x32xf32>
    %45 = tpu.matmul %44, %26, %cst_17 {dimension_numbers = #tpu.dot_dimension_numbers<[1], [0], [0], [1], [0, 0, 1, 1], [], []>} : vector<9x9xbf16>, vector<9x32xbf16>, vector<9x32xf32> -> vector<9x32xf32>
    %46 = vector.extract_strided_slice %1 {offsets = [0, 64], sizes = [9, 32], strides = [1, 1]} : vector<9x384xbf16> to vector<9x32xbf16>
    %47 = vector.extract_strided_slice %1 {offsets = [0, 192], sizes = [9, 32], strides = [1, 1]} : vector<9x384xbf16> to vector<9x32xbf16>
    %48 = vector.extract_strided_slice %1 {offsets = [0, 320], sizes = [9, 32], strides = [1, 1]} : vector<9x384xbf16> to vector<9x32xbf16>
    %cst_18 = arith.constant dense<0.000000e+00> : vector<9x9xf32>
    %49 = tpu.matmul %46, %47, %cst_18 {dimension_numbers = #tpu.dot_dimension_numbers<[1], [1], [0], [0], [0, 0, 1, 0], [], []>} : vector<9x32xbf16>, vector<9x32xbf16>, vector<9x9xf32> -> vector<9x9xf32>
    %c0_19 = arith.constant 0 : index
    %c0_20 = arith.constant 0 : index
    %c2 = arith.constant 2 : index
    %c0_21 = arith.constant 0 : index
    %50 = vector.load %arg2[%c0_19, %c0_20, %c2, %c0_21] : memref<1x9x4x9xbf16, #tpu.memory_space<vmem>>, vector<1x9x1x9xbf16>
    %51 = vector.shape_cast %50 : vector<1x9x1x9xbf16> to vector<9x9xbf16>
    %52 = arith.extf %51 : vector<9x9xbf16> to vector<9x9xf32>
    %53 = arith.addf %49, %52 : vector<9x9xf32>
    %cst_22 = arith.constant 0.176776692 : f32
    %54 = vector.broadcast %cst_22 : f32 to vector<9x9xf32>
    %55 = arith.mulf %53, %54 : vector<9x9xf32>
    %cst_23 = arith.constant dense<0xFF800000> : vector<9xf32>
    %56 = vector.multi_reduction <maximumf>, %55, %cst_23 [1] : vector<9x9xf32> to vector<9xf32>
    %57 = vector.shape_cast %56 : vector<9xf32> to vector<9x1xf32>
    %58 = vector.broadcast %57 : vector<9x1xf32> to vector<9x9xf32>
    %59 = arith.subf %55, %58 : vector<9x9xf32>
    %60 = math.exp %59 : vector<9x9xf32>
    %cst_24 = arith.constant dense<0.000000e+00> : vector<9xf32>
    %61 = vector.multi_reduction <add>, %60, %cst_24 [1] : vector<9x9xf32> to vector<9xf32>
    %62 = vector.shape_cast %61 : vector<9xf32> to vector<9x1xf32>
    %63 = tpu.reciprocal %62 {approx = true} : vector<9x1xf32> -> vector<9x1xf32>
    %64 = vector.broadcast %63 : vector<9x1xf32> to vector<9x9xf32>
    %65 = arith.mulf %60, %64 : vector<9x9xf32>
    %66 = arith.truncf %65 : vector<9x9xf32> to vector<9x9xbf16>
    %cst_25 = arith.constant dense<0.000000e+00> : vector<9x32xf32>
    %67 = tpu.matmul %66, %48, %cst_25 {dimension_numbers = #tpu.dot_dimension_numbers<[1], [0], [0], [1], [0, 0, 1, 1], [], []>} : vector<9x9xbf16>, vector<9x32xbf16>, vector<9x32xf32> -> vector<9x32xf32>
    %68 = vector.extract_strided_slice %1 {offsets = [0, 96], sizes = [9, 32], strides = [1, 1]} : vector<9x384xbf16> to vector<9x32xbf16>
    %69 = vector.extract_strided_slice %1 {offsets = [0, 224], sizes = [9, 32], strides = [1, 1]} : vector<9x384xbf16> to vector<9x32xbf16>
    %70 = vector.extract_strided_slice %1 {offsets = [0, 352], sizes = [9, 32], strides = [1, 1]} : vector<9x384xbf16> to vector<9x32xbf16>
    %cst_26 = arith.constant dense<0.000000e+00> : vector<9x9xf32>
    %71 = tpu.matmul %68, %69, %cst_26 {dimension_numbers = #tpu.dot_dimension_numbers<[1], [1], [0], [0], [0, 0, 1, 0], [], []>} : vector<9x32xbf16>, vector<9x32xbf16>, vector<9x9xf32> -> vector<9x9xf32>
    %c0_27 = arith.constant 0 : index
    %c0_28 = arith.constant 0 : index
    %c3 = arith.constant 3 : index
    %c0_29 = arith.constant 0 : index
    %72 = vector.load %arg2[%c0_27, %c0_28, %c3, %c0_29] : memref<1x9x4x9xbf16, #tpu.memory_space<vmem>>, vector<1x9x1x9xbf16>
    %73 = vector.shape_cast %72 : vector<1x9x1x9xbf16> to vector<9x9xbf16>
    %74 = arith.extf %73 : vector<9x9xbf16> to vector<9x9xf32>
    %75 = arith.addf %71, %74 : vector<9x9xf32>
    %cst_30 = arith.constant 0.176776692 : f32
    %76 = vector.broadcast %cst_30 : f32 to vector<9x9xf32>
    %77 = arith.mulf %75, %76 : vector<9x9xf32>
    %cst_31 = arith.constant dense<0xFF800000> : vector<9xf32>
    %78 = vector.multi_reduction <maximumf>, %77, %cst_31 [1] : vector<9x9xf32> to vector<9xf32>
    %79 = vector.shape_cast %78 : vector<9xf32> to vector<9x1xf32>
    %80 = vector.broadcast %79 : vector<9x1xf32> to vector<9x9xf32>
    %81 = arith.subf %77, %80 : vector<9x9xf32>
    %82 = math.exp %81 : vector<9x9xf32>
    %cst_32 = arith.constant dense<0.000000e+00> : vector<9xf32>
    %83 = vector.multi_reduction <add>, %82, %cst_32 [1] : vector<9x9xf32> to vector<9xf32>
    %84 = vector.shape_cast %83 : vector<9xf32> to vector<9x1xf32>
    %85 = tpu.reciprocal %84 {approx = true} : vector<9x1xf32> -> vector<9x1xf32>
    %86 = vector.broadcast %85 : vector<9x1xf32> to vector<9x9xf32>
    %87 = arith.mulf %82, %86 : vector<9x9xf32>
    %88 = arith.truncf %87 : vector<9x9xf32> to vector<9x9xbf16>
    %cst_33 = arith.constant dense<0.000000e+00> : vector<9x32xf32>
    %89 = tpu.matmul %88, %70, %cst_33 {dimension_numbers = #tpu.dot_dimension_numbers<[1], [0], [0], [1], [0, 0, 1, 1], [], []>} : vector<9x9xbf16>, vector<9x32xbf16>, vector<9x32xf32> -> vector<9x32xf32>
    %90 = tpu.concatenate %23, %45, %67, %89 in 1 : vector<9x32xf32>, vector<9x32xf32>, vector<9x32xf32>, vector<9x32xf32> -> vector<9x128xf32>
    %91 = arith.truncf %90 : vector<9x128xf32> to vector<9x128xbf16>
    %c0_34 = arith.constant 0 : index
    %c0_35 = arith.constant 0 : index
    %c0_36 = arith.constant 0 : index
    %92 = vector.load %arg3[%c0_34, %c0_35, %c0_36] : memref<1x9x128xbf16, #tpu.memory_space<vmem>>, vector<1x9x128xbf16>
    %93 = vector.shape_cast %92 : vector<1x9x128xbf16> to vector<9x128xbf16>
    %94 = vector.shape_cast %91 : vector<9x128xbf16> to vector<1x9x128xbf16>
    tpu.vector_store %arg3[%c0_34, %c0_35, %c0_36], %94 {strides = array<i32>} : memref<1x9x128xbf16, #tpu.memory_space<vmem>>, vector<1x9x128xbf16>,
    return
  }
  func.func @transform_0(%arg0: i32) -> (i32, i32, i32) {
    %c0_i32 = arith.constant 0 : i32
    %c0_i32_0 = arith.constant 0 : i32
    %c0_i32_1 = arith.constant 0 : i32
    return %arg0, %c0_i32, %c0_i32_0 : i32, i32, i32
  }
  func.func @transform_1(%arg0: i32) -> (i32, i32, i32, i32) {
    %c0_i32 = arith.constant 0 : i32
    %c0_i32_0 = arith.constant 0 : i32
    %c0_i32_1 = arith.constant 0 : i32
    %c0_i32_2 = arith.constant 0 : i32
    return %arg0, %c0_i32, %c0_i32_0, %c0_i32_1 : i32, i32, i32, i32
  }
  func.func @transform_2(%arg0: i32) -> (i32, i32, i32) {
    %c0_i32 = arith.constant 0 : i32
    %c0_i32_0 = arith.constant 0 : i32
    %c0_i32_1 = arith.constant 0 : i32
    return %arg0, %c0_i32, %c0_i32_0 : i32, i32, i32
  }
}

module attributes {stable_mosaic.version = 11 : i64} {
  func.func @_fused_linear_kernel(%arg0: i32, %arg1: memref<18x128xf32, #tpu.memory_space<vmem>>, %arg2: memref<1x128xf32, #tpu.memory_space<vmem>>, %arg3: memref<1x128xf32, #tpu.memory_space<vmem>>, %arg4: memref<128x512xbf16, #tpu.memory_space<vmem>>, %arg5: memref<1x512xf32, #tpu.memory_space<vmem>>, %arg6: memref<18x256xbf16, #tpu.memory_space<vmem>>) attributes {dimension_semantics = [#tpu.dimension_semantics<parallel>], iteration_bounds = array<i64: 1>, scalar_prefetch = 0 : i64, scratch_operands = 0 : i64, tpu.core_type = #tpu.core_type<tc>, window_params = [{transform_indices = @transform_0, window_bounds = array<i64: 18, 128>}, {pipeline_mode = #tpu.pipeline_mode<synchronous>, transform_indices = @transform_1, window_bounds = array<i64: 1, 128>}, {pipeline_mode = #tpu.pipeline_mode<synchronous>, transform_indices = @transform_2, window_bounds = array<i64: 1, 128>}, {pipeline_mode = #tpu.pipeline_mode<synchronous>, transform_indices = @transform_3, window_bounds = array<i64: 128, 512>}, {pipeline_mode = #tpu.pipeline_mode<synchronous>, transform_indices = @transform_4, window_bounds = array<i64: 1, 512>}, {transform_indices = @transform_5, window_bounds = array<i64: 18, 256>}]} {
    %c0 = arith.constant 0 : index
    %c0_0 = arith.constant 0 : index
    %0 = vector.load %arg1[%c0, %c0_0] : memref<18x128xf32, #tpu.memory_space<vmem>>, vector<18x128xf32>
    %cst = arith.constant dense<0.000000e+00> : vector<18xf32>
    %1 = vector.multi_reduction <add>, %0, %cst [1] : vector<18x128xf32> to vector<18xf32>
    %2 = vector.shape_cast %1 : vector<18xf32> to vector<18x1xf32>
    %cst_1 = arith.constant 1.280000e+02 : f32
    %3 = vector.broadcast %cst_1 : f32 to vector<18x1xf32>
    %4 = arith.divf %2, %3 : vector<18x1xf32>
    %5 = vector.broadcast %4 : vector<18x1xf32> to vector<18x128xf32>
    %6 = arith.subf %0, %5 : vector<18x128xf32>
    %7 = arith.mulf %6, %6 : vector<18x128xf32>
    %cst_2 = arith.constant dense<0.000000e+00> : vector<18xf32>
    %8 = vector.multi_reduction <add>, %7, %cst_2 [1] : vector<18x128xf32> to vector<18xf32>
    %9 = vector.shape_cast %8 : vector<18xf32> to vector<18x1xf32>
    %cst_3 = arith.constant 1.280000e+02 : f32
    %10 = vector.broadcast %cst_3 : f32 to vector<18x1xf32>
    %11 = arith.divf %9, %10 : vector<18x1xf32>
    %12 = vector.broadcast %4 : vector<18x1xf32> to vector<18x128xf32>
    %13 = arith.subf %0, %12 : vector<18x128xf32>
    %cst_4 = arith.constant 9.99999974E-6 : f32
    %14 = vector.broadcast %cst_4 : f32 to vector<18x1xf32>
    %15 = arith.addf %11, %14 : vector<18x1xf32>
    %16 = math.rsqrt %15 : vector<18x1xf32>
    %17 = vector.broadcast %16 : vector<18x1xf32> to vector<18x128xf32>
    %18 = arith.mulf %13, %17 : vector<18x128xf32>
    %c0_5 = arith.constant 0 : index
    %c0_6 = arith.constant 0 : index
    %19 = vector.load %arg2[%c0_5, %c0_6] : memref<1x128xf32, #tpu.memory_space<vmem>>, vector<1x128xf32>
    %20 = vector.broadcast %19 : vector<1x128xf32> to vector<18x128xf32>
    %21 = arith.mulf %18, %20 : vector<18x128xf32>
    %c0_7 = arith.constant 0 : index
    %c0_8 = arith.constant 0 : index
    %22 = vector.load %arg3[%c0_7, %c0_8] : memref<1x128xf32, #tpu.memory_space<vmem>>, vector<1x128xf32>
    %23 = vector.broadcast %22 : vector<1x128xf32> to vector<18x128xf32>
    %24 = arith.addf %21, %23 : vector<18x128xf32>
    %25 = arith.truncf %24 : vector<18x128xf32> to vector<18x128xbf16>
    %c0_9 = arith.constant 0 : index
    %c0_10 = arith.constant 0 : index
    %26 = vector.load %arg4[%c0_9, %c0_10] : memref<128x512xbf16, #tpu.memory_space<vmem>>, vector<128x512xbf16>
    %cst_11 = arith.constant dense<0.000000e+00> : vector<18x512xf32>
    %27 = tpu.matmul %25, %26, %cst_11 {dimension_numbers = #tpu.dot_dimension_numbers<[1], [0], [0], [1], [0, 0, 1, 1], [], []>} : vector<18x128xbf16>, vector<128x512xbf16>, vector<18x512xf32> -> vector<18x512xf32>
    %c0_12 = arith.constant 0 : index
    %c0_13 = arith.constant 0 : index
    %28 = vector.load %arg5[%c0_12, %c0_13] : memref<1x512xf32, #tpu.memory_space<vmem>>, vector<1x512xf32>
    %29 = vector.broadcast %28 : vector<1x512xf32> to vector<18x512xf32>
    %30 = arith.addf %27, %29 : vector<18x512xf32>
    %31 = vector.extract_strided_slice %30 {offsets = [0, 0], sizes = [18, 256], strides = [1, 1]} : vector<18x512xf32> to vector<18x256xf32>
    %32 = vector.extract_strided_slice %30 {offsets = [0, 256], sizes = [18, 256], strides = [1, 1]} : vector<18x512xf32> to vector<18x256xf32>
    %33 = arith.negf %32 : vector<18x256xf32>
    %34 = math.exp %33 : vector<18x256xf32>
    %cst_14 = arith.constant 1.000000e+00 : f32
    %35 = vector.broadcast %cst_14 : f32 to vector<18x256xf32>
    %36 = arith.addf %35, %34 : vector<18x256xf32>
    %37 = arith.divf %35, %36 : vector<18x256xf32>
    %38 = arith.mulf %31, %37 : vector<18x256xf32>
    %39 = arith.truncf %38 : vector<18x256xf32> to vector<18x256xbf16>
    %c0_15 = arith.constant 0 : index
    %c0_16 = arith.constant 0 : index
    %40 = vector.load %arg6[%c0_15, %c0_16] : memref<18x256xbf16, #tpu.memory_space<vmem>>, vector<18x256xbf16>
    tpu.vector_store %arg6[%c0_15, %c0_16], %39 {strides = array<i32>} : memref<18x256xbf16, #tpu.memory_space<vmem>>, vector<18x256xbf16>,
    return
  }
  func.func @transform_0(%arg0: i32) -> (i32, i32) {
    %c0_i32 = arith.constant 0 : i32
    %c0_i32_0 = arith.constant 0 : i32
    return %arg0, %c0_i32 : i32, i32
  }
  func.func @transform_1(%arg0: i32) -> (i32, i32) {
    %c0_i32 = arith.constant 0 : i32
    %c0_i32_0 = arith.constant 0 : i32
    %c0_i32_1 = arith.constant 0 : i32
    return %c0_i32, %c0_i32_0 : i32, i32
  }
  func.func @transform_2(%arg0: i32) -> (i32, i32) {
    %c0_i32 = arith.constant 0 : i32
    %c0_i32_0 = arith.constant 0 : i32
    %c0_i32_1 = arith.constant 0 : i32
    return %c0_i32, %c0_i32_0 : i32, i32
  }
  func.func @transform_3(%arg0: i32) -> (i32, i32) {
    %c0_i32 = arith.constant 0 : i32
    %c0_i32_0 = arith.constant 0 : i32
    %c0_i32_1 = arith.constant 0 : i32
    return %c0_i32, %c0_i32_0 : i32, i32
  }
  func.func @transform_4(%arg0: i32) -> (i32, i32) {
    %c0_i32 = arith.constant 0 : i32
    %c0_i32_0 = arith.constant 0 : i32
    %c0_i32_1 = arith.constant 0 : i32
    return %c0_i32, %c0_i32_0 : i32, i32
  }
  func.func @transform_5(%arg0: i32) -> (i32, i32) {
    %c0_i32 = arith.constant 0 : i32
    %c0_i32_0 = arith.constant 0 : i32
    return %arg0, %c0_i32 : i32, i32
  }
}

module attributes {stable_mosaic.version = 11 : i64} {
  func.func @_fused_linear_kernel(%arg0: i32, %arg1: memref<18x128xbf16, #tpu.memory_space<vmem>>, %arg2: memref<128x128xbf16, #tpu.memory_space<vmem>>, %arg3: memref<1x128xf32, #tpu.memory_space<vmem>>, %arg4: memref<18x128xf32, #tpu.memory_space<vmem>>, %arg5: memref<18x128xf32, #tpu.memory_space<vmem>>) attributes {dimension_semantics = [#tpu.dimension_semantics<parallel>], iteration_bounds = array<i64: 1>, scalar_prefetch = 0 : i64, scratch_operands = 0 : i64, tpu.core_type = #tpu.core_type<tc>, window_params = [{transform_indices = @transform_0, window_bounds = array<i64: 18, 128>}, {pipeline_mode = #tpu.pipeline_mode<synchronous>, transform_indices = @transform_1, window_bounds = array<i64: 128, 128>}, {pipeline_mode = #tpu.pipeline_mode<synchronous>, transform_indices = @transform_2, window_bounds = array<i64: 1, 128>}, {transform_indices = @transform_3, window_bounds = array<i64: 18, 128>}, {transform_indices = @transform_4, window_bounds = array<i64: 18, 128>}]} {
    %c0 = arith.constant 0 : index
    %c0_0 = arith.constant 0 : index
    %0 = vector.load %arg1[%c0, %c0_0] : memref<18x128xbf16, #tpu.memory_space<vmem>>, vector<18x128xbf16>
    %c0_1 = arith.constant 0 : index
    %c0_2 = arith.constant 0 : index
    %1 = vector.load %arg2[%c0_1, %c0_2] : memref<128x128xbf16, #tpu.memory_space<vmem>>, vector<128x128xbf16>
    %cst = arith.constant dense<0.000000e+00> : vector<18x128xf32>
    %2 = tpu.matmul %0, %1, %cst {dimension_numbers = #tpu.dot_dimension_numbers<[1], [0], [0], [1], [0, 0, 1, 1], [], []>} : vector<18x128xbf16>, vector<128x128xbf16>, vector<18x128xf32> -> vector<18x128xf32>
    %c0_3 = arith.constant 0 : index
    %c0_4 = arith.constant 0 : index
    %3 = vector.load %arg3[%c0_3, %c0_4] : memref<1x128xf32, #tpu.memory_space<vmem>>, vector<1x128xf32>
    %4 = vector.broadcast %3 : vector<1x128xf32> to vector<18x128xf32>
    %5 = arith.addf %2, %4 : vector<18x128xf32>
    %c0_5 = arith.constant 0 : index
    %c0_6 = arith.constant 0 : index
    %6 = vector.load %arg4[%c0_5, %c0_6] : memref<18x128xf32, #tpu.memory_space<vmem>>, vector<18x128xf32>
    %cst_7 = arith.constant 1.000000e+00 : f32
    %7 = vector.broadcast %cst_7 : f32 to vector<18x128xf32>
    %8 = arith.mulf %7, %5 : vector<18x128xf32>
    %9 = arith.addf %6, %8 : vector<18x128xf32>
    %c0_8 = arith.constant 0 : index
    %c0_9 = arith.constant 0 : index
    %10 = vector.load %arg5[%c0_8, %c0_9] : memref<18x128xf32, #tpu.memory_space<vmem>>, vector<18x128xf32>
    tpu.vector_store %arg5[%c0_8, %c0_9], %9 {strides = array<i32>} : memref<18x128xf32, #tpu.memory_space<vmem>>, vector<18x128xf32>,
    return
  }
  func.func @transform_0(%arg0: i32) -> (i32, i32) {
    %c0_i32 = arith.constant 0 : i32
    %c0_i32_0 = arith.constant 0 : i32
    return %arg0, %c0_i32 : i32, i32
  }
  func.func @transform_1(%arg0: i32) -> (i32, i32) {
    %c0_i32 = arith.constant 0 : i32
    %c0_i32_0 = arith.constant 0 : i32
    %c0_i32_1 = arith.constant 0 : i32
    return %c0_i32, %c0_i32_0 : i32, i32
  }
  func.func @transform_2(%arg0: i32) -> (i32, i32) {
    %c0_i32 = arith.constant 0 : i32
    %c0_i32_0 = arith.constant 0 : i32
    %c0_i32_1 = arith.constant 0 : i32
    return %c0_i32, %c0_i32_0 : i32, i32
  }
  func.func @transform_3(%arg0: i32) -> (i32, i32) {
    %c0_i32 = arith.constant 0 : i32
    %c0_i32_0 = arith.constant 0 : i32
    return %arg0, %c0_i32 : i32, i32
  }
  func.func @transform_4(%arg0: i32) -> (i32, i32) {
    %c0_i32 = arith.constant 0 : i32
    %c0_i32_0 = arith.constant 0 : i32
    return %arg0, %c0_i32 : i32, i32
  }
}

module attributes {stable_mosaic.version = 11 : i64} {
  func.func @_fused_linear_kernel(%arg0: i32, %arg1: memref<18x128xf32, #tpu.memory_space<vmem>>, %arg2: memref<1x128xf32, #tpu.memory_space<vmem>>, %arg3: memref<1x128xf32, #tpu.memory_space<vmem>>, %arg4: memref<128x512xbf16, #tpu.memory_space<vmem>>, %arg5: memref<1x512xf32, #tpu.memory_space<vmem>>, %arg6: memref<18x512xbf16, #tpu.memory_space<vmem>>) attributes {dimension_semantics = [#tpu.dimension_semantics<parallel>], iteration_bounds = array<i64: 1>, scalar_prefetch = 0 : i64, scratch_operands = 0 : i64, tpu.core_type = #tpu.core_type<tc>, window_params = [{transform_indices = @transform_0, window_bounds = array<i64: 18, 128>}, {pipeline_mode = #tpu.pipeline_mode<synchronous>, transform_indices = @transform_1, window_bounds = array<i64: 1, 128>}, {pipeline_mode = #tpu.pipeline_mode<synchronous>, transform_indices = @transform_2, window_bounds = array<i64: 1, 128>}, {pipeline_mode = #tpu.pipeline_mode<synchronous>, transform_indices = @transform_3, window_bounds = array<i64: 128, 512>}, {pipeline_mode = #tpu.pipeline_mode<synchronous>, transform_indices = @transform_4, window_bounds = array<i64: 1, 512>}, {transform_indices = @transform_5, window_bounds = array<i64: 18, 512>}]} {
    %c0 = arith.constant 0 : index
    %c0_0 = arith.constant 0 : index
    %0 = vector.load %arg1[%c0, %c0_0] : memref<18x128xf32, #tpu.memory_space<vmem>>, vector<18x128xf32>
    %cst = arith.constant dense<0.000000e+00> : vector<18xf32>
    %1 = vector.multi_reduction <add>, %0, %cst [1] : vector<18x128xf32> to vector<18xf32>
    %2 = vector.shape_cast %1 : vector<18xf32> to vector<18x1xf32>
    %cst_1 = arith.constant 1.280000e+02 : f32
    %3 = vector.broadcast %cst_1 : f32 to vector<18x1xf32>
    %4 = arith.divf %2, %3 : vector<18x1xf32>
    %5 = vector.broadcast %4 : vector<18x1xf32> to vector<18x128xf32>
    %6 = arith.subf %0, %5 : vector<18x128xf32>
    %7 = arith.mulf %6, %6 : vector<18x128xf32>
    %cst_2 = arith.constant dense<0.000000e+00> : vector<18xf32>
    %8 = vector.multi_reduction <add>, %7, %cst_2 [1] : vector<18x128xf32> to vector<18xf32>
    %9 = vector.shape_cast %8 : vector<18xf32> to vector<18x1xf32>
    %cst_3 = arith.constant 1.280000e+02 : f32
    %10 = vector.broadcast %cst_3 : f32 to vector<18x1xf32>
    %11 = arith.divf %9, %10 : vector<18x1xf32>
    %12 = vector.broadcast %4 : vector<18x1xf32> to vector<18x128xf32>
    %13 = arith.subf %0, %12 : vector<18x128xf32>
    %cst_4 = arith.constant 9.99999974E-6 : f32
    %14 = vector.broadcast %cst_4 : f32 to vector<18x1xf32>
    %15 = arith.addf %11, %14 : vector<18x1xf32>
    %16 = math.rsqrt %15 : vector<18x1xf32>
    %17 = vector.broadcast %16 : vector<18x1xf32> to vector<18x128xf32>
    %18 = arith.mulf %13, %17 : vector<18x128xf32>
    %c0_5 = arith.constant 0 : index
    %c0_6 = arith.constant 0 : index
    %19 = vector.load %arg2[%c0_5, %c0_6] : memref<1x128xf32, #tpu.memory_space<vmem>>, vector<1x128xf32>
    %20 = vector.broadcast %19 : vector<1x128xf32> to vector<18x128xf32>
    %21 = arith.mulf %18, %20 : vector<18x128xf32>
    %c0_7 = arith.constant 0 : index
    %c0_8 = arith.constant 0 : index
    %22 = vector.load %arg3[%c0_7, %c0_8] : memref<1x128xf32, #tpu.memory_space<vmem>>, vector<1x128xf32>
    %23 = vector.broadcast %22 : vector<1x128xf32> to vector<18x128xf32>
    %24 = arith.addf %21, %23 : vector<18x128xf32>
    %25 = arith.truncf %24 : vector<18x128xf32> to vector<18x128xbf16>
    %c0_9 = arith.constant 0 : index
    %c0_10 = arith.constant 0 : index
    %26 = vector.load %arg4[%c0_9, %c0_10] : memref<128x512xbf16, #tpu.memory_space<vmem>>, vector<128x512xbf16>
    %cst_11 = arith.constant dense<0.000000e+00> : vector<18x512xf32>
    %27 = tpu.matmul %25, %26, %cst_11 {dimension_numbers = #tpu.dot_dimension_numbers<[1], [0], [0], [1], [0, 0, 1, 1], [], []>} : vector<18x128xbf16>, vector<128x512xbf16>, vector<18x512xf32> -> vector<18x512xf32>
    %c0_12 = arith.constant 0 : index
    %c0_13 = arith.constant 0 : index
    %28 = vector.load %arg5[%c0_12, %c0_13] : memref<1x512xf32, #tpu.memory_space<vmem>>, vector<1x512xf32>
    %29 = vector.broadcast %28 : vector<1x512xf32> to vector<18x512xf32>
    %30 = arith.addf %27, %29 : vector<18x512xf32>
    %31 = arith.negf %30 : vector<18x512xf32>
    %32 = math.exp %31 : vector<18x512xf32>
    %cst_14 = arith.constant 1.000000e+00 : f32
    %33 = vector.broadcast %cst_14 : f32 to vector<18x512xf32>
    %34 = arith.addf %33, %32 : vector<18x512xf32>
    %35 = arith.divf %33, %34 : vector<18x512xf32>
    %36 = arith.mulf %30, %35 : vector<18x512xf32>
    %37 = arith.truncf %36 : vector<18x512xf32> to vector<18x512xbf16>
    %c0_15 = arith.constant 0 : index
    %c0_16 = arith.constant 0 : index
    %38 = vector.load %arg6[%c0_15, %c0_16] : memref<18x512xbf16, #tpu.memory_space<vmem>>, vector<18x512xbf16>
    tpu.vector_store %arg6[%c0_15, %c0_16], %37 {strides = array<i32>} : memref<18x512xbf16, #tpu.memory_space<vmem>>, vector<18x512xbf16>,
    return
  }
  func.func @transform_0(%arg0: i32) -> (i32, i32) {
    %c0_i32 = arith.constant 0 : i32
    %c0_i32_0 = arith.constant 0 : i32
    return %arg0, %c0_i32 : i32, i32
  }
  func.func @transform_1(%arg0: i32) -> (i32, i32) {
    %c0_i32 = arith.constant 0 : i32
    %c0_i32_0 = arith.constant 0 : i32
    %c0_i32_1 = arith.constant 0 : i32
    return %c0_i32, %c0_i32_0 : i32, i32
  }
  func.func @transform_2(%arg0: i32) -> (i32, i32) {
    %c0_i32 = arith.constant 0 : i32
    %c0_i32_0 = arith.constant 0 : i32
    %c0_i32_1 = arith.constant 0 : i32
    return %c0_i32, %c0_i32_0 : i32, i32
  }
  func.func @transform_3(%arg0: i32) -> (i32, i32) {
    %c0_i32 = arith.constant 0 : i32
    %c0_i32_0 = arith.constant 0 : i32
    %c0_i32_1 = arith.constant 0 : i32
    return %c0_i32, %c0_i32_0 : i32, i32
  }
  func.func @transform_4(%arg0: i32) -> (i32, i32) {
    %c0_i32 = arith.constant 0 : i32
    %c0_i32_0 = arith.constant 0 : i32
    %c0_i32_1 = arith.constant 0 : i32
    return %c0_i32, %c0_i32_0 : i32, i32
  }
  func.func @transform_5(%arg0: i32) -> (i32, i32) {
    %c0_i32 = arith.constant 0 : i32
    %c0_i32_0 = arith.constant 0 : i32
    return %arg0, %c0_i32 : i32, i32
  }
}

module attributes {stable_mosaic.version = 11 : i64} {
  func.func @_dwconv_stats_kernel(%arg0: i32, %arg1: memref<1x24x256xbf16, #tpu.memory_space<vmem>>, %arg2: memref<16x256xf32, #tpu.memory_space<vmem>>, %arg3: memref<1x256xf32, #tpu.memory_space<vmem>>, %arg4: memref<1x9x256xf32, #tpu.memory_space<vmem>>, %arg5: memref<1x2x256xf32, #tpu.memory_space<vmem>>) attributes {dimension_semantics = [#tpu.dimension_semantics<parallel>], iteration_bounds = array<i64: 2>, scalar_prefetch = 0 : i64, scratch_operands = 0 : i64, tpu.core_type = #tpu.core_type<tc>, window_params = [{transform_indices = @transform_0, window_bounds = array<i64: 1, 24, 256>}, {pipeline_mode = #tpu.pipeline_mode<synchronous>, transform_indices = @transform_1, window_bounds = array<i64: 16, 256>}, {pipeline_mode = #tpu.pipeline_mode<synchronous>, transform_indices = @transform_2, window_bounds = array<i64: 1, 256>}, {transform_indices = @transform_3, window_bounds = array<i64: 1, 9, 256>}, {transform_indices = @transform_4, window_bounds = array<i64: 1, 2, 256>}]} {
    %c0 = arith.constant 0 : index
    %c0_0 = arith.constant 0 : index
    %c0_1 = arith.constant 0 : index
    %0 = vector.load %arg1[%c0, %c0_0, %c0_1] : memref<1x24x256xbf16, #tpu.memory_space<vmem>>, vector<1x24x256xbf16>
    %1 = vector.shape_cast %0 : vector<1x24x256xbf16> to vector<24x256xbf16>
    %cst = arith.constant 0.000000e+00 : f32
    %2 = vector.broadcast %cst : f32 to vector<9x256xf32>
    %3 = vector.extract_strided_slice %1 {offsets = [0, 0], sizes = [9, 256], strides = [1, 1]} : vector<24x256xbf16> to vector<9x256xbf16>
    %4 = arith.extf %3 : vector<9x256xbf16> to vector<9x256xf32>
    %c0_2 = arith.constant 0 : index
    %c0_3 = arith.constant 0 : index
    %5 = vector.load %arg2[%c0_2, %c0_3] : memref<16x256xf32, #tpu.memory_space<vmem>>, vector<1x256xf32>
    %6 = vector.broadcast %5 : vector<1x256xf32> to vector<9x256xf32>
    %7 = arith.mulf %4, %6 : vector<9x256xf32>
    %8 = arith.addf %2, %7 : vector<9x256xf32>
    %9 = vector.extract_strided_slice %1 {offsets = [1, 0], sizes = [9, 256], strides = [1, 1]} : vector<24x256xbf16> to vector<9x256xbf16>
    %10 = arith.extf %9 : vector<9x256xbf16> to vector<9x256xf32>
    %c1 = arith.constant 1 : index
    %c0_4 = arith.constant 0 : index
    %11 = vector.load %arg2[%c1, %c0_4] : memref<16x256xf32, #tpu.memory_space<vmem>>, vector<1x256xf32>
    %12 = vector.broadcast %11 : vector<1x256xf32> to vector<9x256xf32>
    %13 = arith.mulf %10, %12 : vector<9x256xf32>
    %14 = arith.addf %8, %13 : vector<9x256xf32>
    %15 = vector.extract_strided_slice %1 {offsets = [2, 0], sizes = [9, 256], strides = [1, 1]} : vector<24x256xbf16> to vector<9x256xbf16>
    %16 = arith.extf %15 : vector<9x256xbf16> to vector<9x256xf32>
    %c2 = arith.constant 2 : index
    %c0_5 = arith.constant 0 : index
    %17 = vector.load %arg2[%c2, %c0_5] : memref<16x256xf32, #tpu.memory_space<vmem>>, vector<1x256xf32>
    %18 = vector.broadcast %17 : vector<1x256xf32> to vector<9x256xf32>
    %19 = arith.mulf %16, %18 : vector<9x256xf32>
    %20 = arith.addf %14, %19 : vector<9x256xf32>
    %21 = vector.extract_strided_slice %1 {offsets = [3, 0], sizes = [9, 256], strides = [1, 1]} : vector<24x256xbf16> to vector<9x256xbf16>
    %22 = arith.extf %21 : vector<9x256xbf16> to vector<9x256xf32>
    %c3 = arith.constant 3 : index
    %c0_6 = arith.constant 0 : index
    %23 = vector.load %arg2[%c3, %c0_6] : memref<16x256xf32, #tpu.memory_space<vmem>>, vector<1x256xf32>
    %24 = vector.broadcast %23 : vector<1x256xf32> to vector<9x256xf32>
    %25 = arith.mulf %22, %24 : vector<9x256xf32>
    %26 = arith.addf %20, %25 : vector<9x256xf32>
    %27 = vector.extract_strided_slice %1 {offsets = [4, 0], sizes = [9, 256], strides = [1, 1]} : vector<24x256xbf16> to vector<9x256xbf16>
    %28 = arith.extf %27 : vector<9x256xbf16> to vector<9x256xf32>
    %c4 = arith.constant 4 : index
    %c0_7 = arith.constant 0 : index
    %29 = vector.load %arg2[%c4, %c0_7] : memref<16x256xf32, #tpu.memory_space<vmem>>, vector<1x256xf32>
    %30 = vector.broadcast %29 : vector<1x256xf32> to vector<9x256xf32>
    %31 = arith.mulf %28, %30 : vector<9x256xf32>
    %32 = arith.addf %26, %31 : vector<9x256xf32>
    %33 = vector.extract_strided_slice %1 {offsets = [5, 0], sizes = [9, 256], strides = [1, 1]} : vector<24x256xbf16> to vector<9x256xbf16>
    %34 = arith.extf %33 : vector<9x256xbf16> to vector<9x256xf32>
    %c5 = arith.constant 5 : index
    %c0_8 = arith.constant 0 : index
    %35 = vector.load %arg2[%c5, %c0_8] : memref<16x256xf32, #tpu.memory_space<vmem>>, vector<1x256xf32>
    %36 = vector.broadcast %35 : vector<1x256xf32> to vector<9x256xf32>
    %37 = arith.mulf %34, %36 : vector<9x256xf32>
    %38 = arith.addf %32, %37 : vector<9x256xf32>
    %39 = vector.extract_strided_slice %1 {offsets = [6, 0], sizes = [9, 256], strides = [1, 1]} : vector<24x256xbf16> to vector<9x256xbf16>
    %40 = arith.extf %39 : vector<9x256xbf16> to vector<9x256xf32>
    %c6 = arith.constant 6 : index
    %c0_9 = arith.constant 0 : index
    %41 = vector.load %arg2[%c6, %c0_9] : memref<16x256xf32, #tpu.memory_space<vmem>>, vector<1x256xf32>
    %42 = vector.broadcast %41 : vector<1x256xf32> to vector<9x256xf32>
    %43 = arith.mulf %40, %42 : vector<9x256xf32>
    %44 = arith.addf %38, %43 : vector<9x256xf32>
    %45 = vector.extract_strided_slice %1 {offsets = [7, 0], sizes = [9, 256], strides = [1, 1]} : vector<24x256xbf16> to vector<9x256xbf16>
    %46 = arith.extf %45 : vector<9x256xbf16> to vector<9x256xf32>
    %c7 = arith.constant 7 : index
    %c0_10 = arith.constant 0 : index
    %47 = vector.load %arg2[%c7, %c0_10] : memref<16x256xf32, #tpu.memory_space<vmem>>, vector<1x256xf32>
    %48 = vector.broadcast %47 : vector<1x256xf32> to vector<9x256xf32>
    %49 = arith.mulf %46, %48 : vector<9x256xf32>
    %50 = arith.addf %44, %49 : vector<9x256xf32>
    %51 = vector.extract_strided_slice %1 {offsets = [8, 0], sizes = [9, 256], strides = [1, 1]} : vector<24x256xbf16> to vector<9x256xbf16>
    %52 = arith.extf %51 : vector<9x256xbf16> to vector<9x256xf32>
    %c8 = arith.constant 8 : index
    %c0_11 = arith.constant 0 : index
    %53 = vector.load %arg2[%c8, %c0_11] : memref<16x256xf32, #tpu.memory_space<vmem>>, vector<1x256xf32>
    %54 = vector.broadcast %53 : vector<1x256xf32> to vector<9x256xf32>
    %55 = arith.mulf %52, %54 : vector<9x256xf32>
    %56 = arith.addf %50, %55 : vector<9x256xf32>
    %57 = vector.extract_strided_slice %1 {offsets = [9, 0], sizes = [9, 256], strides = [1, 1]} : vector<24x256xbf16> to vector<9x256xbf16>
    %58 = arith.extf %57 : vector<9x256xbf16> to vector<9x256xf32>
    %c9 = arith.constant 9 : index
    %c0_12 = arith.constant 0 : index
    %59 = vector.load %arg2[%c9, %c0_12] : memref<16x256xf32, #tpu.memory_space<vmem>>, vector<1x256xf32>
    %60 = vector.broadcast %59 : vector<1x256xf32> to vector<9x256xf32>
    %61 = arith.mulf %58, %60 : vector<9x256xf32>
    %62 = arith.addf %56, %61 : vector<9x256xf32>
    %63 = vector.extract_strided_slice %1 {offsets = [10, 0], sizes = [9, 256], strides = [1, 1]} : vector<24x256xbf16> to vector<9x256xbf16>
    %64 = arith.extf %63 : vector<9x256xbf16> to vector<9x256xf32>
    %c10 = arith.constant 10 : index
    %c0_13 = arith.constant 0 : index
    %65 = vector.load %arg2[%c10, %c0_13] : memref<16x256xf32, #tpu.memory_space<vmem>>, vector<1x256xf32>
    %66 = vector.broadcast %65 : vector<1x256xf32> to vector<9x256xf32>
    %67 = arith.mulf %64, %66 : vector<9x256xf32>
    %68 = arith.addf %62, %67 : vector<9x256xf32>
    %69 = vector.extract_strided_slice %1 {offsets = [11, 0], sizes = [9, 256], strides = [1, 1]} : vector<24x256xbf16> to vector<9x256xbf16>
    %70 = arith.extf %69 : vector<9x256xbf16> to vector<9x256xf32>
    %c11 = arith.constant 11 : index
    %c0_14 = arith.constant 0 : index
    %71 = vector.load %arg2[%c11, %c0_14] : memref<16x256xf32, #tpu.memory_space<vmem>>, vector<1x256xf32>
    %72 = vector.broadcast %71 : vector<1x256xf32> to vector<9x256xf32>
    %73 = arith.mulf %70, %72 : vector<9x256xf32>
    %74 = arith.addf %68, %73 : vector<9x256xf32>
    %75 = vector.extract_strided_slice %1 {offsets = [12, 0], sizes = [9, 256], strides = [1, 1]} : vector<24x256xbf16> to vector<9x256xbf16>
    %76 = arith.extf %75 : vector<9x256xbf16> to vector<9x256xf32>
    %c12 = arith.constant 12 : index
    %c0_15 = arith.constant 0 : index
    %77 = vector.load %arg2[%c12, %c0_15] : memref<16x256xf32, #tpu.memory_space<vmem>>, vector<1x256xf32>
    %78 = vector.broadcast %77 : vector<1x256xf32> to vector<9x256xf32>
    %79 = arith.mulf %76, %78 : vector<9x256xf32>
    %80 = arith.addf %74, %79 : vector<9x256xf32>
    %81 = vector.extract_strided_slice %1 {offsets = [13, 0], sizes = [9, 256], strides = [1, 1]} : vector<24x256xbf16> to vector<9x256xbf16>
    %82 = arith.extf %81 : vector<9x256xbf16> to vector<9x256xf32>
    %c13 = arith.constant 13 : index
    %c0_16 = arith.constant 0 : index
    %83 = vector.load %arg2[%c13, %c0_16] : memref<16x256xf32, #tpu.memory_space<vmem>>, vector<1x256xf32>
    %84 = vector.broadcast %83 : vector<1x256xf32> to vector<9x256xf32>
    %85 = arith.mulf %82, %84 : vector<9x256xf32>
    %86 = arith.addf %80, %85 : vector<9x256xf32>
    %87 = vector.extract_strided_slice %1 {offsets = [14, 0], sizes = [9, 256], strides = [1, 1]} : vector<24x256xbf16> to vector<9x256xbf16>
    %88 = arith.extf %87 : vector<9x256xbf16> to vector<9x256xf32>
    %c14 = arith.constant 14 : index
    %c0_17 = arith.constant 0 : index
    %89 = vector.load %arg2[%c14, %c0_17] : memref<16x256xf32, #tpu.memory_space<vmem>>, vector<1x256xf32>
    %90 = vector.broadcast %89 : vector<1x256xf32> to vector<9x256xf32>
    %91 = arith.mulf %88, %90 : vector<9x256xf32>
    %92 = arith.addf %86, %91 : vector<9x256xf32>
    %93 = vector.extract_strided_slice %1 {offsets = [15, 0], sizes = [9, 256], strides = [1, 1]} : vector<24x256xbf16> to vector<9x256xbf16>
    %94 = arith.extf %93 : vector<9x256xbf16> to vector<9x256xf32>
    %c15 = arith.constant 15 : index
    %c0_18 = arith.constant 0 : index
    %95 = vector.load %arg2[%c15, %c0_18] : memref<16x256xf32, #tpu.memory_space<vmem>>, vector<1x256xf32>
    %96 = vector.broadcast %95 : vector<1x256xf32> to vector<9x256xf32>
    %97 = arith.mulf %94, %96 : vector<9x256xf32>
    %98 = arith.addf %92, %97 : vector<9x256xf32>
    %c0_19 = arith.constant 0 : index
    %c0_20 = arith.constant 0 : index
    %99 = vector.load %arg3[%c0_19, %c0_20] : memref<1x256xf32, #tpu.memory_space<vmem>>, vector<1x256xf32>
    %100 = vector.broadcast %99 : vector<1x256xf32> to vector<9x256xf32>
    %101 = arith.addf %98, %100 : vector<9x256xf32>
    %c0_21 = arith.constant 0 : index
    %c0_22 = arith.constant 0 : index
    %c0_23 = arith.constant 0 : index
    %102 = vector.load %arg4[%c0_21, %c0_22, %c0_23] : memref<1x9x256xf32, #tpu.memory_space<vmem>>, vector<1x9x256xf32>
    %103 = vector.shape_cast %102 : vector<1x9x256xf32> to vector<9x256xf32>
    %104 = vector.shape_cast %101 : vector<9x256xf32> to vector<1x9x256xf32>
    tpu.vector_store %arg4[%c0_21, %c0_22, %c0_23], %104 {strides = array<i32>} : memref<1x9x256xf32, #tpu.memory_space<vmem>>, vector<1x9x256xf32>,
    %cst_24 = arith.constant dense<0.000000e+00> : vector<256xf32>
    %105 = vector.multi_reduction <add>, %101, %cst_24 [0] : vector<9x256xf32> to vector<256xf32>
    %106 = vector.shape_cast %105 : vector<256xf32> to vector<1x256xf32>
    %107 = arith.mulf %101, %101 : vector<9x256xf32>
    %cst_25 = arith.constant dense<0.000000e+00> : vector<256xf32>
    %108 = vector.multi_reduction <add>, %107, %cst_25 [0] : vector<9x256xf32> to vector<256xf32>
    %109 = vector.shape_cast %108 : vector<256xf32> to vector<1x256xf32>
    %110 = tpu.concatenate %106, %109 in 0 : vector<1x256xf32>, vector<1x256xf32> -> vector<2x256xf32>
    %c0_26 = arith.constant 0 : index
    %c0_27 = arith.constant 0 : index
    %c0_28 = arith.constant 0 : index
    %111 = vector.load %arg5[%c0_26, %c0_27, %c0_28] : memref<1x2x256xf32, #tpu.memory_space<vmem>>, vector<1x2x256xf32>
    %112 = vector.shape_cast %111 : vector<1x2x256xf32> to vector<2x256xf32>
    %113 = vector.shape_cast %110 : vector<2x256xf32> to vector<1x2x256xf32>
    tpu.vector_store %arg5[%c0_26, %c0_27, %c0_28], %113 {strides = array<i32>} : memref<1x2x256xf32, #tpu.memory_space<vmem>>, vector<1x2x256xf32>,
    return
  }
  func.func @transform_0(%arg0: i32) -> (i32, i32, i32) {
    %c0_i32 = arith.constant 0 : i32
    %c0_i32_0 = arith.constant 0 : i32
    %c0_i32_1 = arith.constant 0 : i32
    return %arg0, %c0_i32, %c0_i32_0 : i32, i32, i32
  }
  func.func @transform_1(%arg0: i32) -> (i32, i32) {
    %c0_i32 = arith.constant 0 : i32
    %c0_i32_0 = arith.constant 0 : i32
    %c0_i32_1 = arith.constant 0 : i32
    return %c0_i32, %c0_i32_0 : i32, i32
  }
  func.func @transform_2(%arg0: i32) -> (i32, i32) {
    %c0_i32 = arith.constant 0 : i32
    %c0_i32_0 = arith.constant 0 : i32
    %c0_i32_1 = arith.constant 0 : i32
    return %c0_i32, %c0_i32_0 : i32, i32
  }
  func.func @transform_3(%arg0: i32) -> (i32, i32, i32) {
    %c0_i32 = arith.constant 0 : i32
    %c0_i32_0 = arith.constant 0 : i32
    %c0_i32_1 = arith.constant 0 : i32
    return %arg0, %c0_i32, %c0_i32_0 : i32, i32, i32
  }
  func.func @transform_4(%arg0: i32) -> (i32, i32, i32) {
    %c0_i32 = arith.constant 0 : i32
    %c0_i32_0 = arith.constant 0 : i32
    %c0_i32_1 = arith.constant 0 : i32
    return %arg0, %c0_i32, %c0_i32_0 : i32, i32, i32
  }
}

module attributes {stable_mosaic.version = 11 : i64} {
  func.func @_fused_linear_kernel(%arg0: i32, %arg1: memref<18x256xf32, #tpu.memory_space<vmem>>, %arg2: memref<1x256xf32, #tpu.memory_space<vmem>>, %arg3: memref<1x256xf32, #tpu.memory_space<vmem>>, %arg4: memref<256x128xbf16, #tpu.memory_space<vmem>>, %arg5: memref<1x128xf32, #tpu.memory_space<vmem>>, %arg6: memref<18x128xf32, #tpu.memory_space<vmem>>, %arg7: memref<18x128xf32, #tpu.memory_space<vmem>>) attributes {dimension_semantics = [#tpu.dimension_semantics<parallel>], iteration_bounds = array<i64: 1>, scalar_prefetch = 0 : i64, scratch_operands = 0 : i64, tpu.core_type = #tpu.core_type<tc>, window_params = [{transform_indices = @transform_0, window_bounds = array<i64: 18, 256>}, {pipeline_mode = #tpu.pipeline_mode<synchronous>, transform_indices = @transform_1, window_bounds = array<i64: 1, 256>}, {pipeline_mode = #tpu.pipeline_mode<synchronous>, transform_indices = @transform_2, window_bounds = array<i64: 1, 256>}, {pipeline_mode = #tpu.pipeline_mode<synchronous>, transform_indices = @transform_3, window_bounds = array<i64: 256, 128>}, {pipeline_mode = #tpu.pipeline_mode<synchronous>, transform_indices = @transform_4, window_bounds = array<i64: 1, 128>}, {transform_indices = @transform_5, window_bounds = array<i64: 18, 128>}, {transform_indices = @transform_6, window_bounds = array<i64: 18, 128>}]} {
    %c0 = arith.constant 0 : index
    %c0_0 = arith.constant 0 : index
    %0 = vector.load %arg1[%c0, %c0_0] : memref<18x256xf32, #tpu.memory_space<vmem>>, vector<18x256xf32>
    %c0_1 = arith.constant 0 : index
    %c0_2 = arith.constant 0 : index
    %1 = vector.load %arg2[%c0_1, %c0_2] : memref<1x256xf32, #tpu.memory_space<vmem>>, vector<1x256xf32>
    %2 = vector.broadcast %1 : vector<1x256xf32> to vector<18x256xf32>
    %3 = arith.mulf %0, %2 : vector<18x256xf32>
    %c0_3 = arith.constant 0 : index
    %c0_4 = arith.constant 0 : index
    %4 = vector.load %arg3[%c0_3, %c0_4] : memref<1x256xf32, #tpu.memory_space<vmem>>, vector<1x256xf32>
    %5 = vector.broadcast %4 : vector<1x256xf32> to vector<18x256xf32>
    %6 = arith.addf %3, %5 : vector<18x256xf32>
    %7 = arith.negf %6 : vector<18x256xf32>
    %8 = math.exp %7 : vector<18x256xf32>
    %cst = arith.constant 1.000000e+00 : f32
    %9 = vector.broadcast %cst : f32 to vector<18x256xf32>
    %10 = arith.addf %9, %8 : vector<18x256xf32>
    %11 = arith.divf %9, %10 : vector<18x256xf32>
    %12 = arith.mulf %6, %11 : vector<18x256xf32>
    %13 = arith.truncf %12 : vector<18x256xf32> to vector<18x256xbf16>
    %c0_5 = arith.constant 0 : index
    %c0_6 = arith.constant 0 : index
    %14 = vector.load %arg4[%c0_5, %c0_6] : memref<256x128xbf16, #tpu.memory_space<vmem>>, vector<256x128xbf16>
    %cst_7 = arith.constant dense<0.000000e+00> : vector<18x128xf32>
    %15 = tpu.matmul %13, %14, %cst_7 {dimension_numbers = #tpu.dot_dimension_numbers<[1], [0], [0], [1], [0, 0, 1, 1], [], []>} : vector<18x256xbf16>, vector<256x128xbf16>, vector<18x128xf32> -> vector<18x128xf32>
    %c0_8 = arith.constant 0 : index
    %c0_9 = arith.constant 0 : index
    %16 = vector.load %arg5[%c0_8, %c0_9] : memref<1x128xf32, #tpu.memory_space<vmem>>, vector<1x128xf32>
    %17 = vector.broadcast %16 : vector<1x128xf32> to vector<18x128xf32>
    %18 = arith.addf %15, %17 : vector<18x128xf32>
    %c0_10 = arith.constant 0 : index
    %c0_11 = arith.constant 0 : index
    %19 = vector.load %arg6[%c0_10, %c0_11] : memref<18x128xf32, #tpu.memory_space<vmem>>, vector<18x128xf32>
    %cst_12 = arith.constant 1.000000e+00 : f32
    %20 = vector.broadcast %cst_12 : f32 to vector<18x128xf32>
    %21 = arith.mulf %20, %18 : vector<18x128xf32>
    %22 = arith.addf %19, %21 : vector<18x128xf32>
    %c0_13 = arith.constant 0 : index
    %c0_14 = arith.constant 0 : index
    %23 = vector.load %arg7[%c0_13, %c0_14] : memref<18x128xf32, #tpu.memory_space<vmem>>, vector<18x128xf32>
    tpu.vector_store %arg7[%c0_13, %c0_14], %22 {strides = array<i32>} : memref<18x128xf32, #tpu.memory_space<vmem>>, vector<18x128xf32>,
    return
  }
  func.func @transform_0(%arg0: i32) -> (i32, i32) {
    %c0_i32 = arith.constant 0 : i32
    %c0_i32_0 = arith.constant 0 : i32
    return %arg0, %c0_i32 : i32, i32
  }
  func.func @transform_1(%arg0: i32) -> (i32, i32) {
    %c0_i32 = arith.constant 0 : i32
    %c0_i32_0 = arith.constant 0 : i32
    %c0_i32_1 = arith.constant 0 : i32
    return %c0_i32, %c0_i32_0 : i32, i32
  }
  func.func @transform_2(%arg0: i32) -> (i32, i32) {
    %c0_i32 = arith.constant 0 : i32
    %c0_i32_0 = arith.constant 0 : i32
    %c0_i32_1 = arith.constant 0 : i32
    return %c0_i32, %c0_i32_0 : i32, i32
  }
  func.func @transform_3(%arg0: i32) -> (i32, i32) {
    %c0_i32 = arith.constant 0 : i32
    %c0_i32_0 = arith.constant 0 : i32
    %c0_i32_1 = arith.constant 0 : i32
    return %c0_i32, %c0_i32_0 : i32, i32
  }
  func.func @transform_4(%arg0: i32) -> (i32, i32) {
    %c0_i32 = arith.constant 0 : i32
    %c0_i32_0 = arith.constant 0 : i32
    %c0_i32_1 = arith.constant 0 : i32
    return %c0_i32, %c0_i32_0 : i32, i32
  }
  func.func @transform_5(%arg0: i32) -> (i32, i32) {
    %c0_i32 = arith.constant 0 : i32
    %c0_i32_0 = arith.constant 0 : i32
    return %arg0, %c0_i32 : i32, i32
  }
  func.func @transform_6(%arg0: i32) -> (i32, i32) {
    %c0_i32 = arith.constant 0 : i32
    %c0_i32_0 = arith.constant 0 : i32
    return %arg0, %c0_i32 : i32, i32
  }
}

module attributes {stable_mosaic.version = 11 : i64} {
  func.func @_fused_linear_kernel(%arg0: i32, %arg1: memref<18x512xbf16, #tpu.memory_space<vmem>>, %arg2: memref<512x128xbf16, #tpu.memory_space<vmem>>, %arg3: memref<1x128xf32, #tpu.memory_space<vmem>>, %arg4: memref<18x128xf32, #tpu.memory_space<vmem>>, %arg5: memref<1x128xf32, #tpu.memory_space<vmem>>, %arg6: memref<1x128xf32, #tpu.memory_space<vmem>>, %arg7: memref<18x128xf32, #tpu.memory_space<vmem>>) attributes {dimension_semantics = [#tpu.dimension_semantics<parallel>], iteration_bounds = array<i64: 1>, scalar_prefetch = 0 : i64, scratch_operands = 0 : i64, tpu.core_type = #tpu.core_type<tc>, window_params = [{transform_indices = @transform_0, window_bounds = array<i64: 18, 512>}, {pipeline_mode = #tpu.pipeline_mode<synchronous>, transform_indices = @transform_1, window_bounds = array<i64: 512, 128>}, {pipeline_mode = #tpu.pipeline_mode<synchronous>, transform_indices = @transform_2, window_bounds = array<i64: 1, 128>}, {transform_indices = @transform_3, window_bounds = array<i64: 18, 128>}, {pipeline_mode = #tpu.pipeline_mode<synchronous>, transform_indices = @transform_4, window_bounds = array<i64: 1, 128>}, {pipeline_mode = #tpu.pipeline_mode<synchronous>, transform_indices = @transform_5, window_bounds = array<i64: 1, 128>}, {transform_indices = @transform_6, window_bounds = array<i64: 18, 128>}]} {
    %c0 = arith.constant 0 : index
    %c0_0 = arith.constant 0 : index
    %0 = vector.load %arg1[%c0, %c0_0] : memref<18x512xbf16, #tpu.memory_space<vmem>>, vector<18x512xbf16>
    %c0_1 = arith.constant 0 : index
    %c0_2 = arith.constant 0 : index
    %1 = vector.load %arg2[%c0_1, %c0_2] : memref<512x128xbf16, #tpu.memory_space<vmem>>, vector<512x128xbf16>
    %cst = arith.constant dense<0.000000e+00> : vector<18x128xf32>
    %2 = tpu.matmul %0, %1, %cst {dimension_numbers = #tpu.dot_dimension_numbers<[1], [0], [0], [1], [0, 0, 1, 1], [], []>} : vector<18x512xbf16>, vector<512x128xbf16>, vector<18x128xf32> -> vector<18x128xf32>
    %c0_3 = arith.constant 0 : index
    %c0_4 = arith.constant 0 : index
    %3 = vector.load %arg3[%c0_3, %c0_4] : memref<1x128xf32, #tpu.memory_space<vmem>>, vector<1x128xf32>
    %4 = vector.broadcast %3 : vector<1x128xf32> to vector<18x128xf32>
    %5 = arith.addf %2, %4 : vector<18x128xf32>
    %c0_5 = arith.constant 0 : index
    %c0_6 = arith.constant 0 : index
    %6 = vector.load %arg4[%c0_5, %c0_6] : memref<18x128xf32, #tpu.memory_space<vmem>>, vector<18x128xf32>
    %cst_7 = arith.constant 5.000000e-01 : f32
    %7 = vector.broadcast %cst_7 : f32 to vector<18x128xf32>
    %8 = arith.mulf %7, %5 : vector<18x128xf32>
    %9 = arith.addf %6, %8 : vector<18x128xf32>
    %cst_8 = arith.constant dense<0.000000e+00> : vector<18xf32>
    %10 = vector.multi_reduction <add>, %9, %cst_8 [1] : vector<18x128xf32> to vector<18xf32>
    %11 = vector.shape_cast %10 : vector<18xf32> to vector<18x1xf32>
    %cst_9 = arith.constant 1.280000e+02 : f32
    %12 = vector.broadcast %cst_9 : f32 to vector<18x1xf32>
    %13 = arith.divf %11, %12 : vector<18x1xf32>
    %14 = vector.broadcast %13 : vector<18x1xf32> to vector<18x128xf32>
    %15 = arith.subf %9, %14 : vector<18x128xf32>
    %16 = arith.mulf %15, %15 : vector<18x128xf32>
    %cst_10 = arith.constant dense<0.000000e+00> : vector<18xf32>
    %17 = vector.multi_reduction <add>, %16, %cst_10 [1] : vector<18x128xf32> to vector<18xf32>
    %18 = vector.shape_cast %17 : vector<18xf32> to vector<18x1xf32>
    %cst_11 = arith.constant 1.280000e+02 : f32
    %19 = vector.broadcast %cst_11 : f32 to vector<18x1xf32>
    %20 = arith.divf %18, %19 : vector<18x1xf32>
    %21 = vector.broadcast %13 : vector<18x1xf32> to vector<18x128xf32>
    %22 = arith.subf %9, %21 : vector<18x128xf32>
    %cst_12 = arith.constant 9.99999974E-6 : f32
    %23 = vector.broadcast %cst_12 : f32 to vector<18x1xf32>
    %24 = arith.addf %20, %23 : vector<18x1xf32>
    %25 = math.rsqrt %24 : vector<18x1xf32>
    %26 = vector.broadcast %25 : vector<18x1xf32> to vector<18x128xf32>
    %27 = arith.mulf %22, %26 : vector<18x128xf32>
    %c0_13 = arith.constant 0 : index
    %c0_14 = arith.constant 0 : index
    %28 = vector.load %arg5[%c0_13, %c0_14] : memref<1x128xf32, #tpu.memory_space<vmem>>, vector<1x128xf32>
    %29 = vector.broadcast %28 : vector<1x128xf32> to vector<18x128xf32>
    %30 = arith.mulf %27, %29 : vector<18x128xf32>
    %c0_15 = arith.constant 0 : index
    %c0_16 = arith.constant 0 : index
    %31 = vector.load %arg6[%c0_15, %c0_16] : memref<1x128xf32, #tpu.memory_space<vmem>>, vector<1x128xf32>
    %32 = vector.broadcast %31 : vector<1x128xf32> to vector<18x128xf32>
    %33 = arith.addf %30, %32 : vector<18x128xf32>
    %c0_17 = arith.constant 0 : index
    %c0_18 = arith.constant 0 : index
    %34 = vector.load %arg7[%c0_17, %c0_18] : memref<18x128xf32, #tpu.memory_space<vmem>>, vector<18x128xf32>
    tpu.vector_store %arg7[%c0_17, %c0_18], %33 {strides = array<i32>} : memref<18x128xf32, #tpu.memory_space<vmem>>, vector<18x128xf32>,
    return
  }
  func.func @transform_0(%arg0: i32) -> (i32, i32) {
    %c0_i32 = arith.constant 0 : i32
    %c0_i32_0 = arith.constant 0 : i32
    return %arg0, %c0_i32 : i32, i32
  }
  func.func @transform_1(%arg0: i32) -> (i32, i32) {
    %c0_i32 = arith.constant 0 : i32
    %c0_i32_0 = arith.constant 0 : i32
    %c0_i32_1 = arith.constant 0 : i32
    return %c0_i32, %c0_i32_0 : i32, i32
  }
  func.func @transform_2(%arg0: i32) -> (i32, i32) {
    %c0_i32 = arith.constant 0 : i32
    %c0_i32_0 = arith.constant 0 : i32
    %c0_i32_1 = arith.constant 0 : i32
    return %c0_i32, %c0_i32_0 : i32, i32
  }
  func.func @transform_3(%arg0: i32) -> (i32, i32) {
    %c0_i32 = arith.constant 0 : i32
    %c0_i32_0 = arith.constant 0 : i32
    return %arg0, %c0_i32 : i32, i32
  }
  func.func @transform_4(%arg0: i32) -> (i32, i32) {
    %c0_i32 = arith.constant 0 : i32
    %c0_i32_0 = arith.constant 0 : i32
    %c0_i32_1 = arith.constant 0 : i32
    return %c0_i32, %c0_i32_0 : i32, i32
  }
  func.func @transform_5(%arg0: i32) -> (i32, i32) {
    %c0_i32 = arith.constant 0 : i32
    %c0_i32_0 = arith.constant 0 : i32
    %c0_i32_1 = arith.constant 0 : i32
    return %c0_i32, %c0_i32_0 : i32, i32
  }
  func.func @transform_6(%arg0: i32) -> (i32, i32) {
    %c0_i32 = arith.constant 0 : i32
    %c0_i32_0 = arith.constant 0 : i32
    return %arg0, %c0_i32 : i32, i32
  }
}

</mosaic_0001>

<bundles_post_ra>
// kernel: model_forward.13
= control target key start
LH: loop header
LB: loop body
LE: loop exit
PB: predicated region body
PF: predicated region fallthrough
CT: control target
= control target key end

     0   :  { %8 = vsyncpa [#allocation3], 0  ;;  %s463_s12 = smov 0   ;;  %s465_s13 = smov 0   ;;  %s525_s0 = inlined_call_operand.vmem [shape: f32[2,8,128], index: 0, kind: input, shape index: {}]   ;;  %s526_s1 = inlined_call_operand.vmem [shape: f32[8,128], index: 1, kind: input, shape index: {}]   ;;  %s527_s2 = inlined_call_operand.vmem [shape: f32[2], index: 2, kind: input, shape index: {}]   ;;  %s528_s3 = inlined_call_operand.vmem [shape: f32[2,8,128], index: 3, kind: output, shape index: {}]  }
   0x1   :  { %s467_s14 = smov 0  }
   0x2 LB: > { %s348_s15 = sadd.s32 4294967295, %s440_s14   ;;  %s26_s16 = sadd.s32 1, %s436_s13  ;;  %s440_s14 = sphi %s467_s14, %s14_s14   ;;  %s436_s13 = sphi %s465_s13, %s532_s13   ;;  %s432_s12 = sphi %s463_s12, %s531_s12  }
   0x3   : > { %p28_p0 = scmp.ge.s32.totalorder %s26_s16, 2  ;;  %p350_p1 = scmp.ge.s32.totalorder %s440_s14, 1 }
   0x4   : > { %p134_p2 = scmp.lt.s32.totalorder %s440_s14, 3  ;;  %p488_p4 = scmp.eq.s32.totalorder %s348_s15, 0 }
   0x5   : > { %s534_s16 = smov (%p28_p0, %s26_s16), 0  ;;  %s154_s21 = sshll.u32 %s527_s2, 4  ;;  %s155_s21 = int_to_ptr.vmem [resolvable:$true] %s154_s21 }
   0x6   : > { %p484_p3 = pnand %p350_p1, %p134_p2  ;;  %s399_s22 = scalar_lea.vmem %s155_s21, 16 }
   0x7   : > { %p400_p7 = scmp.ne.s32.totalorder %s155_s21, %s399_s22  ;;  %p407_p11 = scmp.lt.s32.totalorder %s155_s21, %s155_s21 }
   0x8   : > { %p366_p5 = pneg %p484_p3  ;;  %p408_p12 = scmp.lt.s32.totalorder %s399_s22, %s399_s22 }
   0xa   : > { %p367_p6 = pnand %p488_p4, %p366_p5  ;;  %p409_p13 = por %p408_p12, %p407_p11 }
   0xc   : > { %p401_p8 = pneg %p367_p6 }
   0xe   : > { %p402_p9 = pnand %p401_p8, %p400_p7 }
  0x10   : > { %p403_p10 = pneg %p402_p9 }
  0x12   : > { %p410_p0 = pnand %p409_p13, %p403_p10 }
  0x14   : > { %413 = shalt.err (!%p410_p0)
}
  0x15   : > { %s442_s23 = smov [#allocation2]   ;;  %177 = sbr.rel (%p484_p3) target bundleno = 67 (0x43), region = 32 }
  0x16   : > { %369 = dma.vmem_to_smem (!%p367_p6), %s155_s21, 16, %s442_s23, [#allocation3]  }
  0x1c   : > { %427 = dma.done.wait (%p488_p4), [#allocation3], 16  }
  0x1d   : > { %429 = vsyncadd (%p488_p4), [#allocation3], 4294967280 }
  0x1e   : > { %183 = sfence }
  0x1f   : > { %p210_p1 = scmp.lt.s32.totalorder %s432_s12, 1  ;;  %s228_s24 = sld [smem:[#allocation2]]  ;;  %v243_v11 = vld [vmem:[%s526_s1] sm:$0xff] }
  0x20   : > { %s358_s25 = sld [smem:[#allocation2 + $0x1]] }
  0x21   : > { %s536_s12 = smov (!%p210_p1, %s432_s12), 1 }
  0x22   : > { %s356_s26 = sshll.u32 %s536_s12, 3 }
  0x23   : > { %s216_s29 = scalar_lea.vmem %s525_s0, %s356_s26  ;;  %s227_s7 = scalar_lea.vmem %s528_s3, %s356_s26 }
  0x24   : > { %v230_v0 = vld [vmem:[%s216_s29] sm:$0xff] }
  0x25   : > { %v231_v1 = vstv %s228_s24 }
  0x26   : > { %v232_v2 = vsub.f32 %v230_v0, %v231_v1  ;;  %v233_v3 = vstv %s358_s25 }
  0x28   : > { %v234_v4 = vmul.f32 %v233_v3, %v232_v2 }
  0x2a   : > { %v236_v5 = vmin.f32 %v234_v4, 0.0  ;;  %vm235_vm0 = vcmp.gt.f32.partialorder %v234_v4, 0.0 }
  0x2c   : > { %v237_v6 = vmul.f32 1.442695, %v236_v5 }
  0x2e   : > { %397 = vpow2.f32 %v237_v6 }
  0x38   : > { %v398_v7 = vpop.eup %397 }
  0x39   : > { %v359_v8 = vadd.f32 -1.0, %v398_v7 }
  0x3b   : > { %v240_v9 = vmul.f32 1.6732632, %v359_v8 }
  0x3d   : > { %v241_v10 = vsel %vm235_vm0, %v234_v4, %v240_v9 }
  0x3e   : > { %v242_v12 = vmul.f32 1.050701, %v241_v10 }
  0x40   : > { %v244_v13 = vadd.f32 %v243_v11, %v242_v12 }
  0x42   : > { %245 = vst [vmem:[%s227_s7] sm:$0xff] %v244_v13 }
  0x43 PF: > { %s14_s14 = sadd.s32 1, %s440_s14   ;;  %s531_s12 = smov %s436_s13 }
  0x44   : > { %p11_p2 = scmp.ge.s32.totalorder %s14_s14, 4   ;;  %s532_s13 = smov %s534_s16 }
  0x46   :  { %13 = sbr.rel (!%p11_p2) target bundleno = 2 (0x2), region = 70 }
  0x4d   :  { %271 = vsyncpa [#allocation3], 1 }
  0x4e   :  { %273 = vsyncpa [#allocation3 + $0x1], 1 }

// kernel: model_forward.12
= control target key start
LH: loop header
LB: loop body
LE: loop exit
PB: predicated region body
PF: predicated region fallthrough
CT: control target
= control target key end

     0   :  { %8 = vsyncpa [#allocation3], 0  ;;  %s1130_s0 = inlined_call_operand.hbm [shape: f32[16,1024], index: 0, kind: input, shape index: {}]   ;;  %s1131_s1 = inlined_call_operand.hbm [shape: bf16[1024,128], index: 1, kind: input, shape index: {}]   ;;  %s1132_s2 = inlined_call_operand.hbm [shape: f32[1,128], index: 2, kind: input, shape index: {}]   ;;  %s1133_s3 = inlined_call_operand.vmem [shape: f32[16,128], index: 3, kind: output, shape index: {}]  }
   0x1   :  { %9 = vsyncpa [#allocation5], 0  ;;  %s1062_s12 = smov [#allocation4]   ;;  %s992_s16 = scalar_lea.hbm %s1131_s1, 8192 }
   0x2   :  { %s27_s13 = sshll.u32 %s1062_s12, 4  ;;  %p993_p0 = scmp.ne.s32.totalorder %s1131_s1, %s992_s16  ;;  %s28_s13 = int_to_ptr.vmem [resolvable:$true] %s27_s13 }
   0x3   :  { %p996_p1 = scmp.lt.u32.totalorder %s992_s16, %s1131_s1 }
   0x5   :  { %p998_p2 = pnand %p996_p1, %p993_p0 }
   0x7   :  { %1001 = shalt.err (!%p998_p2)
}
   0x8   :  { %s1002_s21 = scalar_lea.vmem %s28_s13, 8192  ;;  %p1007_p4 = scmp.lt.s32.totalorder %s28_s13, %s28_s13 }
   0x9   :  { %p1003_p3 = scmp.ne.s32.totalorder %s28_s13, %s1002_s21  ;;  %p1008_p5 = scmp.lt.s32.totalorder %s1002_s21, %s1002_s21 }
   0xb   :  { %p1009_p6 = por %p1008_p5, %p1007_p4 }
   0xd   :  { %p1010_p7 = pnand %p1009_p6, %p1003_p3 }
   0xf   :  { %1013 = shalt.err (!%p1010_p7)
}
  0x10   :  { %s1063_s22 = smov 64   ;;  %s1064_s23 = smov 4  }
  0x11   :  { %33 = dma.hbm_to_vmem [thread:$0]  %s1131_s1, 8192, %s28_s13, [#allocation5], %s1063_s22, %s1063_s22, %s1064_s23  }
  0x12   :  { %s1065_s26 = smov [#allocation2]   ;;  %s1014_s30 = scalar_lea.hbm %s1130_s0, 2048 }
  0x13   :  { %s15_s27 = sshll.u32 %s1065_s26, 4  ;;  %p1015_p8 = scmp.ne.s32.totalorder %s1130_s0, %s1014_s30  ;;  %s16_s27 = int_to_ptr.vmem [resolvable:$true] %s15_s27 }
  0x14   :  { %p1018_p9 = scmp.lt.u32.totalorder %s1014_s30, %s1130_s0 }
  0x16   :  { %p1020_p10 = pnand %p1018_p9, %p1015_p8 }
  0x18   :  { %1023 = shalt.err (!%p1020_p10)
}
  0x19   :  { %s1024_s8 = scalar_lea.vmem %s16_s27, 2048  ;;  %p1029_p12 = scmp.lt.s32.totalorder %s16_s27, %s16_s27 }
  0x1a   :  { %p1025_p11 = scmp.ne.s32.totalorder %s16_s27, %s1024_s8  ;;  %p1030_p13 = scmp.lt.s32.totalorder %s1024_s8, %s1024_s8 }
  0x1c   :  { %p1031_p0 = por %p1030_p13, %p1029_p12 }
  0x1e   :  { %p1032_p1 = pnand %p1031_p0, %p1025_p11 }
  0x20   :  { %1035 = shalt.err (!%p1032_p1)
}
  0x21   :  { %s1066_s1 = smov 1024   ;;  %s1067_s11 = smov [#allocation6]  }
  0x22   :  { %21 = dma.hbm_to_vmem [thread:$0]  %s1130_s0, 2048, %s16_s27, [#allocation3], %s1066_s1, %s1066_s1, %s1063_s22  }
  0x23   :  { %s40_s12 = sshll.u32 %s1067_s11, 4  ;;  %s1036_s15 = scalar_lea.hbm %s1132_s2, 16  ;;  %s41_s12 = int_to_ptr.vmem [resolvable:$true] %s40_s12 }
  0x24   :  { %p1037_p2 = scmp.ne.s32.totalorder %s1132_s2, %s1036_s15  ;;  %p1040_p3 = scmp.lt.u32.totalorder %s1036_s15, %s1132_s2 }
  0x26   :  { %p1042_p4 = pnand %p1040_p3, %p1037_p2 }
  0x28   :  { %1045 = shalt.err (!%p1042_p4)
}
  0x29   :  { %s1046_s20 = scalar_lea.vmem %s41_s12, 16  ;;  %s1050_s0 = scalar_lea.vmem %s41_s12, 32 }
  0x2a   :  { %p1047_p5 = scmp.ne.s32.totalorder %s41_s12, %s1046_s20  ;;  %p1051_p6 = scmp.lt.s32.totalorder %s41_s12, %s41_s12 }
  0x2b   :  { %p1052_p7 = scmp.lt.s32.totalorder %s1050_s0, %s1046_s20 }
  0x2d   :  { %p1053_p8 = por %p1052_p7, %p1051_p6 }
  0x2f   :  { %p1054_p9 = pnand %p1053_p8, %p1047_p5 }
  0x31   :  { %1057 = shalt.err (!%p1054_p9)
}
  0x32   :  { %43 = dma.hbm_to_vmem [thread:$0]  %s1132_s2, 16, %s41_s12, [#allocation5]  }
  0x33   :  { %1058 = dma.done.wait [#allocation3], 2048  }
  0x34   :  { %1059 = vsyncadd [#allocation3], 4294965248 }
  0x35   :  { %1060 = dma.done.wait [#allocation5], 8208  }
  0x36   :  { %1061 = vsyncadd [#allocation5], 4294959088  ;;  %v928_v0 = vld [vmem:[#allocation4 + $0x40] sm:$0xff]   ;;  %v932_v4 = vld [vmem:[#allocation4 + $0x48] sm:$0xff]  }
  0x37   :  { %v929_v1 = vld [vmem:[#allocation4 + $0xc0] sm:$0xff]   ;;  %834 = vmatprep.subr.bf16.mxu0 %v928_v0  ;;  %v933_v5 = vld [vmem:[#allocation4 + $0xc8] sm:$0xff]   ;;  %v936_v8 = vld [vmem:[#allocation4 + $0x50] sm:$0xff]  }
  0x38   :  { %v930_v2 = vld [vmem:[#allocation4] sm:$0xff]   ;;  %856 = vmatprep.subr.bf16.mxu1 %v929_v1  ;;  %v934_v6 = vld [vmem:[#allocation4 + $0x8] sm:$0xff]   ;;  %v937_v9 = vld [vmem:[#allocation4 + $0xd0] sm:$0xff]  }
  0x39   :  { %v931_v3 = vld [vmem:[#allocation4 + $0x80] sm:$0xff]   ;;  %835 = vmatpush3.bf16.msra.mxu0 %v930_v2  ;;  %v935_v7 = vld [vmem:[#allocation4 + $0x88] sm:$0xff]   ;;  %v938_v10 = vld [vmem:[#allocation4 + $0x10] sm:$0xff]  }
  0x3a   :  { %857 = vmatpush3.bf16.msra.mxu1 %v931_v3  ;;  %836 = vmatprep.subr.bf16.mxu0 %v932_v4  ;;  %v939_v11 = vld [vmem:[#allocation4 + $0x90] sm:$0xff]   ;;  %v940_v12 = vld [vmem:[#allocation4 + $0x58] sm:$0xff]   ;;  %v944_v16 = vld [vmem:[#allocation4 + $0x60] sm:$0xff]  }
  0x3b   :  { %858 = vmatprep.subr.bf16.mxu1 %v933_v5  ;;  %v941_v13 = vld [vmem:[#allocation4 + $0xd8] sm:$0xff]   ;;  %v945_v17 = vld [vmem:[#allocation4 + $0xe0] sm:$0xff]   ;;  %v948_v20 = vld [vmem:[#allocation4 + $0x68] sm:$0xff]  }
  0x3c   :  { %v942_v14 = vld [vmem:[#allocation4 + $0x18] sm:$0xff]   ;;  %v946_v18 = vld [vmem:[#allocation4 + $0x20] sm:$0xff]   ;;  %v949_v21 = vld [vmem:[#allocation4 + $0xe8] sm:$0xff]  }
  0x3d   :  { %837 = vmatpush3.bf16.msra.mxu0 %v934_v6  ;;  %v943_v15 = vld [vmem:[#allocation4 + $0x98] sm:$0xff]   ;;  %v947_v19 = vld [vmem:[#allocation4 + $0xa0] sm:$0xff]   ;;  %v950_v22 = vld [vmem:[#allocation4 + $0x28] sm:$0xff]  }
  0x3e   :  { %859 = vmatpush3.bf16.msra.mxu1 %v935_v7  ;;  %838 = vmatprep.subr.bf16.mxu0 %v936_v8  ;;  %v951_v23 = vld [vmem:[#allocation4 + $0xa8] sm:$0xff]   ;;  %v952_v24 = vld [vmem:[#allocation4 + $0x70] sm:$0xff]   ;;  %v956_v28 = vld [vmem:[#allocation4 + $0x78] sm:$0xff]  }
  0x3f   :  { %860 = vmatprep.subr.bf16.mxu1 %v937_v9  ;;  %v953_v25 = vld [vmem:[#allocation4 + $0xf0] sm:$0xff]   ;;  %v957_v29 = vld [vmem:[#allocation4 + $0xf8] sm:$0xff]   ;;  %v55_v32 = vld [vmem:[#allocation2 + $0x8] sm:$0xff] }
  0x40   :  { %v954_v26 = vld [vmem:[#allocation4 + $0x30] sm:$0xff]   ;;  %v958_v30 = vld [vmem:[#allocation4 + $0x38] sm:$0xff]   ;;  %v63_v33 = vld [vmem:[#allocation2 + $0x48] sm:$0xff] }
  0x41   :  { %839 = vmatpush3.bf16.msra.mxu0 %v938_v10  ;;  %v955_v27 = vld [vmem:[#allocation4 + $0xb0] sm:$0xff]   ;;  %v959_v31 = vld [vmem:[#allocation4 + $0xb8] sm:$0xff]   ;;  %v71_v35 = vpack.c.bf16 %v63_v33, %v55_v32  ;;  %v54_v37 = vld [vmem:[#allocation2] sm:$0xff] }
  0x42   :  { %861 = vmatpush3.bf16.msra.mxu1 %v939_v11  ;;  %840 = vmatprep.subr.bf16.mxu0 %v940_v12  ;;  %v57_v34 = vld [vmem:[#allocation2 + $0x18] sm:$0xff]  ;;  %v62_v38 = vld [vmem:[#allocation2 + $0x40] sm:$0xff]  ;;  %v56_v41 = vld [vmem:[#allocation2 + $0x10] sm:$0xff] }
  0x43   :  { %862 = vmatprep.subr.bf16.mxu1 %v941_v13  ;;  %v65_v36 = vld [vmem:[#allocation2 + $0x58] sm:$0xff]  ;;  %v70_v40 = vpack.c.bf16 %v62_v38, %v54_v37  ;;  %v64_v42 = vld [vmem:[#allocation2 + $0x50] sm:$0xff]  ;;  %629 = vmatprep.mubr.bf16.mxu0 %v71_v35  ;;  %v960_v44 = vld [vmem:[#allocation4 + $0x140] sm:$0xff]  }
  0x44   :  { %v73_v39 = vpack.c.bf16 %v65_v36, %v57_v34  ;;  %v72_v43 = vpack.c.bf16 %v64_v42, %v56_v41  ;;  %v961_v45 = vld [vmem:[#allocation4 + $0x1c0] sm:$0xff]   ;;  %v964_v48 = vld [vmem:[#allocation4 + $0x148] sm:$0xff]   ;;  %v968_v52 = vld [vmem:[#allocation4 + $0x150] sm:$0xff]  }
  0x45   :  { %841 = vmatpush3.bf16.msra.mxu0 %v942_v14  ;;  %v962_v46 = vld [vmem:[#allocation4 + $0x100] sm:$0xff]   ;;  %v965_v49 = vld [vmem:[#allocation4 + $0x1c8] sm:$0xff]   ;;  %v969_v53 = vld [vmem:[#allocation4 + $0x1d0] sm:$0xff]  }
  0x46   :  { %863 = vmatpush3.bf16.msra.mxu1 %v943_v15  ;;  %842 = vmatprep.subr.bf16.mxu0 %v944_v16  ;;  %v963_v47 = vld [vmem:[#allocation4 + $0x180] sm:$0xff]   ;;  %v966_v50 = vld [vmem:[#allocation4 + $0x108] sm:$0xff]   ;;  %v970_v54 = vld [vmem:[#allocation4 + $0x110] sm:$0xff]  }
  0x47   :  { %864 = vmatprep.subr.bf16.mxu1 %v945_v17  ;;  %670 = vmatprep.mubr.bf16.mxu1 %v73_v39  ;;  %v967_v51 = vld [vmem:[#allocation4 + $0x188] sm:$0xff]   ;;  %v971_v55 = vld [vmem:[#allocation4 + $0x190] sm:$0xff]   ;;  %v972_v56 = vld [vmem:[#allocation4 + $0x158] sm:$0xff]  }
  0x48   :  { %v973_v57 = vld [vmem:[#allocation4 + $0x1d8] sm:$0xff]   ;;  %v976_v60 = vld [vmem:[#allocation4 + $0x160] sm:$0xff]   ;;  %v980_v0 = vld [vmem:[#allocation4 + $0x168] sm:$0xff]  }
  0x49   :  { %843 = vmatpush3.bf16.msra.mxu0 %v946_v18  ;;  %v974_v58 = vld [vmem:[#allocation4 + $0x118] sm:$0xff]   ;;  %v977_v61 = vld [vmem:[#allocation4 + $0x1e0] sm:$0xff]   ;;  %v981_v1 = vld [vmem:[#allocation4 + $0x1e8] sm:$0xff]  }
  0x4a   :  { %865 = vmatpush3.bf16.msra.mxu1 %v947_v19  ;;  %844 = vmatprep.subr.bf16.mxu0 %v948_v20  ;;  %v975_v59 = vld [vmem:[#allocation4 + $0x198] sm:$0xff]   ;;  %v978_v62 = vld [vmem:[#allocation4 + $0x120] sm:$0xff]   ;;  %v982_v2 = vld [vmem:[#allocation4 + $0x128] sm:$0xff]  }
  0x4b   :  { %866 = vmatprep.subr.bf16.mxu1 %v949_v21  ;;  %v979_v63 = vld [vmem:[#allocation4 + $0x1a0] sm:$0xff]   ;;  %v983_v3 = vld [vmem:[#allocation4 + $0x1a8] sm:$0xff]   ;;  %v984_v4 = vld [vmem:[#allocation4 + $0x170] sm:$0xff]  }
  0x4c   :  { %v985_v5 = vld [vmem:[#allocation4 + $0x1f0] sm:$0xff]   ;;  %v988_v8 = vld [vmem:[#allocation4 + $0x178] sm:$0xff]   ;;  %v59_v12 = vld [vmem:[#allocation2 + $0x28] sm:$0xff] }
  0x4d   :  { %845 = vmatpush3.bf16.msra.mxu0 %v950_v22  ;;  %v986_v6 = vld [vmem:[#allocation4 + $0x130] sm:$0xff]   ;;  %v989_v9 = vld [vmem:[#allocation4 + $0x1f8] sm:$0xff]   ;;  %v67_v13 = vld [vmem:[#allocation2 + $0x68] sm:$0xff] }
  0x4e   :  { %867 = vmatpush3.bf16.msra.mxu1 %v951_v23  ;;  %846 = vmatprep.subr.bf16.mxu0 %v952_v24  ;;  %v987_v7 = vld [vmem:[#allocation4 + $0x1b0] sm:$0xff]   ;;  %v990_v10 = vld [vmem:[#allocation4 + $0x138] sm:$0xff]   ;;  %v75_v16 = vpack.c.bf16 %v67_v13, %v59_v12  ;;  %v58_v18 = vld [vmem:[#allocation2 + $0x20] sm:$0xff] }
  0x4f   :  { %868 = vmatprep.subr.bf16.mxu1 %v953_v25  ;;  %v991_v11 = vld [vmem:[#allocation4 + $0x1b8] sm:$0xff]   ;;  %v66_v19 = vld [vmem:[#allocation2 + $0x60] sm:$0xff]  ;;  %v60_v20 = vld [vmem:[#allocation2 + $0x30] sm:$0xff] }
  0x50   :  { %v61_v14 = vld [vmem:[#allocation2 + $0x38] sm:$0xff]  ;;  %v74_v21 = vpack.c.bf16 %v66_v19, %v58_v18  ;;  %v68_v22 = vld [vmem:[#allocation2 + $0x70] sm:$0xff] }
  0x51   :  { %847 = vmatpush3.bf16.msra.mxu0 %v954_v26  ;;  %v69_v15 = vld [vmem:[#allocation2 + $0x78] sm:$0xff]  ;;  %v76_v23 = vpack.c.bf16 %v68_v22, %v60_v20  ;;  %v769_v26 = vld [vmem:[#allocation6] ss:$0 sm:$0xff] }
  0x52   :  { %869 = vmatpush3.bf16.msra.mxu1 %v955_v27  ;;  %848 = vmatprep.subr.bf16.mxu0 %v956_v28  ;;  %v77_v17 = vpack.c.bf16 %v69_v15, %v61_v14 }
  0x53   :  { %870 = vmatprep.subr.bf16.mxu1 %v957_v29 }
  0x55   :  { %849 = vmatpush3.bf16.msra.mxu0 %v958_v30 }
  0x56   :  { %871 = vmatpush3.bf16.msra.mxu1 %v959_v31  ;;  %878 = vmatprep.subr.bf16.mxu0 %v960_v44 }
  0x57   :  { %900 = vmatprep.subr.bf16.mxu1 %v961_v45 }
  0x58   :  { %630 = vmatmul.mubr.bf16.vlgmr.msra.gmra.mrb[0].mxu0 %v70_v40 }
  0x59   :  { %671 = vmatmul.mubr.bf16.vlgmr.msra.gmra.mrb[0].mxu1 %v72_v43  ;;  %879 = vmatpush3.bf16.msra.mxu0 %v962_v46 }
  0x5a   :  { %901 = vmatpush3.bf16.msra.mxu1 %v963_v47  ;;  %880 = vmatprep.subr.bf16.mxu0 %v964_v48 }
  0x5b   :  { %902 = vmatprep.subr.bf16.mxu1 %v965_v49  ;;  %711 = vmatprep.mubr.bf16.mxu0 %v75_v16 }
  0x5c   :  { %752 = vmatprep.mubr.bf16.mxu1 %v77_v17 }
  0x5d   :  { %881 = vmatpush3.bf16.msra.mxu0 %v966_v50 }
  0x5e   :  { %903 = vmatpush3.bf16.msra.mxu1 %v967_v51  ;;  %882 = vmatprep.subr.bf16.mxu0 %v968_v52 }
  0x5f   :  { %904 = vmatprep.subr.bf16.mxu1 %v969_v53 }
  0x61   :  { %883 = vmatpush3.bf16.msra.mxu0 %v970_v54 }
  0x62   :  { %905 = vmatpush3.bf16.msra.mxu1 %v971_v55  ;;  %884 = vmatprep.subr.bf16.mxu0 %v972_v56 }
  0x63   :  { %906 = vmatprep.subr.bf16.mxu1 %v973_v57 }
  0x65   :  { %885 = vmatpush3.bf16.msra.mxu0 %v974_v58 }
  0x66   :  { %907 = vmatpush3.bf16.msra.mxu1 %v975_v59  ;;  %886 = vmatprep.subr.bf16.mxu0 %v976_v60 }
  0x67   :  { %908 = vmatprep.subr.bf16.mxu1 %v977_v61 }
  0x69   :  { %887 = vmatpush3.bf16.msra.mxu0 %v978_v62 }
  0x6a   :  { %909 = vmatpush3.bf16.msra.mxu1 %v979_v63  ;;  %888 = vmatprep.subr.bf16.mxu0 %v980_v0 }
  0x6b   :  { %910 = vmatprep.subr.bf16.mxu1 %v981_v1 }
  0x6d   :  { %889 = vmatpush3.bf16.msra.mxu0 %v982_v2 }
  0x6e   :  { %911 = vmatpush3.bf16.msra.mxu1 %v983_v3  ;;  %890 = vmatprep.subr.bf16.mxu0 %v984_v4 }
  0x6f   :  { %912 = vmatprep.subr.bf16.mxu1 %v985_v5 }
  0x71   :  { %891 = vmatpush3.bf16.msra.mxu0 %v986_v6 }
  0x72   :  { %913 = vmatpush3.bf16.msra.mxu1 %v987_v7  ;;  %892 = vmatprep.subr.bf16.mxu0 %v988_v8 }
  0x73   :  { %914 = vmatprep.subr.bf16.mxu1 %v989_v9 }
  0x75   :  { %893 = vmatpush3.bf16.msra.mxu0 %v990_v10 }
  0x76   :  { %915 = vmatpush3.bf16.msra.mxu1 %v991_v11 }
  0x78   :  { %712 = vmatmul.mubr.bf16.vlgmr.msra.gmra.mrb[4].mxu0 %v74_v21 }
  0x79   :  { %753 = vmatmul.mubr.bf16.vlgmr.msra.gmra.mrb[4].mxu1 %v76_v23 }
 0x12b   :  { %v850_v24 = vpop.f32.mrb[0].mxu0 }
 0x12c   :  { %v872_v25 = vpop.f32.mrb[0].mxu1  ;;  %v851_v27 = vpop.f32.mrb[1].mxu0 }
 0x12d   :  { %v852_v28 = vadd.f32 %v851_v27, %v850_v24  ;;  %v873_v29 = vpop.f32.mrb[1].mxu1  ;;  %v853_v30 = vpop.f32.mrb[2].mxu0 }
 0x12e   :  { %v874_v31 = vadd.f32 %v873_v29, %v872_v25  ;;  %v875_v32 = vpop.f32.mrb[2].mxu1  ;;  %v854_v33 = vpop.f32.mrb[3].mxu0 }
 0x12f   :  { %v632_v34 = vadd.f32 %v852_v28, %v769_v26  ;;  %v855_v35 = vadd.f32 %v854_v33, %v853_v30  ;;  %v876_v36 = vpop.f32.mrb[3].mxu1 }
 0x130   :  { %v877_v37 = vadd.f32 %v876_v36, %v875_v32 }
 0x131   :  { %v673_v38 = vadd.f32 %v874_v31, %v632_v34  ;;  %v635_v39 = vadd.f32 %v855_v35, %v769_v26 }
 0x133   :  { %v676_v40 = vadd.f32 %v877_v37, %v635_v39 }
 0x14b   :  { %v894_v41 = vpop.f32.mrb[4].mxu0 }
 0x14c   :  { %v916_v42 = vpop.f32.mrb[4].mxu1  ;;  %v895_v43 = vpop.f32.mrb[5].mxu0 }
 0x14d   :  { %v896_v44 = vadd.f32 %v895_v43, %v894_v41  ;;  %v917_v45 = vpop.f32.mrb[5].mxu1  ;;  %v897_v46 = vpop.f32.mrb[6].mxu0 }
 0x14e   :  { %v918_v47 = vadd.f32 %v917_v45, %v916_v42  ;;  %v919_v48 = vpop.f32.mrb[6].mxu1  ;;  %v898_v49 = vpop.f32.mrb[7].mxu0 }
 0x14f   :  { %v714_v50 = vadd.f32 %v896_v44, %v673_v38  ;;  %v899_v51 = vadd.f32 %v898_v49, %v897_v46  ;;  %v920_v52 = vpop.f32.mrb[7].mxu1 }
 0x150   :  { %v921_v53 = vadd.f32 %v920_v52, %v919_v48 }
 0x151   :  { %v755_v54 = vadd.f32 %v918_v47, %v714_v50  ;;  %v717_v55 = vadd.f32 %v899_v51, %v676_v40 }
 0x153   :  { %761 = vst [vmem:[%s1133_s3] sm:$0xff] %v755_v54  ;;  %v758_v56 = vadd.f32 %v921_v53, %v717_v55 }
 0x155   :  { %762 = vst [vmem:[%s1133_s3 + $0x8] sm:$0xff] %v758_v56 }
 0x156   :  { %767 = vsyncpa [#allocation3], 1 }
 0x157   :  { %768 = vsyncpa [#allocation5], 1 }

// kernel: model_forward.14
= control target key start
LH: loop header
LB: loop body
LE: loop exit
PB: predicated region body
PF: predicated region fallthrough
CT: control target
= control target key end

     0   :  { %10 = vsyncpa [#allocation3], 0  ;;  %s1023_s0 = inlined_call_operand.vmem [shape: f32[18,128], index: 0, kind: input, shape index: {}]   ;;  %s1024_s1 = inlined_call_operand.hbm [shape: f32[1,128], index: 1, kind: input, shape index: {}]   ;;  %s1025_s2 = inlined_call_operand.hbm [shape: f32[1,128], index: 2, kind: input, shape index: {}]   ;;  %s1026_s3 = inlined_call_operand.hbm [shape: bf16[128,512], index: 3, kind: input, shape index: {}]   ;;  %s1027_s4 = inlined_call_operand.hbm [shape: f32[1,512], index: 4, kind: input, shape index: {}]   ;;  %s1028_s5 = inlined_call_operand.vmem [shape: bf16[18,512], index: 5, kind: output, shape index: {}]  }
   0x1   :  { %11 = vsyncpa [#allocation5], 0 }
   0x2   :  { %12 = vsyncpa [#allocation8], 0  ;;  %s846_s18 = smov [#allocation4]   ;;  %s847_s20 = smov [#allocation2]  }
   0x3   :  { %s31_s19 = sshll.u32 %s846_s18, 4  ;;  %s21_s21 = sshll.u32 %s847_s20, 4  ;;  %s32_s19 = int_to_ptr.vmem [resolvable:$true] %s31_s19  ;;  %s22_s21 = int_to_ptr.vmem [resolvable:$true] %s21_s21 }
   0x4   :  { %s752_s24 = scalar_lea.hbm %s1025_s2, 16 }
   0x5   :  { %p753_p0 = scmp.ne.s32.totalorder %s1025_s2, %s752_s24  ;;  %p756_p1 = scmp.lt.u32.totalorder %s752_s24, %s1025_s2 }
   0x7   :  { %p758_p2 = pnand %p756_p1, %p753_p0 }
   0x9   :  { %761 = shalt.err (!%p758_p2)
}
   0xa   :  { %s762_s29 = scalar_lea.vmem %s32_s19, 16  ;;  %s766_s30 = scalar_lea.vmem %s32_s19, 32 }
   0xb   :  { %p763_p3 = scmp.ne.s32.totalorder %s32_s19, %s762_s29  ;;  %p767_p4 = scmp.lt.s32.totalorder %s32_s19, %s32_s19 }
   0xc   :  { %p768_p5 = scmp.lt.s32.totalorder %s766_s30, %s762_s29 }
   0xe   :  { %p769_p6 = por %p768_p5, %p767_p4 }
  0x10   :  { %p770_p7 = pnand %p769_p6, %p763_p3 }
  0x12   :  { %773 = shalt.err (!%p770_p7)
}
  0x13   :  { %34 = dma.hbm_to_vmem [thread:$0]  %s1025_s2, 16, %s32_s19, [#allocation5]  }
  0x14   :  { %s774_s10 = scalar_lea.hbm %s1024_s1, 16 }
  0x15   :  { %p775_p8 = scmp.ne.s32.totalorder %s1024_s1, %s774_s10  ;;  %p778_p9 = scmp.lt.u32.totalorder %s774_s10, %s1024_s1 }
  0x17   :  { %p780_p10 = pnand %p778_p9, %p775_p8 }
  0x19   :  { %783 = shalt.err (!%p780_p10)
}
  0x1a   :  { %s784_s15 = scalar_lea.vmem %s22_s21, 16  ;;  %s788_s16 = scalar_lea.vmem %s22_s21, 32 }
  0x1b   :  { %p785_p11 = scmp.ne.s32.totalorder %s22_s21, %s784_s15  ;;  %p789_p12 = scmp.lt.s32.totalorder %s22_s21, %s22_s21 }
  0x1c   :  { %p790_p13 = scmp.lt.s32.totalorder %s788_s16, %s784_s15 }
  0x1e   :  { %p791_p0 = por %p790_p13, %p789_p12 }
  0x20   :  { %p792_p1 = pnand %p791_p0, %p785_p11 }
  0x22   :  { %795 = shalt.err (!%p792_p1)
}
  0x23   :  { %24 = dma.hbm_to_vmem [thread:$0]  %s1024_s1, 16, %s22_s21, [#allocation3]  }
  0x24   :  { %s848_s18 = smov [#allocation6]   ;;  %s796_s23 = scalar_lea.hbm %s1026_s3, 4096 }
  0x25   :  { %s40_s19 = sshll.u32 %s848_s18, 4  ;;  %p797_p2 = scmp.ne.s32.totalorder %s1026_s3, %s796_s23  ;;  %s41_s19 = int_to_ptr.vmem [resolvable:$true] %s40_s19 }
  0x26   :  { %p800_p3 = scmp.lt.u32.totalorder %s796_s23, %s1026_s3 }
  0x28   :  { %p802_p4 = pnand %p800_p3, %p797_p2 }
  0x2a   :  { %805 = shalt.err (!%p802_p4)
}
  0x2b   :  { %s806_s28 = scalar_lea.vmem %s41_s19, 4096  ;;  %p811_p6 = scmp.lt.s32.totalorder %s41_s19, %s41_s19 }
  0x2c   :  { %p807_p5 = scmp.ne.s32.totalorder %s41_s19, %s806_s28  ;;  %p812_p7 = scmp.lt.s32.totalorder %s806_s28, %s806_s28 }
  0x2e   :  { %p813_p8 = por %p812_p7, %p811_p6 }
  0x30   :  { %p814_p9 = pnand %p813_p8, %p807_p5 }
  0x32   :  { %817 = shalt.err (!%p814_p9)
}
  0x33   :  { %s849_s1 = smov 256   ;;  %s850_s21 = smov 16  }
  0x34   :  { %46 = dma.hbm_to_vmem [thread:$0]  %s1026_s3, 4096, %s41_s19, [#allocation5], %s849_s1, %s849_s1, %s850_s21  }
  0x35   :  { %s851_s6 = smov [#allocation7]   ;;  %s818_s10 = scalar_lea.hbm %s1027_s4, 64 }
  0x36   :  { %s53_s7 = sshll.u32 %s851_s6, 4  ;;  %p819_p10 = scmp.ne.s32.totalorder %s1027_s4, %s818_s10  ;;  %s54_s7 = int_to_ptr.vmem [resolvable:$true] %s53_s7 }
  0x37   :  { %p822_p11 = scmp.lt.u32.totalorder %s818_s10, %s1027_s4 }
  0x39   :  { %p824_p12 = pnand %p822_p11, %p819_p10 }
  0x3b   :  { %827 = shalt.err (!%p824_p12)
}
  0x3c   :  { %s828_s15 = scalar_lea.vmem %s54_s7, 64  ;;  %p833_p0 = scmp.lt.s32.totalorder %s54_s7, %s54_s7 }
  0x3d   :  { %p829_p13 = scmp.ne.s32.totalorder %s54_s7, %s828_s15  ;;  %p834_p1 = scmp.lt.s32.totalorder %s828_s15, %s828_s15 }
  0x3f   :  { %p835_p2 = por %p834_p1, %p833_p0 }
  0x41   :  { %p836_p3 = pnand %p835_p2, %p829_p13 }
  0x43   :  { %839 = shalt.err (!%p836_p3)
}
  0x44   :  { %56 = dma.hbm_to_vmem [thread:$0]  %s1027_s4, 64, %s54_s7, [#allocation8]  }
  0x45   :  { %840 = dma.done.wait [#allocation3], 16  }
  0x46   :  { %841 = vsyncadd [#allocation3], 4294967280 }
  0x47   :  { %842 = dma.done.wait [#allocation5], 4112  }
  0x48   :  { %843 = vsyncadd [#allocation5], 4294963184 }
  0x49   :  { %844 = dma.done.wait [#allocation8], 64  }
  0x4a   :  { %845 = vsyncadd [#allocation8], 4294967232  ;;  %vm77_vm0 = vcmask 1041408   ;;  %v70_v0 = vld [vmem:[%s1023_s0] sm:$0xff]  ;;  %v72_v1 = vld [vmem:[%s1023_s0 + $0x10] sm:$0x3] }
  0x4b   :  { %v71_v2 = vld [vmem:[%s1023_s0 + $0x8] sm:$0xff]  ;;  %73 = vadd.xlane.f32.xlu0 %v70_v0  ;;  %v78_v3 = vsel %vm77_vm0, %v72_v1, 0.0  ;;  %v652_v5 = vld [vmem:[#allocation6 + $0xc] ss:$16 sps:$4 sm:$0xff]   ;;  %v654_v6 = vld [vmem:[#allocation6] ss:$16 sps:$4 sm:$0xff]  }
  0x4c   :  { %79 = vadd.xlane.f32.xlu1 %v78_v3  ;;  %v650_v4 = vld [vmem:[#allocation6 + $0x4] ss:$16 sps:$4 sm:$0xff]   ;;  %v655_v7 = vld [vmem:[#allocation6 + $0x8] ss:$16 sps:$4 sm:$0xff]   ;;  %v658_v9 = vld [vmem:[#allocation6 + $0x2c] ss:$16 sps:$4 sm:$0xff]   ;;  %397 = vmatprep.subr.bf16.mxu1 %v652_v5 }
  0x4d   :  { %v656_v8 = vld [vmem:[#allocation6 + $0x24] ss:$16 sps:$4 sm:$0xff]   ;;  %346 = vmatprep.subr.bf16.mxu0 %v650_v4  ;;  %398 = vmatpush1.bf16.msra.mxu1 %v655_v7  ;;  %v660_v23 = vld [vmem:[#allocation6 + $0x20] ss:$16 sps:$4 sm:$0xff]   ;;  %v661_v24 = vld [vmem:[#allocation6 + $0x28] ss:$16 sps:$4 sm:$0xff]  }
  0x4e   :  { %347 = vmatpush1.bf16.msra.mxu0 %v654_v6  ;;  %399 = vmatprep.subr.bf16.mxu1 %v658_v9  ;;  %v662_v25 = vld [vmem:[#allocation6 + $0x44] ss:$16 sps:$4 sm:$0xff]   ;;  %v664_v26 = vld [vmem:[#allocation6 + $0x4c] ss:$16 sps:$4 sm:$0xff]   ;;  %v666_v27 = vld [vmem:[#allocation6 + $0x40] ss:$16 sps:$4 sm:$0xff]  }
  0x4f   :  { %75 = vadd.xlane.f32.xlu0 %v71_v2  ;;  %348 = vmatprep.subr.bf16.mxu0 %v656_v8  ;;  %v667_v28 = vld [vmem:[#allocation6 + $0x48] ss:$16 sps:$4 sm:$0xff]   ;;  %v668_v29 = vld [vmem:[#allocation6 + $0x64] ss:$16 sps:$4 sm:$0xff]   ;;  %v670_v30 = vld [vmem:[#allocation6 + $0x6c] ss:$16 sps:$4 sm:$0xff]  }
  0x50   :  { %v672_v31 = vld [vmem:[#allocation6 + $0x60] ss:$16 sps:$4 sm:$0xff]   ;;  %v673_v32 = vld [vmem:[#allocation6 + $0x68] ss:$16 sps:$4 sm:$0xff]   ;;  %v674_v33 = vld [vmem:[#allocation6 + $0x84] ss:$16 sps:$4 sm:$0xff]  }
  0x51   :  { %400 = vmatpush1.bf16.msra.mxu1 %v661_v24  ;;  %v676_v34 = vld [vmem:[#allocation6 + $0x8c] ss:$16 sps:$4 sm:$0xff]   ;;  %v678_v35 = vld [vmem:[#allocation6 + $0x80] ss:$16 sps:$4 sm:$0xff]   ;;  %v679_v36 = vld [vmem:[#allocation6 + $0x88] ss:$16 sps:$4 sm:$0xff]  }
  0x52   :  { %349 = vmatpush1.bf16.msra.mxu0 %v660_v23  ;;  %401 = vmatprep.subr.bf16.mxu1 %v664_v26  ;;  %v680_v37 = vld [vmem:[#allocation6 + $0xa4] ss:$16 sps:$4 sm:$0xff]   ;;  %v682_v38 = vld [vmem:[#allocation6 + $0xac] ss:$16 sps:$4 sm:$0xff]   ;;  %v684_v39 = vld [vmem:[#allocation6 + $0xa0] ss:$16 sps:$4 sm:$0xff]  }
  0x53   :  { %350 = vmatprep.subr.bf16.mxu0 %v662_v25  ;;  %v685_v40 = vld [vmem:[#allocation6 + $0xa8] ss:$16 sps:$4 sm:$0xff]   ;;  %v686_v41 = vld [vmem:[#allocation6 + $0xc4] ss:$16 sps:$4 sm:$0xff]   ;;  %v688_v42 = vld [vmem:[#allocation6 + $0xcc] ss:$16 sps:$4 sm:$0xff]  }
  0x54   :  { %v852_v43 = vmov 0   ;;  %v690_v44 = vld [vmem:[#allocation6 + $0xc0] ss:$16 sps:$4 sm:$0xff]   ;;  %v691_v45 = vld [vmem:[#allocation6 + $0xc8] ss:$16 sps:$4 sm:$0xff]  }
  0x55   :  { %402 = vmatpush1.bf16.msra.mxu1 %v667_v28  ;;  %378 = vmatprep.mubr.bf16.mxu0 %v852_v43  ;;  %v692_v46 = vld [vmem:[#allocation6 + $0xe4] ss:$16 sps:$4 sm:$0xff]   ;;  %v694_v47 = vld [vmem:[#allocation6 + $0xec] ss:$16 sps:$4 sm:$0xff]   ;;  %v696_v48 = vld [vmem:[#allocation6 + $0xe0] ss:$16 sps:$4 sm:$0xff]  }
  0x56   :  { %351 = vmatpush1.bf16.msra.mxu0 %v666_v27  ;;  %403 = vmatprep.subr.bf16.mxu1 %v670_v30  ;;  %v697_v49 = vld [vmem:[#allocation6 + $0xe8] ss:$16 sps:$4 sm:$0xff]   ;;  %v585_v61 = vld [vmem:[#allocation2] ss:$0 sm:$0xff] }
  0x57   :  { %352 = vmatprep.subr.bf16.mxu0 %v668_v29  ;;  %429 = vmatprep.mubr.bf16.mxu1 %v852_v43 }
  0x59   :  { %404 = vmatpush1.bf16.msra.mxu1 %v673_v32 }
  0x5a   :  { %353 = vmatpush1.bf16.msra.mxu0 %v672_v31  ;;  %405 = vmatprep.subr.bf16.mxu1 %v676_v34 }
  0x5b   :  { %354 = vmatprep.subr.bf16.mxu0 %v674_v33 }
  0x5d   :  { %406 = vmatpush1.bf16.msra.mxu1 %v679_v36 }
  0x5e   :  { %355 = vmatpush1.bf16.msra.mxu0 %v678_v35  ;;  %407 = vmatprep.subr.bf16.mxu1 %v682_v38 }
  0x5f   :  { %356 = vmatprep.subr.bf16.mxu0 %v680_v37 }
  0x61   :  { %408 = vmatpush1.bf16.msra.mxu1 %v685_v40 }
  0x62   :  { %357 = vmatpush1.bf16.msra.mxu0 %v684_v39  ;;  %409 = vmatprep.subr.bf16.mxu1 %v688_v42 }
  0x63   :  { %358 = vmatprep.subr.bf16.mxu0 %v686_v41 }
  0x65   :  { %410 = vmatpush1.bf16.msra.mxu1 %v691_v45 }
  0x66   :  { %359 = vmatpush1.bf16.msra.mxu0 %v690_v44  ;;  %411 = vmatprep.subr.bf16.mxu1 %v694_v47 }
  0x67   :  { %360 = vmatprep.subr.bf16.mxu0 %v692_v46 }
  0x69   :  { %412 = vmatpush1.bf16.msra.mxu1 %v697_v49 }
  0x6a   :  { %361 = vmatpush1.bf16.msra.mxu0 %v696_v48 }
  0xd8   :  { %v74_v10 = vpop.xlane.xlu0 %73 }
  0xd9   :  { %v82_v11 = vmul.f32 0.0078125, %v74_v10  ;;  %v80_v12 = vpop.xlane.xlu1 %79 }
  0xda   :  { %v84_v13 = vmul.f32 0.0078125, %v80_v12 }
  0xdb   :  { %v941_v14 = vsub.f32 %v70_v0, %v82_v11  ;;  %v166_v11 = vlaneseq }
  0xdc   :  { %v943_v15 = vsub.f32 %v72_v1, %v84_v13  ;;  %v76_v16 = vpop.xlane.xlu0 %75 }
  0xdd   :  { %v83_v17 = vmul.f32 0.0078125, %v76_v16  ;;  %v88_v18 = vmul.f32 %v941_v14, %v941_v14  ;;  %v167_v12 = vshrl.u32 %v166_v11, 7  ;;  %v164_v16 = vld [vmem:[#allocation7] sm:$0xf] }
  0xde   :  { %v90_v19 = vmul.f32 %v943_v15, %v943_v15 }
  0xdf   :  { %v949_v20 = vsub.f32 %v71_v2, %v83_v17  ;;  %91 = vadd.xlane.f32.xlu1 %v88_v18  ;;  %v586_v2 = vld [vmem:[#allocation4] ss:$0 sm:$0xff]  ;;  %v168_v13 = vsub.s32 0, %v167_v12  ;;  %v172_v17 = vsub.s32 1, %v167_v12  ;;  %v180_v18 = vsub.s32 3, %v167_v12 }
  0xe0   :  { %v95_v21 = vsel %vm77_vm0, %v90_v19, 0.0 }
  0xe1   :  { %v89_v22 = vmul.f32 %v949_v20, %v949_v20 }
  0xe3   :  { %96 = vadd.xlane.f32.xlu1 %v95_v21  ;;  %93 = vadd.xlane.f32.xlu0 %v89_v22  ;;  %v181_v21 = vrot.slane %v164_v16, %v180_v18 }
 0x16c   :  { %v92_v50 = vpop.xlane.xlu1 %91 }
 0x16d   :  { %v98_v51 = vmul.f32 0.0078125, %v92_v50 }
 0x16f   :  { %v101_v52 = vadd.f32 1e-05, %v98_v51 }
 0x170   :  { %v97_v53 = vpop.xlane.xlu1 %96  ;;  %v94_v54 = vpop.xlane.xlu0 %93 }
 0x171   :  { %698 = vrsqrt.f32 %v101_v52  ;;  %v100_v55 = vmul.f32 0.0078125, %v97_v53  ;;  %v99_v56 = vmul.f32 0.0078125, %v94_v54 }
 0x173   :  { %v103_v57 = vadd.f32 1e-05, %v100_v55  ;;  %v102_v58 = vadd.f32 1e-05, %v99_v56 }
 0x175   :  { %700 = vrsqrt.f32 %v103_v57 }
 0x176   :  { %702 = vrsqrt.f32 %v102_v58 }
 0x17b   :  { %v699_v59 = vpop.eup %698 }
 0x17c   :  { %v107_v60 = vmul.f32 %v699_v59, %v941_v14  ;;  %v176_v14 = vsub.s32 2, %v167_v12 }
 0x17e   :  { %v117_v1 = vmul.f32 %v585_v61, %v107_v60  ;;  %v177_v19 = vrot.slane %v164_v16, %v176_v14 }
 0x17f   :  { %v701_v62 = vpop.eup %700 }
 0x180   :  { %v703_v63 = vpop.eup %702  ;;  %v109_v4 = vmul.f32 %v701_v62, %v943_v15  ;;  %v127_v5 = vadd.f32 %v586_v2, %v117_v1  ;;  %v169_v15 = vrot.slane %v164_v16, %v168_v13 }
 0x181   :  { %v108_v0 = vmul.f32 %v703_v63, %v949_v20  ;;  %v173_v20 = vrot.slane %v164_v16, %v172_v17 }
 0x182   :  { %v119_v8 = vmul.f32 %v585_v61, %v109_v4 }
 0x183   :  { %v118_v3 = vmul.f32 %v585_v61, %v108_v0 }
 0x184   :  { %v129_v9 = vadd.f32 %v586_v2, %v119_v8 }
 0x185   :  { %v128_v6 = vadd.f32 %v586_v2, %v118_v3 }
 0x186   :  { %v131_v10 = vpack.c.bf16 %v129_v9, %v129_v9 }
 0x187   :  { %v130_v7 = vpack.c.bf16 %v128_v6, %v127_v5 }
 0x189   :  { %379 = vmatmul.mubr.bf16.vlgmr.msra.gmra.mrb[0].mxu0 %v130_v7  ;;  %430 = vmatmul.mubr.bf16.vlgmr.msra.gmra.mrb[0].mxu1 %v130_v7 }
 0x18a   :  { %388 = vmatprep.mubr.bf16.mxu0 %v852_v43  ;;  %439 = vmatprep.mubr.bf16.mxu1 %v852_v43 }
 0x191   :  { %389 = vmatmul.mubr.bf16.gmra.mrb[4].mxu0 %v131_v10  ;;  %440 = vmatmul.mubr.bf16.gmra.mrb[4].mxu1 %v131_v10 }
 0x25c   :  { %v380_v22 = vpop.f32.mrb[0].mxu0  ;;  %v431_v23 = vpop.f32.mrb[0].mxu1 }
 0x25d   :  { %v957_v24 = vadd.f32 %v380_v22, %v169_v15  ;;  %v959_v25 = vadd.f32 %v431_v23, %v177_v19  ;;  %v382_v26 = vpop.f32.mrb[1].mxu0  ;;  %v433_v27 = vpop.f32.mrb[1].mxu1 }
 0x25e   :  { %v961_v28 = vadd.f32 %v382_v26, %v173_v20  ;;  %v963_v29 = vadd.f32 %v433_v27, %v181_v21  ;;  %v384_v30 = vpop.f32.mrb[2].mxu0  ;;  %v435_v31 = vpop.f32.mrb[2].mxu1 }
 0x25f   :  { %v619_v32 = vmul.f32 -1.442695, %v957_v24  ;;  %v621_v33 = vmul.f32 -1.442695, %v959_v25  ;;  %v967_v34 = vadd.f32 %v384_v30, %v169_v15  ;;  %v969_v35 = vadd.f32 %v435_v31, %v177_v19  ;;  %v386_v36 = vpop.f32.mrb[3].mxu0  ;;  %v437_v37 = vpop.f32.mrb[3].mxu1 }
 0x260   :  { %v620_v38 = vmul.f32 -1.442695, %v961_v28  ;;  %v622_v39 = vmul.f32 -1.442695, %v963_v29  ;;  %v973_v40 = vadd.f32 %v386_v36, %v173_v20  ;;  %v975_v41 = vadd.f32 %v437_v37, %v181_v21 }
 0x261   :  { %704 = vpow2.f32 %v619_v32  ;;  %v623_v42 = vmul.f32 -1.442695, %v967_v34  ;;  %v625_v43 = vmul.f32 -1.442695, %v969_v35 }
 0x262   :  { %706 = vpow2.f32 %v621_v33  ;;  %v624_v44 = vmul.f32 -1.442695, %v973_v40  ;;  %v626_v45 = vmul.f32 -1.442695, %v975_v41 }
 0x263   :  { %708 = vpow2.f32 %v620_v38 }
 0x264   :  { %710 = vpow2.f32 %v622_v39  ;;  %v390_v46 = vpop.f32.mrb[4].mxu0  ;;  %v441_v47 = vpop.f32.mrb[4].mxu1 }
 0x265   :  { %712 = vpow2.f32 %v623_v42  ;;  %v981_v48 = vadd.f32 %v390_v46, %v169_v15  ;;  %v983_v49 = vadd.f32 %v441_v47, %v177_v19  ;;  %v392_v50 = vpop.f32.mrb[5].mxu0  ;;  %v443_v51 = vpop.f32.mrb[5].mxu1 }
 0x266   :  { %714 = vpow2.f32 %v625_v43  ;;  %v985_v52 = vadd.f32 %v392_v50, %v173_v20  ;;  %v987_v53 = vadd.f32 %v443_v51, %v181_v21  ;;  %v394_v54 = vpop.f32.mrb[6].mxu0  ;;  %v445_v55 = vpop.f32.mrb[6].mxu1 }
 0x267   :  { %716 = vpow2.f32 %v624_v44  ;;  %v627_v56 = vmul.f32 -1.442695, %v981_v48  ;;  %v629_v57 = vmul.f32 -1.442695, %v983_v49  ;;  %v395_v58 = vpop.f32.mrb[7].mxu0  ;;  %v446_v59 = vpop.f32.mrb[7].mxu1 }
 0x268   :  { %718 = vpow2.f32 %v626_v45  ;;  %v628_v60 = vmul.f32 -1.442695, %v985_v52  ;;  %v630_v61 = vmul.f32 -1.442695, %v987_v53 }
 0x269   :  { %720 = vpow2.f32 %v627_v56 }
 0x26a   :  { %722 = vpow2.f32 %v629_v57 }
 0x26b   :  { %v705_v62 = vpop.eup %704  ;;  %724 = vpow2.f32 %v628_v60 }
 0x26c   :  { %v707_v63 = vpop.eup %706  ;;  %v484_v0 = vadd.f32 1.0, %v705_v62  ;;  %726 = vpow2.f32 %v630_v61 }
 0x26d   :  { %v709_v1 = vpop.eup %708  ;;  %v486_v2 = vadd.f32 1.0, %v707_v63 }
 0x26e   :  { %v711_v3 = vpop.eup %710  ;;  %728 = vrcp.f32 %v484_v0  ;;  %v485_v4 = vadd.f32 1.0, %v709_v1 }
 0x26f   :  { %v713_v5 = vpop.eup %712  ;;  %730 = vrcp.f32 %v486_v2  ;;  %v487_v6 = vadd.f32 1.0, %v711_v3 }
 0x270   :  { %v715_v7 = vpop.eup %714  ;;  %732 = vrcp.f32 %v485_v4  ;;  %v488_v8 = vadd.f32 1.0, %v713_v5 }
 0x271   :  { %v717_v9 = vpop.eup %716  ;;  %734 = vrcp.f32 %v487_v6  ;;  %v490_v10 = vadd.f32 1.0, %v715_v7 }
 0x272   :  { %v719_v11 = vpop.eup %718  ;;  %736 = vrcp.f32 %v488_v8  ;;  %v489_v12 = vadd.f32 1.0, %v717_v9 }
 0x273   :  { %v721_v13 = vpop.eup %720  ;;  %738 = vrcp.f32 %v490_v10  ;;  %v491_v14 = vadd.f32 1.0, %v719_v11 }
 0x274   :  { %v723_v16 = vpop.eup %722  ;;  %740 = vrcp.f32 %v489_v12  ;;  %v492_v17 = vadd.f32 1.0, %v721_v13 }
 0x275   :  { %v725_v18 = vpop.eup %724  ;;  %742 = vrcp.f32 %v491_v14  ;;  %v494_v15 = vadd.f32 1.0, %v723_v16 }
 0x276   :  { %v727_v19 = vpop.eup %726  ;;  %744 = vrcp.f32 %v492_v17  ;;  %v493_v20 = vadd.f32 1.0, %v725_v18 }
 0x277   :  { %746 = vrcp.f32 %v494_v15  ;;  %v495_v21 = vadd.f32 1.0, %v727_v19 }
 0x278   :  { %v729_v22 = vpop.eup %728  ;;  %748 = vrcp.f32 %v493_v20 }
 0x279   :  { %v731_v23 = vpop.eup %730  ;;  %v520_v26 = vmul.f32 %v729_v22, %v957_v24  ;;  %750 = vrcp.f32 %v495_v21 }
 0x27a   :  { %v733_v27 = vpop.eup %732  ;;  %v522_v30 = vmul.f32 %v731_v23, %v959_v25 }
 0x27b   :  { %v735_v31 = vpop.eup %734  ;;  %v521_v32 = vmul.f32 %v733_v27, %v961_v28 }
 0x27c   :  { %v737_v33 = vpop.eup %736  ;;  %v523_v36 = vmul.f32 %v735_v31, %v963_v29 }
 0x27d   :  { %v739_v37 = vpop.eup %738  ;;  %v637_v38 = vpack.c.bf16 %v521_v32, %v520_v26  ;;  %v524_v39 = vmul.f32 %v737_v33, %v967_v34 }
 0x27e   :  { %v741_v42 = vpop.eup %740  ;;  %v638_v43 = vpack.c.bf16 %v523_v36, %v522_v30  ;;  %v526_v44 = vmul.f32 %v739_v37, %v969_v35 }
 0x27f   :  { %v743_v45 = vpop.eup %742  ;;  %572 = vst [vmem:[%s1028_s5] sm:$0xff] %v637_v38  ;;  %v525_v24 = vmul.f32 %v741_v42, %v973_v40 }
 0x280   :  { %v745_v25 = vpop.eup %744  ;;  %573 = vst [vmem:[%s1028_s5 + $0x8] sm:$0xff] %v638_v43  ;;  %v527_v28 = vmul.f32 %v743_v45, %v975_v41 }
 0x281   :  { %v747_v29 = vpop.eup %746  ;;  %v639_v34 = vpack.c.bf16 %v525_v24, %v524_v39  ;;  %v528_v46 = vmul.f32 %v745_v25, %v981_v48 }
 0x282   :  { %v749_v47 = vpop.eup %748  ;;  %v640_v35 = vpack.c.bf16 %v527_v28, %v526_v44  ;;  %v530_v50 = vmul.f32 %v747_v29, %v983_v49 }
 0x283   :  { %v751_v51 = vpop.eup %750  ;;  %574 = vst [vmem:[%s1028_s5 + $0x10] sm:$0xff] %v639_v34  ;;  %v529_v40 = vmul.f32 %v749_v47, %v985_v52 }
 0x284   :  { %575 = vst [vmem:[%s1028_s5 + $0x18] sm:$0xff] %v640_v35  ;;  %v531_v41 = vmul.f32 %v751_v51, %v987_v53 }
 0x285   :  { %v641_v54 = vpack.c.bf16 %v529_v40, %v528_v46 }
 0x286   :  { %v642_v55 = vpack.c.bf16 %v531_v41, %v530_v50 }
 0x287   :  { %576 = vst [vmem:[%s1028_s5 + $0x20] sm:$0x11] %v641_v54 }
 0x288   :  { %577 = vst [vmem:[%s1028_s5 + $0x28] sm:$0x11] %v642_v55 }
 0x289   :  { %582 = vsyncpa [#allocation3], 1 }
 0x28a   :  { %583 = vsyncpa [#allocation5], 1 }
 0x28b   :  { %584 = vsyncpa [#allocation8], 1 }

// kernel: model_forward.15
= control target key start
LH: loop header
LB: loop body
LE: loop exit
PB: predicated region body
PF: predicated region fallthrough
CT: control target
= control target key end

     0   :  { %9 = vsyncpa [#allocation3], 0  ;;  %s741_s0 = inlined_call_operand.vmem [shape: bf16[18,512], index: 0, kind: input, shape index: {}]   ;;  %s742_s1 = inlined_call_operand.hbm [shape: bf16[512,128], index: 1, kind: input, shape index: {}]   ;;  %s743_s2 = inlined_call_operand.hbm [shape: f32[1,128], index: 2, kind: input, shape index: {}]   ;;  %s744_s3 = inlined_call_operand.vmem [shape: f32[18,128], index: 3, kind: input, shape index: {}]   ;;  %s745_s4 = inlined_call_operand.vmem [shape: f32[18,128], index: 4, kind: output, shape index: {}]  }
   0x1   :  { %10 = vsyncpa [#allocation5], 0  ;;  %s652_s15 = smov [#allocation2]   ;;  %s604_s19 = scalar_lea.hbm %s742_s1, 4096 }
   0x2   :  { %s18_s16 = sshll.u32 %s652_s15, 4  ;;  %p605_p0 = scmp.ne.s32.totalorder %s742_s1, %s604_s19  ;;  %s19_s16 = int_to_ptr.vmem [resolvable:$true] %s18_s16 }
   0x3   :  { %p608_p1 = scmp.lt.u32.totalorder %s604_s19, %s742_s1 }
   0x5   :  { %p610_p2 = pnand %p608_p1, %p605_p0 }
   0x7   :  { %613 = shalt.err (!%p610_p2)
}
   0x8   :  { %s614_s24 = scalar_lea.vmem %s19_s16, 4096  ;;  %p619_p4 = scmp.lt.s32.totalorder %s19_s16, %s19_s16 }
   0x9   :  { %p615_p3 = scmp.ne.s32.totalorder %s19_s16, %s614_s24  ;;  %p620_p5 = scmp.lt.s32.totalorder %s614_s24, %s614_s24 }
   0xb   :  { %p621_p6 = por %p620_p5, %p619_p4 }
   0xd   :  { %p622_p7 = pnand %p621_p6, %p615_p3 }
   0xf   :  { %625 = shalt.err (!%p622_p7)
}
  0x10   :  { %s653_s25 = smov 64   ;;  %s654_s26 = smov 4  }
  0x11   :  { %24 = dma.hbm_to_vmem [thread:$0]  %s742_s1, 4096, %s19_s16, [#allocation3], %s653_s25, %s653_s25, %s654_s26  }
  0x12   :  { %s655_s29 = smov [#allocation4]   ;;  %s626_s7 = scalar_lea.hbm %s743_s2, 16 }
  0x13   :  { %s31_s30 = sshll.u32 %s655_s29, 4  ;;  %p627_p8 = scmp.ne.s32.totalorder %s743_s2, %s626_s7  ;;  %s32_s30 = int_to_ptr.vmem [resolvable:$true] %s31_s30 }
  0x14   :  { %p630_p9 = scmp.lt.u32.totalorder %s626_s7, %s743_s2 }
  0x16   :  { %p632_p10 = pnand %p630_p9, %p627_p8 }
  0x18   :  { %635 = shalt.err (!%p632_p10)
}
  0x19   :  { %s636_s12 = scalar_lea.vmem %s32_s30, 16  ;;  %s640_s1 = scalar_lea.vmem %s32_s30, 32 }
  0x1a   :  { %p637_p11 = scmp.ne.s32.totalorder %s32_s30, %s636_s12  ;;  %p641_p12 = scmp.lt.s32.totalorder %s32_s30, %s32_s30 }
  0x1b   :  { %p642_p13 = scmp.lt.s32.totalorder %s640_s1, %s636_s12 }
  0x1d   :  { %p643_p0 = por %p642_p13, %p641_p12 }
  0x1f   :  { %p644_p1 = pnand %p643_p0, %p637_p11 }
  0x21   :  { %647 = shalt.err (!%p644_p1)
}
  0x22   :  { %34 = dma.hbm_to_vmem [thread:$0]  %s743_s2, 16, %s32_s30, [#allocation5]  }
  0x23   :  { %648 = dma.done.wait [#allocation3], 4096  }
  0x24   :  { %649 = vsyncadd [#allocation3], 4294963200 }
  0x25   :  { %650 = dma.done.wait [#allocation5], 16  }
  0x26   :  { %651 = vsyncadd [#allocation5], 4294967280  ;;  %v562_v0 = vld [vmem:[#allocation2 + $0x40] sm:$0xff]   ;;  %v566_v4 = vld [vmem:[#allocation2 + $0x48] sm:$0xff]  }
  0x27   :  { %v563_v1 = vld [vmem:[#allocation2 + $0xc0] sm:$0xff]   ;;  %502 = vmatprep.subr.bf16.mxu0 %v562_v0  ;;  %v567_v5 = vld [vmem:[#allocation2 + $0xc8] sm:$0xff]   ;;  %v570_v8 = vld [vmem:[#allocation2 + $0x50] sm:$0xff]  }
  0x28   :  { %v564_v2 = vld [vmem:[#allocation2] sm:$0xff]   ;;  %530 = vmatprep.subr.bf16.mxu1 %v563_v1  ;;  %v568_v6 = vld [vmem:[#allocation2 + $0x8] sm:$0xff]   ;;  %v571_v9 = vld [vmem:[#allocation2 + $0xd0] sm:$0xff]  }
  0x29   :  { %v565_v3 = vld [vmem:[#allocation2 + $0x80] sm:$0xff]   ;;  %503 = vmatpush3.bf16.msra.mxu0 %v564_v2  ;;  %v569_v7 = vld [vmem:[#allocation2 + $0x88] sm:$0xff]   ;;  %v572_v10 = vld [vmem:[#allocation2 + $0x10] sm:$0xff]  }
  0x2a   :  { %531 = vmatpush3.bf16.msra.mxu1 %v565_v3  ;;  %504 = vmatprep.subr.bf16.mxu0 %v566_v4  ;;  %v573_v11 = vld [vmem:[#allocation2 + $0x90] sm:$0xff]   ;;  %v574_v12 = vld [vmem:[#allocation2 + $0x58] sm:$0xff]   ;;  %v578_v16 = vld [vmem:[#allocation2 + $0x60] sm:$0xff]  }
  0x2b   :  { %532 = vmatprep.subr.bf16.mxu1 %v567_v5  ;;  %v575_v13 = vld [vmem:[#allocation2 + $0xd8] sm:$0xff]   ;;  %v579_v17 = vld [vmem:[#allocation2 + $0xe0] sm:$0xff]   ;;  %v582_v20 = vld [vmem:[#allocation2 + $0x68] sm:$0xff]  }
  0x2c   :  { %v576_v14 = vld [vmem:[#allocation2 + $0x18] sm:$0xff]   ;;  %v580_v18 = vld [vmem:[#allocation2 + $0x20] sm:$0xff]   ;;  %v583_v21 = vld [vmem:[#allocation2 + $0xe8] sm:$0xff]  }
  0x2d   :  { %505 = vmatpush3.bf16.msra.mxu0 %v568_v6  ;;  %v577_v15 = vld [vmem:[#allocation2 + $0x98] sm:$0xff]   ;;  %v581_v19 = vld [vmem:[#allocation2 + $0xa0] sm:$0xff]   ;;  %v584_v22 = vld [vmem:[#allocation2 + $0x28] sm:$0xff]  }
  0x2e   :  { %533 = vmatpush3.bf16.msra.mxu1 %v569_v7  ;;  %506 = vmatprep.subr.bf16.mxu0 %v570_v8  ;;  %v585_v23 = vld [vmem:[#allocation2 + $0xa8] sm:$0xff]   ;;  %v586_v24 = vld [vmem:[#allocation2 + $0x70] sm:$0xff]   ;;  %v590_v28 = vld [vmem:[#allocation2 + $0x78] sm:$0xff]  }
  0x2f   :  { %534 = vmatprep.subr.bf16.mxu1 %v571_v9  ;;  %v587_v25 = vld [vmem:[#allocation2 + $0xf0] sm:$0xff]   ;;  %v591_v29 = vld [vmem:[#allocation2 + $0xf8] sm:$0xff]   ;;  %v48_v36 = vld [vmem:[%s741_s0 + $0x20] sm:$0x11] }
  0x30   :  { %v588_v26 = vld [vmem:[#allocation2 + $0x30] sm:$0xff]   ;;  %v592_v30 = vld [vmem:[#allocation2 + $0x38] sm:$0xff]   ;;  %v467_v37 = vcombine.high %v48_v36, %v48_v36  ;;  %v49_v38 = vld [vmem:[%s741_s0 + $0x28] sm:$0x11]  ;;  %v466_v40 = vcombine.low %v48_v36, %v48_v36 }
  0x31   :  { %507 = vmatpush3.bf16.msra.mxu0 %v572_v10  ;;  %v589_v27 = vld [vmem:[#allocation2 + $0xb0] sm:$0xff]   ;;  %v593_v31 = vld [vmem:[#allocation2 + $0xb8] sm:$0xff]   ;;  %v469_v39 = vcombine.high %v49_v38, %v49_v38  ;;  %v468_v41 = vcombine.low %v49_v38, %v49_v38  ;;  %v461_v44 = vld [vmem:[#allocation4] ss:$0 sm:$0xff] }
  0x32   :  { %535 = vmatpush3.bf16.msra.mxu1 %v573_v11  ;;  %508 = vmatprep.subr.bf16.mxu0 %v574_v12  ;;  %v594_v32 = vld [vmem:[%s741_s0] ss:$16 sps:$4 sm:$0xff]   ;;  %v596_v33 = vld [vmem:[%s741_s0 + $0x4] ss:$16 sps:$4 sm:$0xff]   ;;  %v597_v34 = vld [vmem:[%s741_s0 + $0x8] ss:$16 sps:$4 sm:$0xff]  }
  0x33   :  { %536 = vmatprep.subr.bf16.mxu1 %v575_v13  ;;  %v599_v35 = vld [vmem:[%s741_s0 + $0xc] ss:$16 sps:$4 sm:$0xff]   ;;  %379 = vmatprep.mubr.bf16.mxu0 %v596_v33  ;;  %v443_v58 = vld [vmem:[%s744_s3] sm:$0xff]  ;;  %v445_v13 = vld [vmem:[%s744_s3 + $0x10] sm:$0x3] }
  0x34   :  { %427 = vmatprep.mubr.bf16.mxu1 %v599_v35  ;;  %v444_v62 = vld [vmem:[%s744_s3 + $0x8] sm:$0xff] }
  0x35   :  { %509 = vmatpush3.bf16.msra.mxu0 %v576_v14 }
  0x36   :  { %537 = vmatpush3.bf16.msra.mxu1 %v577_v15  ;;  %510 = vmatprep.subr.bf16.mxu0 %v578_v16 }
  0x37   :  { %538 = vmatprep.subr.bf16.mxu1 %v579_v17 }
  0x39   :  { %511 = vmatpush3.bf16.msra.mxu0 %v580_v18 }
  0x3a   :  { %539 = vmatpush3.bf16.msra.mxu1 %v581_v19  ;;  %512 = vmatprep.subr.bf16.mxu0 %v582_v20 }
  0x3b   :  { %540 = vmatprep.subr.bf16.mxu1 %v583_v21 }
  0x3d   :  { %513 = vmatpush3.bf16.msra.mxu0 %v584_v22 }
  0x3e   :  { %541 = vmatpush3.bf16.msra.mxu1 %v585_v23  ;;  %514 = vmatprep.subr.bf16.mxu0 %v586_v24 }
  0x3f   :  { %542 = vmatprep.subr.bf16.mxu1 %v587_v25 }
  0x41   :  { %515 = vmatpush3.bf16.msra.mxu0 %v588_v26 }
  0x42   :  { %543 = vmatpush3.bf16.msra.mxu1 %v589_v27  ;;  %516 = vmatprep.subr.bf16.mxu0 %v590_v28 }
  0x43   :  { %544 = vmatprep.subr.bf16.mxu1 %v591_v29 }
  0x45   :  { %517 = vmatpush3.bf16.msra.mxu0 %v592_v30 }
  0x46   :  { %545 = vmatpush3.bf16.msra.mxu1 %v593_v31 }
  0x48   :  { %380 = vmatmul.mubr.bf16.vlgmr.msra.gmra.mrb[0].mxu0 %v594_v32 }
  0x49   :  { %428 = vmatmul.mubr.bf16.vlgmr.msra.gmra.mrb[0].mxu1 %v597_v34  ;;  %387 = vmatprep.mubr.bf16.mxu0 %v467_v37 }
  0x4a   :  { %435 = vmatprep.mubr.bf16.mxu1 %v469_v39 }
  0x50   :  { %388 = vmatmul.mubr.bf16.gmra.mrb[4].mxu0 %v466_v40 }
  0x51   :  { %436 = vmatmul.mubr.bf16.gmra.mrb[4].mxu1 %v468_v41 }
 0x11b   :  { %v518_v42 = vpop.f32.mrb[0].mxu0 }
 0x11c   :  { %v546_v43 = vpop.f32.mrb[0].mxu1  ;;  %v519_v45 = vpop.f32.mrb[1].mxu0 }
 0x11d   :  { %v520_v46 = vadd.f32 %v519_v45, %v518_v42  ;;  %v547_v47 = vpop.f32.mrb[1].mxu1  ;;  %v521_v48 = vpop.f32.mrb[2].mxu0 }
 0x11e   :  { %v548_v49 = vadd.f32 %v547_v47, %v546_v43  ;;  %v549_v50 = vpop.f32.mrb[2].mxu1  ;;  %v522_v51 = vpop.f32.mrb[3].mxu0 }
 0x11f   :  { %v382_v52 = vadd.f32 %v520_v46, %v461_v44  ;;  %v523_v53 = vadd.f32 %v522_v51, %v521_v48  ;;  %v550_v54 = vpop.f32.mrb[3].mxu1 }
 0x120   :  { %v551_v55 = vadd.f32 %v550_v54, %v549_v50 }
 0x121   :  { %v430_v56 = vadd.f32 %v548_v49, %v382_v52  ;;  %v385_v57 = vadd.f32 %v523_v53, %v461_v44 }
 0x123   :  { %v446_v59 = vmul.f32 0.5, %v430_v56  ;;  %v433_v60 = vadd.f32 %v551_v55, %v385_v57  ;;  %v524_v61 = vpop.f32.mrb[4].mxu0 }
 0x124   :  { %v552_v63 = vpop.f32.mrb[4].mxu1  ;;  %v525_v0 = vpop.f32.mrb[5].mxu0 }
 0x125   :  { %v449_v1 = vadd.f32 %v446_v59, %v443_v58  ;;  %v447_v2 = vmul.f32 0.5, %v433_v60  ;;  %v526_v3 = vadd.f32 %v525_v0, %v524_v61  ;;  %v553_v4 = vpop.f32.mrb[5].mxu1  ;;  %v527_v5 = vpop.f32.mrb[6].mxu0 }
 0x126   :  { %v554_v6 = vadd.f32 %v553_v4, %v552_v63  ;;  %v555_v7 = vpop.f32.mrb[6].mxu1  ;;  %v528_v8 = vpop.f32.mrb[7].mxu0 }
 0x127   :  { %452 = vst [vmem:[%s745_s4] sm:$0xff] %v449_v1  ;;  %v450_v9 = vadd.f32 %v447_v2, %v444_v62  ;;  %v390_v10 = vadd.f32 %v526_v3, %v461_v44  ;;  %v556_v11 = vpop.f32.mrb[7].mxu1 }
 0x129   :  { %453 = vst [vmem:[%s745_s4 + $0x8] sm:$0xff] %v450_v9  ;;  %v438_v12 = vadd.f32 %v554_v6, %v390_v10 }
 0x12b   :  { %v448_v14 = vmul.f32 0.5, %v438_v12 }
 0x12d   :  { %v451_v15 = vadd.f32 %v448_v14, %v445_v13 }
 0x12f   :  { %454 = vst [vmem:[%s745_s4 + $0x10] sm:$0x3] %v451_v15 }
 0x130   :  { %459 = vsyncpa [#allocation3], 1 }
 0x131   :  { %460 = vsyncpa [#allocation5], 1 }

// kernel: model_forward.16
= control target key start
LH: loop header
LB: loop body
LE: loop exit
PB: predicated region body
PF: predicated region fallthrough
CT: control target
= control target key end

     0   :  { %10 = vsyncpa [#allocation3], 0  ;;  %s876_s0 = inlined_call_operand.vmem [shape: f32[18,128], index: 0, kind: input, shape index: {}]   ;;  %s877_s1 = inlined_call_operand.hbm [shape: f32[1,128], index: 1, kind: input, shape index: {}]   ;;  %s878_s2 = inlined_call_operand.hbm [shape: f32[1,128], index: 2, kind: input, shape index: {}]   ;;  %s879_s3 = inlined_call_operand.vmem [shape: bf16[128,452], index: 3, kind: input, shape index: {}]   ;;  %s880_s4 = inlined_call_operand.hbm [shape: f32[1,452], index: 4, kind: input, shape index: {}]   ;;  %s881_s5 = inlined_call_operand.vmem [shape: bf16[18,452], index: 5, kind: output, shape index: {}]  }
   0x1   :  { %11 = vsyncpa [#allocation5], 0  ;;  %s666_s18 = smov [#allocation4]   ;;  %s667_s20 = smov [#allocation2]  }
   0x2   :  { %s30_s19 = sshll.u32 %s666_s18, 4  ;;  %s20_s21 = sshll.u32 %s667_s20, 4  ;;  %s31_s19 = int_to_ptr.vmem [resolvable:$true] %s30_s19  ;;  %s21_s21 = int_to_ptr.vmem [resolvable:$true] %s20_s21 }
   0x3   :  { %s596_s24 = scalar_lea.hbm %s878_s2, 16 }
   0x4   :  { %p597_p0 = scmp.ne.s32.totalorder %s878_s2, %s596_s24  ;;  %p600_p1 = scmp.lt.u32.totalorder %s596_s24, %s878_s2 }
   0x6   :  { %p602_p2 = pnand %p600_p1, %p597_p0 }
   0x8   :  { %605 = shalt.err (!%p602_p2)
}
   0x9   :  { %s606_s29 = scalar_lea.vmem %s31_s19, 16  ;;  %s610_s30 = scalar_lea.vmem %s31_s19, 32 }
   0xa   :  { %p607_p3 = scmp.ne.s32.totalorder %s31_s19, %s606_s29  ;;  %p611_p4 = scmp.lt.s32.totalorder %s31_s19, %s31_s19 }
   0xb   :  { %p612_p5 = scmp.lt.s32.totalorder %s610_s30, %s606_s29 }
   0xd   :  { %p613_p6 = por %p612_p5, %p611_p4 }
   0xf   :  { %p614_p7 = pnand %p613_p6, %p607_p3 }
  0x11   :  { %617 = shalt.err (!%p614_p7)
}
  0x12   :  { %33 = dma.hbm_to_vmem [thread:$0]  %s878_s2, 16, %s31_s19, [#allocation5]  }
  0x13   :  { %s618_s10 = scalar_lea.hbm %s877_s1, 16 }
  0x14   :  { %p619_p8 = scmp.ne.s32.totalorder %s877_s1, %s618_s10  ;;  %p622_p9 = scmp.lt.u32.totalorder %s618_s10, %s877_s1 }
  0x16   :  { %p624_p10 = pnand %p622_p9, %p619_p8 }
  0x18   :  { %627 = shalt.err (!%p624_p10)
}
  0x19   :  { %s628_s15 = scalar_lea.vmem %s21_s21, 16  ;;  %s632_s16 = scalar_lea.vmem %s21_s21, 32 }
  0x1a   :  { %p629_p11 = scmp.ne.s32.totalorder %s21_s21, %s628_s15  ;;  %p633_p12 = scmp.lt.s32.totalorder %s21_s21, %s21_s21 }
  0x1b   :  { %p634_p13 = scmp.lt.s32.totalorder %s632_s16, %s628_s15 }
  0x1d   :  { %p635_p0 = por %p634_p13, %p633_p12 }
  0x1f   :  { %p636_p1 = pnand %p635_p0, %p629_p11 }
  0x21   :  { %639 = shalt.err (!%p636_p1)
}
  0x22   :  { %23 = dma.hbm_to_vmem [thread:$0]  %s877_s1, 16, %s21_s21, [#allocation3]  }
  0x23   :  { %s668_s18 = smov [#allocation6]   ;;  %s640_s23 = scalar_lea.hbm %s880_s4, 64 }
  0x24   :  { %s42_s19 = sshll.u32 %s668_s18, 4  ;;  %p641_p2 = scmp.ne.s32.totalorder %s880_s4, %s640_s23  ;;  %s43_s19 = int_to_ptr.vmem [resolvable:$true] %s42_s19 }
  0x25   :  { %p644_p3 = scmp.lt.u32.totalorder %s640_s23, %s880_s4 }
  0x27   :  { %p646_p4 = pnand %p644_p3, %p641_p2 }
  0x29   :  { %649 = shalt.err (!%p646_p4)
}
  0x2a   :  { %s650_s28 = scalar_lea.vmem %s43_s19, 64  ;;  %p655_p6 = scmp.lt.s32.totalorder %s43_s19, %s43_s19 }
  0x2b   :  { %p651_p5 = scmp.ne.s32.totalorder %s43_s19, %s650_s28  ;;  %p656_p7 = scmp.lt.s32.totalorder %s650_s28, %s650_s28 }
  0x2d   :  { %p657_p8 = por %p656_p7, %p655_p6 }
  0x2f   :  { %p658_p9 = pnand %p657_p8, %p651_p5 }
  0x31   :  { %661 = shalt.err (!%p658_p9)
}
  0x32   :  { %45 = dma.hbm_to_vmem [thread:$0]  %s880_s4, 64, %s43_s19, [#allocation5]  }
  0x33   :  { %662 = dma.done.wait [#allocation3], 16  }
  0x34   :  { %663 = vsyncadd [#allocation3], 4294967280 }
  0x35   :  { %664 = dma.done.wait [#allocation5], 80  }
  0x36   :  { %665 = vsyncadd [#allocation5], 4294967216  ;;  %vm63_vm0 = vcmask 1041408   ;;  %v56_v0 = vld [vmem:[%s876_s0] sm:$0xff]  ;;  %v58_v1 = vld [vmem:[%s876_s0 + $0x10] sm:$0x3] }
  0x37   :  { %v57_v2 = vld [vmem:[%s876_s0 + $0x8] sm:$0xff]  ;;  %59 = vadd.xlane.f32.xlu0 %v56_v0  ;;  %v64_v3 = vsel %vm63_vm0, %v58_v1, 0.0  ;;  %v542_v4 = vld [vmem:[%s879_s3 + $0x4] ss:$16 sps:$4 sm:$0xff]   ;;  %v546_v6 = vld [vmem:[%s879_s3] ss:$16 sps:$4 sm:$0xff]  }
  0x38   :  { %65 = vadd.xlane.f32.xlu1 %v64_v3  ;;  %v544_v5 = vld [vmem:[%s879_s3 + $0xc] ss:$16 sps:$4 sm:$0xff]   ;;  %v547_v7 = vld [vmem:[%s879_s3 + $0x8] ss:$16 sps:$4 sm:$0xff]   ;;  %v548_v8 = vld [vmem:[%s879_s3 + $0x24] ss:$16 sps:$4 sm:$0xff]   ;;  %332 = vmatprep.subr.bf16.mxu0 %v542_v4 }
  0x39   :  { %v550_v9 = vld [vmem:[%s879_s3 + $0x2c] ss:$16 sps:$4 sm:$0xff]   ;;  %383 = vmatprep.subr.bf16.mxu1 %v544_v5  ;;  %333 = vmatpush1.bf16.msra.mxu0 %v546_v6  ;;  %v552_v23 = vld [vmem:[%s879_s3 + $0x20] ss:$16 sps:$4 sm:$0xff]   ;;  %v553_v24 = vld [vmem:[%s879_s3 + $0x28] ss:$16 sps:$4 sm:$0xff]  }
  0x3a   :  { %384 = vmatpush1.bf16.msra.mxu1 %v547_v7  ;;  %334 = vmatprep.subr.bf16.mxu0 %v548_v8  ;;  %v554_v25 = vld [vmem:[%s879_s3 + $0x44] ss:$16 sps:$4 sm:$0xff]   ;;  %v556_v26 = vld [vmem:[%s879_s3 + $0x4c] ss:$16 sps:$4 sm:$0xff]   ;;  %v558_v27 = vld [vmem:[%s879_s3 + $0x40] ss:$16 sps:$4 sm:$0xff]  }
  0x3b   :  { %61 = vadd.xlane.f32.xlu0 %v57_v2  ;;  %385 = vmatprep.subr.bf16.mxu1 %v550_v9  ;;  %v559_v28 = vld [vmem:[%s879_s3 + $0x48] ss:$16 sps:$4 sm:$0xff]   ;;  %v560_v29 = vld [vmem:[%s879_s3 + $0x64] ss:$16 sps:$4 sm:$0xff]   ;;  %v562_v30 = vld [vmem:[%s879_s3 + $0x6c] ss:$16 sps:$4 sm:$0xff]  }
  0x3c   :  { %v564_v31 = vld [vmem:[%s879_s3 + $0x60] ss:$16 sps:$4 sm:$0xff]   ;;  %v565_v32 = vld [vmem:[%s879_s3 + $0x68] ss:$16 sps:$4 sm:$0xff]   ;;  %v566_v33 = vld [vmem:[%s879_s3 + $0x84] ss:$16 sps:$4 sm:$0xff]  }
  0x3d   :  { %335 = vmatpush1.bf16.msra.mxu0 %v552_v23  ;;  %v568_v34 = vld [vmem:[%s879_s3 + $0x8c] ss:$16 sps:$4 sm:$0xff]   ;;  %v570_v35 = vld [vmem:[%s879_s3 + $0x80] ss:$16 sps:$4 sm:$0xff]   ;;  %v571_v36 = vld [vmem:[%s879_s3 + $0x88] ss:$16 sps:$4 sm:$0xff]  }
  0x3e   :  { %386 = vmatpush1.bf16.msra.mxu1 %v553_v24  ;;  %336 = vmatprep.subr.bf16.mxu0 %v554_v25  ;;  %v572_v37 = vld [vmem:[%s879_s3 + $0xa4] ss:$16 sps:$4 sm:$0xff]   ;;  %v574_v38 = vld [vmem:[%s879_s3 + $0xac] ss:$16 sps:$4 sm:$0xff]   ;;  %v576_v39 = vld [vmem:[%s879_s3 + $0xa0] ss:$16 sps:$4 sm:$0xff]  }
  0x3f   :  { %387 = vmatprep.subr.bf16.mxu1 %v556_v26  ;;  %v577_v40 = vld [vmem:[%s879_s3 + $0xa8] ss:$16 sps:$4 sm:$0xff]   ;;  %v578_v41 = vld [vmem:[%s879_s3 + $0xc4] ss:$16 sps:$4 sm:$0xff]   ;;  %v580_v42 = vld [vmem:[%s879_s3 + $0xcc] ss:$16 sps:$4 sm:$0xff]  }
  0x40   :  { %v669_v43 = vmov 0   ;;  %v582_v44 = vld [vmem:[%s879_s3 + $0xc0] ss:$16 sps:$4 sm:$0xff]   ;;  %v583_v45 = vld [vmem:[%s879_s3 + $0xc8] ss:$16 sps:$4 sm:$0xff]   ;;  %vm475_vm1 = vcmask 1043456  }
  0x41   :  { %337 = vmatpush1.bf16.msra.mxu0 %v558_v27  ;;  %364 = vmatprep.mubr.bf16.mxu0 %v669_v43  ;;  %v584_v46 = vld [vmem:[%s879_s3 + $0xe4] ss:$16 sps:$4 sm:$0xff]   ;;  %v586_v47 = vld [vmem:[%s879_s3 + $0xec] ss:$16 sps:$4 sm:$0xff]   ;;  %v588_v48 = vld [vmem:[%s879_s3 + $0xe0] ss:$16 sps:$4 sm:$0xff]  }
  0x42   :  { %388 = vmatpush1.bf16.msra.mxu1 %v559_v28  ;;  %338 = vmatprep.subr.bf16.mxu0 %v560_v29  ;;  %v589_v49 = vld [vmem:[%s879_s3 + $0xe8] ss:$16 sps:$4 sm:$0xff]   ;;  %v492_v61 = vld [vmem:[#allocation2] ss:$0 sm:$0xff]  ;;  %vm476_vm2 = vcmask 556036   ;;  %vm482_vm4 = vcmask 1040384  }
  0x43   :  { %389 = vmatprep.subr.bf16.mxu1 %v562_v30  ;;  %415 = vmatprep.mubr.bf16.mxu1 %v669_v43  ;;  %vm477_vm3 = vmor %vm476_vm2, %vm475_vm1  ;;  %vm483_vm5 = vcmask 552964  }
  0x44   :  { %vm484_vm6 = vmor %vm483_vm5, %vm482_vm4 }
  0x45   :  { %339 = vmatpush1.bf16.msra.mxu0 %v564_v31 }
  0x46   :  { %390 = vmatpush1.bf16.msra.mxu1 %v565_v32  ;;  %340 = vmatprep.subr.bf16.mxu0 %v566_v33 }
  0x47   :  { %391 = vmatprep.subr.bf16.mxu1 %v568_v34 }
  0x49   :  { %341 = vmatpush1.bf16.msra.mxu0 %v570_v35 }
  0x4a   :  { %392 = vmatpush1.bf16.msra.mxu1 %v571_v36  ;;  %342 = vmatprep.subr.bf16.mxu0 %v572_v37 }
  0x4b   :  { %393 = vmatprep.subr.bf16.mxu1 %v574_v38 }
  0x4d   :  { %343 = vmatpush1.bf16.msra.mxu0 %v576_v39 }
  0x4e   :  { %394 = vmatpush1.bf16.msra.mxu1 %v577_v40  ;;  %344 = vmatprep.subr.bf16.mxu0 %v578_v41 }
  0x4f   :  { %395 = vmatprep.subr.bf16.mxu1 %v580_v42 }
  0x51   :  { %345 = vmatpush1.bf16.msra.mxu0 %v582_v44 }
  0x52   :  { %396 = vmatpush1.bf16.msra.mxu1 %v583_v45  ;;  %346 = vmatprep.subr.bf16.mxu0 %v584_v46 }
  0x53   :  { %397 = vmatprep.subr.bf16.mxu1 %v586_v47 }
  0x55   :  { %347 = vmatpush1.bf16.msra.mxu0 %v588_v48 }
  0x56   :  { %398 = vmatpush1.bf16.msra.mxu1 %v589_v49 }
  0xc4   :  { %v60_v10 = vpop.xlane.xlu0 %59 }
  0xc5   :  { %v68_v11 = vmul.f32 0.0078125, %v60_v10  ;;  %v66_v12 = vpop.xlane.xlu1 %65 }
  0xc6   :  { %v70_v13 = vmul.f32 0.0078125, %v66_v12 }
  0xc7   :  { %v764_v14 = vsub.f32 %v56_v0, %v68_v11  ;;  %v152_v11 = vlaneseq }
  0xc8   :  { %v766_v15 = vsub.f32 %v58_v1, %v70_v13  ;;  %v62_v16 = vpop.xlane.xlu0 %61 }
  0xc9   :  { %v69_v17 = vmul.f32 0.0078125, %v62_v16  ;;  %v74_v18 = vmul.f32 %v764_v14, %v764_v14  ;;  %v153_v12 = vshrl.u32 %v152_v11, 7  ;;  %v150_v16 = vld [vmem:[#allocation6] sm:$0xf] }
  0xca   :  { %v76_v19 = vmul.f32 %v766_v15, %v766_v15 }
  0xcb   :  { %v772_v20 = vsub.f32 %v57_v2, %v69_v17  ;;  %77 = vadd.xlane.f32.xlu1 %v74_v18  ;;  %v493_v2 = vld [vmem:[#allocation4] ss:$0 sm:$0xff]  ;;  %v154_v13 = vsub.s32 0, %v153_v12  ;;  %v158_v17 = vsub.s32 1, %v153_v12  ;;  %v166_v18 = vsub.s32 3, %v153_v12 }
  0xcc   :  { %v81_v21 = vsel %vm63_vm0, %v76_v19, 0.0 }
  0xcd   :  { %v75_v22 = vmul.f32 %v772_v20, %v772_v20 }
  0xcf   :  { %82 = vadd.xlane.f32.xlu1 %v81_v21  ;;  %79 = vadd.xlane.f32.xlu0 %v75_v22  ;;  %v167_v21 = vrot.slane %v150_v16, %v166_v18 }
 0x158   :  { %v78_v50 = vpop.xlane.xlu1 %77 }
 0x159   :  { %v84_v51 = vmul.f32 0.0078125, %v78_v50 }
 0x15b   :  { %v87_v52 = vadd.f32 1e-05, %v84_v51 }
 0x15c   :  { %v83_v53 = vpop.xlane.xlu1 %82  ;;  %v80_v54 = vpop.xlane.xlu0 %79 }
 0x15d   :  { %590 = vrsqrt.f32 %v87_v52  ;;  %v86_v55 = vmul.f32 0.0078125, %v83_v53  ;;  %v85_v56 = vmul.f32 0.0078125, %v80_v54 }
 0x15f   :  { %v89_v57 = vadd.f32 1e-05, %v86_v55  ;;  %v88_v58 = vadd.f32 1e-05, %v85_v56 }
 0x161   :  { %592 = vrsqrt.f32 %v89_v57 }
 0x162   :  { %594 = vrsqrt.f32 %v88_v58 }
 0x167   :  { %v591_v59 = vpop.eup %590 }
 0x168   :  { %v93_v60 = vmul.f32 %v591_v59, %v764_v14  ;;  %v162_v14 = vsub.s32 2, %v153_v12 }
 0x16a   :  { %v103_v1 = vmul.f32 %v492_v61, %v93_v60  ;;  %v163_v19 = vrot.slane %v150_v16, %v162_v14 }
 0x16b   :  { %v593_v62 = vpop.eup %592 }
 0x16c   :  { %v595_v63 = vpop.eup %594  ;;  %v95_v4 = vmul.f32 %v593_v62, %v766_v15  ;;  %v113_v5 = vadd.f32 %v493_v2, %v103_v1  ;;  %v155_v15 = vrot.slane %v150_v16, %v154_v13 }
 0x16d   :  { %v94_v0 = vmul.f32 %v595_v63, %v772_v20  ;;  %v159_v20 = vrot.slane %v150_v16, %v158_v17 }
 0x16e   :  { %v105_v8 = vmul.f32 %v492_v61, %v95_v4 }
 0x16f   :  { %v104_v3 = vmul.f32 %v492_v61, %v94_v0 }
 0x170   :  { %v115_v9 = vadd.f32 %v493_v2, %v105_v8 }
 0x171   :  { %v114_v6 = vadd.f32 %v493_v2, %v104_v3 }
 0x172   :  { %v117_v10 = vpack.c.bf16 %v115_v9, %v115_v9 }
 0x173   :  { %v116_v7 = vpack.c.bf16 %v114_v6, %v113_v5 }
 0x175   :  { %365 = vmatmul.mubr.bf16.vlgmr.msra.gmra.mrb[0].mxu0 %v116_v7  ;;  %416 = vmatmul.mubr.bf16.vlgmr.msra.gmra.mrb[0].mxu1 %v116_v7 }
 0x176   :  { %374 = vmatprep.mubr.bf16.mxu0 %v669_v43  ;;  %425 = vmatprep.mubr.bf16.mxu1 %v669_v43 }
 0x17d   :  { %375 = vmatmul.mubr.bf16.gmra.mrb[4].mxu0 %v117_v10  ;;  %426 = vmatmul.mubr.bf16.gmra.mrb[4].mxu1 %v117_v10 }
 0x248   :  { %v366_v22 = vpop.f32.mrb[0].mxu0  ;;  %v417_v23 = vpop.f32.mrb[0].mxu1 }
 0x249   :  { %v367_v24 = vadd.f32 %v366_v22, %v155_v15  ;;  %v418_v25 = vadd.f32 %v417_v23, %v163_v19  ;;  %v368_v26 = vpop.f32.mrb[1].mxu0  ;;  %v419_v27 = vpop.f32.mrb[1].mxu1 }
 0x24a   :  { %v369_v28 = vadd.f32 %v368_v26, %v159_v20  ;;  %v420_v29 = vadd.f32 %v419_v27, %v167_v21  ;;  %v370_v30 = vpop.f32.mrb[2].mxu0  ;;  %v421_v31 = vpop.f32.mrb[2].mxu1 }
 0x24b   :  { %v371_v32 = vadd.f32 %v370_v30, %v155_v15  ;;  %v422_v33 = vadd.f32 %v421_v31, %v163_v19  ;;  %v372_v34 = vpop.f32.mrb[3].mxu0  ;;  %v423_v35 = vpop.f32.mrb[3].mxu1 }
 0x24c   :  { %v532_v36 = vpack.c.bf16 %v369_v28, %v367_v24  ;;  %v533_v37 = vpack.c.bf16 %v420_v29, %v418_v25  ;;  %v373_v38 = vadd.f32 %v372_v34, %v159_v20  ;;  %v424_v39 = vadd.f32 %v423_v35, %v167_v21 }
 0x24e   :  { %474 = vst [vmem:[%s881_s5] sm:$0xff] %v532_v36  ;;  %478 = vst.msk [vmem:[%s881_s5 + $0x8] sm:$0xff] %vm477_vm3, %v533_v37  ;;  %v534_v40 = vpack.c.bf16 %v373_v38, %v371_v32  ;;  %v535_v41 = vpack.c.bf16 %v424_v39, %v422_v33 }
 0x250   :  { %479 = vst [vmem:[%s881_s5 + $0x10] sm:$0xff] %v534_v40  ;;  %480 = vst.msk [vmem:[%s881_s5 + $0x18] sm:$0xff] %vm477_vm3, %v535_v41  ;;  %v376_v42 = vpop.f32.mrb[4].mxu0  ;;  %v427_v43 = vpop.f32.mrb[4].mxu1 }
 0x251   :  { %v377_v44 = vadd.f32 %v376_v42, %v155_v15  ;;  %v428_v45 = vadd.f32 %v427_v43, %v163_v19  ;;  %v378_v46 = vpop.f32.mrb[5].mxu0  ;;  %v429_v47 = vpop.f32.mrb[5].mxu1 }
 0x252   :  { %v379_v48 = vadd.f32 %v378_v46, %v159_v20  ;;  %v430_v49 = vadd.f32 %v429_v47, %v167_v21  ;;  %v380_v50 = vpop.f32.mrb[6].mxu0  ;;  %v431_v51 = vpop.f32.mrb[6].mxu1 }
 0x253   :  { %v381_v52 = vpop.f32.mrb[7].mxu0  ;;  %v432_v53 = vpop.f32.mrb[7].mxu1 }
 0x254   :  { %v536_v54 = vpack.c.bf16 %v379_v48, %v377_v44  ;;  %v537_v55 = vpack.c.bf16 %v430_v49, %v428_v45 }
 0x256   :  { %481 = vst [vmem:[%s881_s5 + $0x20] sm:$0x11] %v536_v54  ;;  %485 = vst.msk [vmem:[%s881_s5 + $0x28] sm:$0x11] %vm484_vm6, %v537_v55 }
 0x257   :  { %490 = vsyncpa [#allocation3], 1 }
 0x258   :  { %491 = vsyncpa [#allocation5], 1 }

// kernel: model_forward.18
= control target key start
LH: loop header
LB: loop body
LE: loop exit
PB: predicated region body
PF: predicated region fallthrough
CT: control target
= control target key end

     0   :  { %s290_s1 = inlined_call_operand.vmem [shape: bf16[128,128], index: 1, kind: input, shape index: {}]   ;;  %s291_s0 = inlined_call_operand.vmem [shape: bf16[18,128], index: 0, kind: input, shape index: {}]   ;;  %s292_s2 = inlined_call_operand.vmem [shape: f32[1,128], index: 2, kind: input, shape index: {}]   ;;  %s293_s3 = inlined_call_operand.vmem [shape: f32[18,128], index: 3, kind: input, shape index: {}]   ;;  %s294_s4 = inlined_call_operand.vmem [shape: f32[18,128], index: 4, kind: output, shape index: {}]  }
   0x1   :  { %v204_v0 = vld [vmem:[%s290_s1] sm:$0xff]   ;;  %v205_v1 = vld [vmem:[%s290_s1 + $0x8] sm:$0xff]   ;;  %v206_v2 = vld [vmem:[%s290_s1 + $0x10] sm:$0xff]  }
   0x2   :  { %184 = vmatprep.subr.bf16.mxu0 %v204_v0  ;;  %v207_v3 = vld [vmem:[%s290_s1 + $0x18] sm:$0xff]   ;;  %v212_v4 = vld [vmem:[%s291_s0] sm:$0xff]   ;;  %v209_v6 = vld [vmem:[%s290_s1 + $0x28] sm:$0xff]  }
   0x3   :  { %185 = vmatpush3.bf16.msra.mxu0 %v204_v0  ;;  %200 = vmatprep.mubr.bf16.mxu0 %v212_v4  ;;  %v208_v5 = vld [vmem:[%s290_s1 + $0x20] sm:$0xff]   ;;  %v210_v7 = vld [vmem:[%s290_s1 + $0x30] sm:$0xff]   ;;  %v211_v8 = vld [vmem:[%s290_s1 + $0x38] sm:$0xff]  }
   0x4   :  { %186 = vmatprep.subr.bf16.mxu0 %v205_v1  ;;  %v213_v9 = vld [vmem:[%s291_s0 + $0x8] ss:$0 sps:$4 sm:$0x11]   ;;  %v163_v10 = vld [vmem:[%s292_s2] ss:$0 sm:$0xff] }
   0x5   :  { %v152_v12 = vld [vmem:[%s293_s3 + $0x10] sm:$0x3]  ;;  %v150_v15 = vld [vmem:[%s293_s3] sm:$0xff]  ;;  %v151_v20 = vld [vmem:[%s293_s3 + $0x8] sm:$0xff] }
   0x7   :  { %187 = vmatpush3.bf16.msra.mxu0 %v205_v1 }
   0x8   :  { %188 = vmatprep.subr.bf16.mxu0 %v206_v2 }
   0xb   :  { %189 = vmatpush3.bf16.msra.mxu0 %v206_v2 }
   0xc   :  { %190 = vmatprep.subr.bf16.mxu0 %v207_v3 }
   0xf   :  { %191 = vmatpush3.bf16.msra.mxu0 %v207_v3 }
  0x10   :  { %192 = vmatprep.subr.bf16.mxu0 %v208_v5 }
  0x13   :  { %193 = vmatpush3.bf16.msra.mxu0 %v208_v5 }
  0x14   :  { %194 = vmatprep.subr.bf16.mxu0 %v209_v6 }
  0x17   :  { %195 = vmatpush3.bf16.msra.mxu0 %v209_v6 }
  0x18   :  { %196 = vmatprep.subr.bf16.mxu0 %v210_v7 }
  0x1b   :  { %197 = vmatpush3.bf16.msra.mxu0 %v210_v7 }
  0x1c   :  { %198 = vmatprep.subr.bf16.mxu0 %v211_v8 }
  0x1f   :  { %199 = vmatpush3.bf16.msra.mxu0 %v211_v8 }
  0x22   :  { %201 = vmatmul.mubr.bf16.vlgmr.msra.gmra.mrb[0].mxu0 %v213_v9 }
  0xf5   :  { %v202_v11 = vpop.f32.mrb[0].mxu0 }
  0xf6   :  { %v145_v13 = vadd.f32 %v202_v11, %v163_v10  ;;  %v136_v14 = vpop.f32.mrb[1].mxu0 }
  0xf7   :  { %v137_v16 = vadd.f32 %v163_v10, %v136_v14  ;;  %v203_v17 = vpop.f32.mrb[2].mxu0 }
  0xf8   :  { %v155_v18 = vadd.f32 %v152_v12, %v145_v13  ;;  %v139_v19 = vpop.f32.mrb[3].mxu0 }
  0xf9   :  { %v153_v21 = vadd.f32 %v150_v15, %v137_v16  ;;  %v140_v22 = vadd.f32 %v163_v10, %v139_v19 }
  0xfa   :  { %158 = vst [vmem:[%s294_s4 + $0x10] sm:$0x3] %v155_v18 }
  0xfb   :  { %156 = vst [vmem:[%s294_s4] sm:$0xff] %v153_v21  ;;  %v154_v23 = vadd.f32 %v151_v20, %v140_v22 }
  0xfd   :  { %157 = vst [vmem:[%s294_s4 + $0x8] sm:$0xff] %v154_v23 }

// kernel: model_forward.17
= control target key start
LH: loop header
LB: loop body
LE: loop exit
PB: predicated region body
PF: predicated region fallthrough
CT: control target
= control target key end

     0   :  { %s1225_s9 = smov 0   ;;  %s1490_s0 = inlined_call_operand.vmem [shape: bf16[2,9,384], index: 0, kind: input, shape index: {}]   ;;  %s1491_s1 = inlined_call_operand.vmem [shape: bf16[2,9,4,9], index: 1, kind: input, shape index: {}]   ;;  %s1492_s2 = inlined_call_operand.vmem [shape: bf16[2,9,128], index: 2, kind: output, shape index: {}]  }
   0x1 LB: > { %s1038_s10 = sadd.s32 4294967295, %s1202_s9   ;;  %p1042_p0 = scmp.ge.s32.totalorder %s1202_s9, 1  ;;  %s1202_s9 = sphi %s1225_s9, %s12_s9  }
   0x2   : > { %p122_p1 = scmp.lt.s32.totalorder %s1202_s9, 3 }
   0x4   : > { %p123_p2 = pnand %p1042_p0, %p122_p1 }
   0x5   : > { %p149_p3 = scmp.lt.s32.totalorder (!%p123_p2), %s1038_s10, 1  ;;  %v1204_v0 = vmov (!%p123_p2), 0.0   ;;  %vm1205_vm0 = vmmov (!%p123_p2), 0   ;;  %vm256_vm1 = vcmask (!%p123_p2), 261120   ;;  %v204_v4 = vlaneseq (!%p123_p2)  ;;  %s1206_s19 = smov (!%p123_p2), 96  }
   0x6   : > { %126 = sbr.rel (%p123_p2) target bundleno = 1505 (0x5e1), region = 28  ;;  %1081 = vmatprep.subr.bf16.mxu0 (!%p123_p2), %v1204_v0  ;;  %1083 = vmatprep.mubr.msk.bf16.mxu0 (!%p123_p2), %vm1205_vm0, %v1204_v0  ;;  %vm240_vm2 = vcmask (!%p123_p2), 1041409   ;;  %vm242_vm3 = vcmask (!%p123_p2), 1042434   ;;  %vm244_vm4 = vcmask (!%p123_p2), 1043459   ;;  %vm246_vm5 = vcmask (!%p123_p2), 1044484   ;;  %s1207_s20 = smov (!%p123_p2), 32  }
   0x7   : > { %1087 = vmatprep.subr.bf16.mxu1 (!%p123_p2), %v1204_v0  ;;  %1089 = vmatprep.mubr.msk.bf16.mxu1 (!%p123_p2), %vm1205_vm0, %v1204_v0  ;;  %v1266_v5 = vshrl.u32 (!%p123_p2), %v204_v4, 7  ;;  %vm248_vm6 = vcmask (!%p123_p2), 1045509   ;;  %vm250_vm7 = vcmask (!%p123_p2), 1046534   ;;  %vm252_vm8 = vcmask (!%p123_p2), 1047559   ;;  %s1209_s21 = smov (!%p123_p2), 64  }
   0x8   : > { %vm306_vm9 = vcmask (!%p123_p2), 72704   ;;  %vm310_vm10 = vcmask (!%p123_p2), 65536   ;;  %vm339_vm11 = vcmask (!%p123_p2), 1043456   ;;  %vm340_vm12 = vcmask (!%p123_p2), 1044480  }
   0x9   : > { %v206_v11 = vsub.s32 (!%p123_p2), 0, %v1266_v5  ;;  %v1208_v62 = vmov (!%p123_p2), 65535   ;;  %vm950_vm13 = vcmask (!%p123_p2), 523264   ;;  %vm953_vm14 = vcmask (!%p123_p2), 785408  }
   0xa   : > { %v341_v63 = vsel (!%p123_p2), %vm339_vm11, 4294967295, %v1208_v62  ;;  %vm965_vm15 = vcmask (!%p123_p2), 1040384  }
   0xd   : > { %s1494_s10 = smov (!%p149_p3, %s1038_s10), 1 }
   0xe   : > { %s1129_s11 = smul.u32 24, %s1494_s10  ;;  %s1062_s22 = sshll.u32 %s1494_s10, 3 }
   0xf   : > { %s1130_s15 = smul.u32 18, %s1494_s10  ;;  %s163_s25 = scalar_lea.vmem %s1492_s2, %s1062_s22 }
  0x10   : > { %s1245_s14 = scalar_lea.vmem %s1490_s0, %s1129_s11 }
  0x11   : > { %v1248_v1 = vld [vmem:[%s1245_s14 + $0x4] ss:$12 sps:$4 sm:$0x1f]   ;;  %v1254_v3 = vld [vmem:[%s1245_s14] ss:$12 sps:$4 sm:$0x1f]   ;;  %s1264_s18 = scalar_lea.vmem %s1491_s1, %s1130_s15 }
  0x12   : > { %v261_v2 = vsel %vm256_vm1, %v1248_v1, 0  ;;  %v1269_v6 = vld [vmem:[%s1264_s18] sm:$0x1]  ;;  %v1272_v7 = vld [vmem:[%s1264_s18 + $0x2] sm:$0x1] }
  0x13   : > { %1082 = vmatpush3.bf16.xpose.msra.mxu0 %v261_v2  ;;  %v1275_v8 = vld [vmem:[%s1264_s18 + $0x4] sm:$0x1]  ;;  %v178_v9 = vunpack.c.l.bf16 %v1269_v6  ;;  %v179_v10 = vunpack.c.l.bf16 %v1272_v7  ;;  %v1281_v12 = vld [vmem:[%s1264_s18 + $0x6] sm:$0x1]  ;;  %v1289_v16 = vld [vmem:[%s1264_s18 + $0x8] sm:$0x1] }
  0x14   : > { %1099 = vmatprep.subr.bf16.mxu0 %v1204_v0  ;;  %v180_v13 = vunpack.c.l.bf16 %v1275_v8  ;;  %v181_v17 = vunpack.c.l.bf16 %v1281_v12  ;;  %v1296_v20 = vld [vmem:[%s1264_s18 + $0xa] sm:$0x1]  ;;  %v182_v21 = vunpack.c.l.bf16 %v1289_v16  ;;  %v1303_v24 = vld [vmem:[%s1264_s18 + $0xc] sm:$0x1]  ;;  %v1310_v28 = vld [vmem:[%s1264_s18 + $0xe] sm:$0x1] }
  0x15   : > { %v207_v14 = vrot.slane %v178_v9, %v206_v11  ;;  %v211_v15 = vrot.slane %v179_v10, %v206_v11  ;;  %v183_v25 = vunpack.c.l.bf16 %v1296_v20  ;;  %v184_v29 = vunpack.c.l.bf16 %v1303_v24  ;;  %v1321_v35 = vld [vmem:[%s1264_s18 + $0x10] sm:$0x1]  ;;  %v1339_v61 = vld [vmem:[%s1245_s14 + $0x8] ss:$12 sps:$4 sm:$0x1f]  }
  0x16   : > { %v215_v18 = vrot.slane %v180_v13, %v206_v11  ;;  %v219_v22 = vrot.slane %v181_v17, %v206_v11  ;;  %v223_v26 = vrot.slane %v182_v21, %v206_v11  ;;  %v185_v32 = vunpack.c.l.bf16 %v1310_v28 }
  0x17   : > { %v241_v19 = vsel %vm240_vm2, %v211_v15, %v207_v14  ;;  %v227_v30 = vrot.slane %v183_v25, %v206_v11  ;;  %v231_v33 = vrot.slane %v184_v29, %v206_v11  ;;  %v186_v38 = vunpack.c.l.bf16 %v1321_v35 }
  0x18   : > { %v243_v23 = vsel %vm242_vm3, %v215_v18, %v241_v19  ;;  %v235_v36 = vrot.slane %v185_v32, %v206_v11  ;;  %v1341_v2 = vsel %vm340_vm12, %v341_v63, 0 }
  0x19   : > { %v245_v27 = vsel %vm244_vm4, %v219_v22, %v243_v23  ;;  %v239_v40 = vrot.slane %v186_v38, %v206_v11  ;;  %v344_v4 = vand.u32 %v1339_v61, %v1341_v2 }
  0x1a   : > { %1084 = vmatmul.mubr.msk.bf16.vlgmr.msra.gmra.mrb[0].mxu0 %vm256_vm1, %v1254_v3  ;;  %v247_v31 = vsel %vm246_vm5, %v223_v26, %v245_v27 }
  0x1b   : > { %1101 = vmatprep.mubr.msk.bf16.mxu0 %vm1205_vm0, %v1204_v0  ;;  %v249_v34 = vsel %vm248_vm6, %v227_v30, %v247_v31  ;;  %1088 = vmatpush3.bf16.msra.mxu1 %v344_v4 }
  0x1c   : > { %v251_v37 = vsel %vm250_vm7, %v231_v33, %v249_v34  ;;  %1093 = vmatprep.subr.bf16.mxu1 %v1204_v0 }
  0x1d   : > { %v253_v39 = vsel %vm252_vm8, %v235_v36, %v251_v37  ;;  %v393_v37 = vsub.s32 1, %v1266_v5 }
  0x1f   : > { %v406_v6 = vrot.slane %v181_v17, %v393_v37  ;;  %v414_v17 = vrot.slane %v183_v25, %v393_v37  ;;  %v563_v25 = vld [vmem:[%s1264_s18 + $0xc] sm:$0x2]  ;;  %v422_v24 = vrot.slane %v185_v32, %v393_v37 }
  0xed   : > { %v297_v41 = vpop.f32.mrb[0].mxu0 }
  0xee   : > { %v298_v42 = vadd.f32 %v297_v41, %v253_v39  ;;  %v1085_v43 = vpop.f32.mrb[1].mxu0  ;;  %v394_v39 = vrot.slane %v178_v9, %v393_v37  ;;  %v557_v41 = vld [vmem:[%s1264_s18] sm:$0x2]  ;;  %v560_v9 = vld [vmem:[%s1264_s18 + $0x6] sm:$0x2] }
  0xef   : > { %v300_v44 = vpop.f32.mrb[2].mxu0  ;;  %v402_v43 = vrot.slane %v180_v13, %v393_v37  ;;  %v410_v13 = vrot.slane %v182_v21, %v393_v37 }
  0xf0   : > { %v304_v45 = vmul.f32 0.17677669, %v298_v42  ;;  %v301_v46 = vadd.f32 %v300_v44, %v239_v40  ;;  %v1086_v47 = vpop.f32.mrb[3].mxu0  ;;  %v398_v40 = vrot.slane %v179_v10, %v393_v37  ;;  %v558_v42 = vld [vmem:[%s1264_s18 + $0x2] sm:$0x2] }
  0xf1   : > { %v567_v47 = vunpack.c.l.bf16 %v558_v42 }
  0xf2   : > { %v305_v48 = vmul.f32 0.17677669, %v301_v46  ;;  %v307_v49 = vsel %vm306_vm9, %v304_v45, -inf  ;;  %v427_v44 = vsel %vm240_vm2, %v398_v40, %v394_v39  ;;  %v566_v46 = vunpack.c.l.bf16 %v557_v41 }
  0xf3   : > { %308 = vmax.xlane.f32.xlu0 %v307_v49  ;;  %v428_v7 = vsel %vm242_vm3, %v402_v43, %v427_v44 }
  0xf4   : > { %v311_v50 = vsel %vm310_vm10, %v305_v48, -inf }
  0xf7   : > { %312 = vmax.xlane.f32.xlu0 %v311_v50  ;;  %v429_v50 = vsel %vm244_vm4, %v406_v6, %v428_v7 }
 0x10d   : > { %389 = vrot.lane.b32.xlu0 %v1248_v1, %s1206_s19 }
 0x111   : > { %756 = vrot.lane.b32.xlu0 %v1248_v1, %s1207_s20 }
 0x180   : > { %v309_v51 = vpop.xlane.xlu0 %308 }
 0x181   : > { %v314_v52 = vsub.f32 %v304_v45, %v309_v51  ;;  %v559_v45 = vld [vmem:[%s1264_s18 + $0x4] sm:$0x2]  ;;  %v561_v51 = vld [vmem:[%s1264_s18 + $0x8] sm:$0x2] }
 0x182   : > { %v568_v10 = vunpack.c.l.bf16 %v559_v45  ;;  %v570_v16 = vunpack.c.l.bf16 %v561_v51 }
 0x183   : > { %v316_v53 = vmul.f32 1.442695, %v314_v52  ;;  %v569_v52 = vunpack.c.l.bf16 %v560_v9 }
 0x184   : > { %v313_v54 = vpop.xlane.xlu0 %312 }
 0x185   : > { %1164 = vpow2.f32 %v316_v53  ;;  %v315_v55 = vsub.f32 %v305_v48, %v313_v54  ;;  %v1381_v48 = vsub.s32 2, %v1266_v5  ;;  %v1398_v54 = vsub.s32 3, %v1266_v5 }
 0x187   : > { %v318_v56 = vmul.f32 1.442695, %v315_v55  ;;  %v591_v49 = vrot.slane %v566_v46, %v1381_v48  ;;  %v595_v8 = vrot.slane %v567_v47, %v1381_v48  ;;  %v599_v12 = vrot.slane %v568_v10, %v1381_v48 }
 0x188   : > { %v390_v19 = vpop.permute.xlu0 %389  ;;  %v430_v55 = vsel %vm246_vm5, %v410_v13, %v429_v50  ;;  %v603_v21 = vrot.slane %v569_v52, %v1381_v48  ;;  %v761_v5 = vrot.slane %v566_v46, %v1398_v54  ;;  %v765_v62 = vrot.slane %v567_v47, %v1398_v54 }
 0x189   : > { %1166 = vpow2.f32 %v318_v56  ;;  %v440_v27 = vsel %vm256_vm1, %v390_v19, 0  ;;  %v624_v53 = vsel %vm240_vm2, %v595_v8, %v591_v49  ;;  %v562_v56 = vld [vmem:[%s1264_s18 + $0xa] sm:$0x2]  ;;  %v431_v20 = vsel %vm248_vm6, %v414_v17, %v430_v55 }
 0x18a   : > { %v607_v4 = vrot.slane %v570_v16, %v1381_v48  ;;  %v572_v19 = vunpack.c.l.bf16 %v563_v25  ;;  %v773_v32 = vrot.slane %v569_v52, %v1398_v54  ;;  %v777_v41 = vrot.slane %v570_v16, %v1398_v54 }
 0x18c   : > { %v757_v31 = vpop.permute.xlu0 %756  ;;  %v785_v13 = vrot.slane %v572_v19, %v1398_v54 }
 0x18d   : > { %v807_v34 = vsel %vm256_vm1, %v757_v31, 0 }
 0x18f   : > { %v1165_v57 = vpop.eup %1164 }
 0x190   : > { %v320_v58 = vsel %vm306_vm9, %v1165_v57, 0.0 }
 0x191   : > { %321 = vadd.xlane.f32.xlu1 %v320_v58  ;;  %v625_v58 = vsel %vm242_vm3, %v599_v12, %v624_v53 }
 0x193   : > { %v1167_v59 = vpop.eup %1166 }
 0x194   : > { %v323_v60 = vsel %vm310_vm10, %v1167_v59, 0.0 }
 0x195   : > { %324 = vadd.xlane.f32.xlu1 %v323_v60  ;;  %v571_v60 = vunpack.c.l.bf16 %v562_v56 }
 0x197   : > { %v781_v47 = vrot.slane %v571_v60, %v1398_v54 }
 0x1a6   : > { %387 = vrot.lane.b32.xlu1 %v1254_v3, %s1206_s19 }
 0x1aa   : > { %577 = vrot.lane.b32.xlu1 %v1248_v1, %s1209_s21 }
 0x1ae   : > { %575 = vrot.lane.b32.xlu1 %v1254_v3, %s1209_s21 }
 0x1b2   : > { %754 = vrot.lane.b32.xlu1 %v1254_v3, %s1207_s20 }
 0x21e   : > { %v322_v11 = vpop.xlane.xlu1 %321 }
 0x21f   : > { %1168 = vrcp.f32 %v322_v11 }
 0x222   : > { %v325_v14 = vpop.xlane.xlu1 %324 }
 0x223   : > { %1170 = vrcp.f32 %v325_v14 }
 0x226   : > { %v388_v26 = vpop.permute.xlu1 %387 }
 0x229   : > { %v1169_v15 = vpop.eup %1168 }
 0x22a   : > { %v328_v22 = vmul.f32 %v1169_v15, %v1165_v57  ;;  %v578_v1 = vpop.permute.xlu1 %577  ;;  %v418_v57 = vrot.slane %v184_v29, %v393_v37  ;;  %v626_v29 = vsel %vm244_vm4, %v603_v21, %v625_v58 }
 0x22b   : > { %v637_v3 = vsel %vm256_vm1, %v578_v1, 0  ;;  %v426_v1 = vrot.slane %v186_v38, %v393_v37 }
 0x22c   : > { %v432_v15 = vsel %vm250_vm7, %v418_v57, %v431_v20 }
 0x22d   : > { %v1171_v18 = vpop.eup %1170 }
 0x22e   : > { %v329_v23 = vmul.f32 %v1171_v18, %v1167_v59  ;;  %v576_v33 = vpop.permute.xlu1 %575  ;;  %v564_v18 = vld [vmem:[%s1264_s18 + $0xe] sm:$0x2] }
 0x22f   : > { %v573_v28 = vunpack.c.l.bf16 %v564_v18 }
 0x230   : > { %v330_v30 = vpack.c.bf16 %v329_v23, %v328_v22  ;;  %v769_v22 = vrot.slane %v568_v10, %v1398_v54  ;;  %v611_v23 = vrot.slane %v571_v60, %v1381_v48 }
 0x231   : > { %v619_v43 = vrot.slane %v573_v28, %v1381_v48  ;;  %v789_v53 = vrot.slane %v573_v28, %v1398_v54 }
 0x232   : > { %1090 = vmatmul.mubr.msk.bf16.vlgmr.msra.gmra.mrb[0].mxu1 %vm306_vm9, %v330_v30  ;;  %v755_v36 = vpop.permute.xlu1 %754  ;;  %v433_v30 = vsel %vm252_vm8, %v422_v24, %v432_v15 }
 0x233   : > { %1094 = vmatpush3.bf16.xpose.msra.mxu1 %v440_v27  ;;  %1095 = vmatprep.mubr.msk.bf16.mxu1 %vm1205_vm0, %v1204_v0  ;;  %v627_v27 = vsel %vm246_vm5, %v607_v4, %v626_v29 }
 0x234   : > { %1105 = vmatprep.subr.bf16.mxu1 %v1204_v0 }
 0x23a   : > { %1096 = vmatmul.mubr.msk.bf16.vlgmr.msra.gmra.mrb[4].mxu1 %vm256_vm1, %v388_v26  ;;  %v794_v26 = vsel %vm240_vm2, %v765_v62, %v761_v5 }
 0x23b   : > { %1106 = vmatpush3.bf16.xpose.msra.mxu1 %v637_v3  ;;  %1107 = vmatprep.mubr.msk.bf16.mxu1 %vm1205_vm0, %v1204_v0  ;;  %v615_v3 = vrot.slane %v572_v19, %v1381_v48  ;;  %v795_v31 = vsel %vm242_vm3, %v769_v22, %v794_v26 }
 0x23c   : > { %1117 = vmatprep.subr.bf16.mxu1 %v1204_v0  ;;  %v796_v44 = vsel %vm244_vm4, %v773_v32, %v795_v31 }
 0x23d   : > { %v797_v9 = vsel %vm246_vm5, %v777_v41, %v796_v44 }
 0x23e   : > { %v798_v51 = vsel %vm248_vm6, %v781_v47, %v797_v9 }
 0x23f   : > { %v799_v21 = vsel %vm250_vm7, %v785_v13, %v798_v51 }
 0x242   : > { %1108 = vmatmul.mubr.msk.bf16.vlgmr.msra.gmra.mrb[8].mxu1 %vm256_vm1, %v576_v33 }
 0x243   : > { %1118 = vmatpush3.bf16.xpose.msra.mxu1 %v807_v34  ;;  %1119 = vmatprep.mubr.msk.bf16.mxu1 %vm1205_vm0, %v1204_v0  ;;  %v628_v34 = vsel %vm248_vm6, %v611_v23, %v627_v27 }
 0x244   : > { %v629_v37 = vsel %vm250_vm7, %v615_v3, %v628_v34 }
 0x245   : > { %v630_v10 = vsel %vm252_vm8, %v619_v43, %v629_v37 }
 0x24a   : > { %1120 = vmatmul.mubr.msk.bf16.vlgmr.msra.gmra.mrb[12].mxu1 %vm256_vm1, %v755_v36  ;;  %v565_v36 = vld [vmem:[%s1264_s18 + $0x10] sm:$0x2] }
 0x24b   : > { %v574_v46 = vunpack.c.l.bf16 %v565_v36 }
 0x24d   : > { %v623_v8 = vrot.slane %v574_v46, %v1381_v48  ;;  %v800_v48 = vsel %vm252_vm8, %v789_v53, %v799_v21  ;;  %v793_v20 = vrot.slane %v574_v46, %v1398_v54 }
 0x305   : > { %v1406_v59 = vpop.f32.mrb[0].mxu1 }
 0x306   : > { %v1091_v63 = vpop.f32.mrb[1].mxu1 }
 0x307   : > { %v1413_v11 = vpop.f32.mrb[2].mxu1 }
 0x308   : > { %v1092_v14 = vpop.f32.mrb[3].mxu1 }
 0x30d   : > { %v476_v33 = vpop.f32.mrb[4].mxu1 }
 0x30e   : > { %v477_v39 = vadd.f32 %v476_v33, %v433_v30  ;;  %v1097_v40 = vpop.f32.mrb[5].mxu1 }
 0x30f   : > { %v479_v42 = vpop.f32.mrb[6].mxu1 }
 0x310   : > { %v483_v45 = vmul.f32 0.17677669, %v477_v39  ;;  %v480_v35 = vadd.f32 %v479_v42, %v426_v1  ;;  %v1098_v38 = vpop.f32.mrb[7].mxu1 }
 0x312   : > { %v484_v6 = vmul.f32 0.17677669, %v480_v35  ;;  %v485_v7 = vsel %vm306_vm9, %v483_v45, -inf }
 0x313   : > { %486 = vmax.xlane.f32.xlu0 %v485_v7 }
 0x314   : > { %v488_v49 = vsel %vm310_vm10, %v484_v6, -inf }
 0x315   : > { %489 = vmax.xlane.f32.xlu1 %v488_v49  ;;  %v673_v50 = vpop.f32.mrb[8].mxu1 }
 0x316   : > { %v674_v52 = vadd.f32 %v673_v50, %v630_v10  ;;  %v1109_v12 = vpop.f32.mrb[9].mxu1 }
 0x317   : > { %v676_v17 = vpop.f32.mrb[10].mxu1 }
 0x318   : > { %v680_v55 = vmul.f32 0.17677669, %v674_v52  ;;  %v677_v56 = vadd.f32 %v676_v17, %v623_v8  ;;  %v1110_v16 = vpop.f32.mrb[11].mxu1 }
 0x31a   : > { %v681_v57 = vmul.f32 0.17677669, %v677_v56  ;;  %v682_v58 = vsel %vm306_vm9, %v680_v55, -inf }
 0x31b   : > { %683 = vmax.xlane.f32.xlu0 %v682_v58 }
 0x31c   : > { %v685_v62 = vsel %vm310_vm10, %v681_v57, -inf }
 0x31d   : > { %v843_v25 = vpop.f32.mrb[12].mxu1 }
 0x31e   : > { %v844_v60 = vadd.f32 %v843_v25, %v800_v48  ;;  %v1121_v5 = vpop.f32.mrb[13].mxu1 }
 0x31f   : > { %686 = vmax.xlane.f32.xlu0 %v685_v62  ;;  %v846_v63 = vpop.f32.mrb[14].mxu1 }
 0x320   : > { %v850_v4 = vmul.f32 0.17677669, %v844_v60  ;;  %v847_v24 = vadd.f32 %v846_v63, %v793_v20  ;;  %v1122_v29 = vpop.f32.mrb[15].mxu1 }
 0x322   : > { %v851_v14 = vmul.f32 0.17677669, %v847_v24  ;;  %v852_v15 = vsel %vm306_vm9, %v850_v4, -inf }
 0x323   : > { %853 = vmax.xlane.f32.xlu0 %v852_v15 }
 0x324   : > { %v855_v18 = vsel %vm310_vm10, %v851_v14, -inf }
 0x325   : > { %856 = vmax.xlane.f32.xlu1 %v855_v18 }
 0x3a0   : > { %v487_v19 = vpop.xlane.xlu0 %486 }
 0x3a1   : > { %v491_v22 = vsub.f32 %v483_v45, %v487_v19 }
 0x3a2   : > { %v490_v54 = vpop.xlane.xlu1 %489 }
 0x3a3   : > { %v493_v23 = vmul.f32 1.442695, %v491_v22  ;;  %v492_v26 = vsub.f32 %v484_v6, %v490_v54 }
 0x3a5   : > { %1172 = vpow2.f32 %v493_v23  ;;  %v495_v27 = vmul.f32 1.442695, %v492_v26 }
 0x3a7   : > { %1174 = vpow2.f32 %v495_v27 }
 0x3a8   : > { %v684_v30 = vpop.xlane.xlu0 %683 }
 0x3a9   : > { %v688_v28 = vsub.f32 %v680_v55, %v684_v30 }
 0x3ab   : > { %v690_v32 = vmul.f32 1.442695, %v688_v28 }
 0x3ac   : > { %v687_v1 = vpop.xlane.xlu0 %686 }
 0x3ad   : > { %1176 = vpow2.f32 %v690_v32  ;;  %v689_v3 = vsub.f32 %v681_v57, %v687_v1 }
 0x3af   : > { %v1173_v31 = vpop.eup %1172  ;;  %v692_v33 = vmul.f32 1.442695, %v689_v3 }
 0x3b0   : > { %v854_v34 = vpop.xlane.xlu0 %853  ;;  %v497_v36 = vsel %vm306_vm9, %v1173_v31, 0.0 }
 0x3b1   : > { %v1175_v39 = vpop.eup %1174  ;;  %1178 = vpow2.f32 %v692_v33  ;;  %v858_v40 = vsub.f32 %v850_v4, %v854_v34  ;;  %498 = vadd.xlane.f32.xlu0 %v497_v36 }
 0x3b2   : > { %v500_v41 = vsel %vm310_vm10, %v1175_v39, 0.0  ;;  %v857_v46 = vpop.xlane.xlu1 %856 }
 0x3b3   : > { %v860_v42 = vmul.f32 1.442695, %v858_v40  ;;  %501 = vadd.xlane.f32.xlu1 %v500_v41  ;;  %v859_v47 = vsub.f32 %v851_v14, %v857_v46 }
 0x3b5   : > { %1180 = vpow2.f32 %v860_v42  ;;  %v862_v6 = vmul.f32 1.442695, %v859_v47 }
 0x3b7   : > { %v1177_v43 = vpop.eup %1176  ;;  %1182 = vpow2.f32 %v862_v6 }
 0x3b8   : > { %v694_v44 = vsel %vm306_vm9, %v1177_v43, 0.0 }
 0x3b9   : > { %695 = vadd.xlane.f32.xlu0 %v694_v44 }
 0x3bb   : > { %v1179_v45 = vpop.eup %1178 }
 0x3bc   : > { %v697_v35 = vsel %vm310_vm10, %v1179_v45, 0.0 }
 0x3bd   : > { %698 = vadd.xlane.f32.xlu1 %v697_v35 }
 0x3bf   : > { %v1181_v38 = vpop.eup %1180 }
 0x3c0   : > { %v864_v37 = vsel %vm306_vm9, %v1181_v38, 0.0 }
 0x3c1   : > { %865 = vadd.xlane.f32.xlu0 %v864_v37  ;;  %v1183_v7 = vpop.eup %1182 }
 0x3c2   : > { %v867_v9 = vsel %vm310_vm10, %v1183_v7, 0.0 }
 0x3ce   : > { %705 = vrot.lane.b32.xlu1 %v1339_v61, %s1209_s21 }
 0x3d7   : > { %508 = vrot.lane.b32.xlu0 %v1339_v61, %s1206_s19 }
 0x3f2   : > { %868 = vadd.xlane.f32.xlu1 %v867_v9 }
 0x403   : > { %875 = vrot.lane.b32.xlu1 %v1339_v61, %s1207_s20 }
 0x43e   : > { %v499_v49 = vpop.xlane.xlu0 %498 }
 0x440   : > { %v502_v10 = vpop.xlane.xlu1 %501 }
 0x441   : > { %1184 = vrcp.f32 %v502_v10 }
 0x442   : > { %1186 = vrcp.f32 %v499_v49 }
 0x446   : > { %v696_v8 = vpop.xlane.xlu0 %695 }
 0x44a   : > { %v699_v13 = vpop.xlane.xlu1 %698 }
 0x44b   : > { %1188 = vrcp.f32 %v699_v13  ;;  %v1185_v51 = vpop.eup %1184 }
 0x44c   : > { %1190 = vrcp.f32 %v696_v8  ;;  %v1187_v52 = vpop.eup %1186  ;;  %v506_v12 = vmul.f32 %v1185_v51, %v1175_v39 }
 0x44d   : > { %v505_v55 = vmul.f32 %v1187_v52, %v1173_v31 }
 0x44e   : > { %v866_v50 = vpop.xlane.xlu0 %865  ;;  %v706_v56 = vpop.permute.xlu1 %705 }
 0x44f   : > { %v507_v16 = vpack.c.bf16 %v506_v12, %v505_v55  ;;  %v711_v21 = vand.u32 %v706_v56, %v1341_v2  ;;  %1192 = vrcp.f32 %v866_v50 }
 0x452   : > { %v509_v17 = vpop.permute.xlu0 %508 }
 0x453   : > { %v514_v53 = vand.u32 %v509_v17, %v1341_v2 }
 0x455   : > { %1100 = vmatpush3.bf16.msra.mxu0 %v514_v53  ;;  %v1189_v61 = vpop.eup %1188 }
 0x456   : > { %1111 = vmatprep.subr.bf16.mxu0 %v1204_v0  ;;  %v1191_v57 = vpop.eup %1190  ;;  %v703_v58 = vmul.f32 %v1189_v61, %v1179_v45 }
 0x457   : > { %v702_v48 = vmul.f32 %v1191_v57, %v1177_v43 }
 0x458   : > { %1102 = vmatmul.mubr.msk.bf16.vlgmr.msra.gmra.mrb[4].mxu0 %vm306_vm9, %v507_v16 }
 0x459   : > { %1112 = vmatpush3.bf16.msra.mxu0 %v711_v21  ;;  %1113 = vmatprep.mubr.msk.bf16.mxu0 %vm1205_vm0, %v1204_v0  ;;  %v704_v20 = vpack.c.bf16 %v703_v58, %v702_v48  ;;  %v1193_v62 = vpop.eup %1192 }
 0x45a   : > { %1123 = vmatprep.subr.bf16.mxu0 %v1204_v0  ;;  %v872_v4 = vmul.f32 %v1193_v62, %v1181_v38  ;;  %v968_v38 = vld [vmem:[%s163_s25 + $0x4] sm:$0x1] }
 0x460   : > { %1114 = vmatmul.mubr.msk.bf16.vlgmr.msra.gmra.mrb[8].mxu0 %vm306_vm9, %v704_v20 }
 0x461   : > { %1125 = vmatprep.mubr.msk.bf16.mxu0 %vm1205_vm0, %v1204_v0  ;;  %vm966_vm0 = vsmask.f32 256 }
 0x462   : > { %vm967_vm2 = vmand %vm965_vm15, %vm966_vm0 }
 0x47f   : > { %v869_v25 = vpop.xlane.xlu1 %868 }
 0x480   : > { %1194 = vrcp.f32 %v869_v25 }
 0x483   : > { %v876_v60 = vpop.permute.xlu1 %875 }
 0x484   : > { %v881_v5 = vand.u32 %v876_v60, %v1341_v2 }
 0x486   : > { %1124 = vmatpush3.bf16.msra.mxu0 %v881_v5 }
 0x48a   : > { %v1195_v63 = vpop.eup %1194 }
 0x48b   : > { %v873_v24 = vmul.f32 %v1195_v63, %v1183_v7 }
 0x48d   : > { %v874_v29 = vpack.c.bf16 %v873_v24, %v872_v4 }
 0x48f   : > { %1126 = vmatmul.mubr.msk.bf16.vlgmr.msra.gmra.mrb[12].mxu0 %vm306_vm9, %v874_v29 }
 0x52b   : > { %v550_v14 = vpop.f32.mrb[4].mxu0 }
 0x52c   : > { %v1103_v15 = vpop.f32.mrb[5].mxu0 }
 0x52d   : > { %v553_v18 = vpop.f32.mrb[6].mxu0 }
 0x52e   : > { %v1145_v19 = vpack.i.bf16 %v550_v14, %v553_v18  ;;  %v1104_v22 = vpop.f32.mrb[7].mxu0 }
 0x530   : > { %1146 = vrot.lane.b32.xlu1 %v1145_v19, %s1207_s20 }
 0x533   : > { %v747_v0 = vpop.f32.mrb[8].mxu0 }
 0x534   : > { %v1115_v54 = vpop.f32.mrb[9].mxu0 }
 0x535   : > { %v750_v23 = vpop.f32.mrb[10].mxu0 }
 0x536   : > { %v1150_v2 = vpack.i.bf16 %v747_v0, %v750_v23  ;;  %v1116_v26 = vpop.f32.mrb[11].mxu0 }
 0x538   : > { %1151 = vrot.lane.b32.xlu0 %v1150_v2, %s1209_s21 }
 0x562   : > { %v917_v27 = vpop.f32.mrb[12].mxu0 }
 0x563   : > { %v1127_v30 = vpop.f32.mrb[13].mxu0 }
 0x564   : > { %v920_v28 = vpop.f32.mrb[14].mxu0 }
 0x565   : > { %v1155_v32 = vpack.i.bf16 %v917_v27, %v920_v28  ;;  %v1128_v1 = vpop.f32.mrb[15].mxu0 }
 0x567   : > { %1156 = vrot.lane.b32.xlu1 %v1155_v32, %s1206_s19 }
 0x5a2   : > { %v1147_v3 = vpop.permute.xlu1 %1146 }
 0x5a3   : > { %v1149_v33 = vunpack.i.h.bf16 %v1147_v3  ;;  %v1148_v34 = vunpack.i.l.bf16 %v1147_v3 }
 0x5a5   : > { %v948_v41 = vsel %vm256_vm1, %v1406_v59, %v1149_v33  ;;  %v949_v42 = vsel %vm256_vm1, %v1413_v11, %v1148_v34 }
 0x5aa   : > { %v1152_v31 = vpop.permute.xlu0 %1151 }
 0x5ab   : > { %v1154_v36 = vunpack.i.h.bf16 %v1152_v31  ;;  %v1153_v39 = vunpack.i.l.bf16 %v1152_v31 }
 0x5ad   : > { %v951_v45 = vsel %vm950_vm13, %v948_v41, %v1154_v36  ;;  %v952_v35 = vsel %vm950_vm13, %v949_v42, %v1153_v39 }
 0x5d9   : > { %v1157_v40 = vpop.permute.xlu1 %1156 }
 0x5da   : > { %v1159_v43 = vunpack.i.h.bf16 %v1157_v40  ;;  %v1158_v44 = vunpack.i.l.bf16 %v1157_v40 }
 0x5dc   : > { %v954_v37 = vsel %vm953_vm14, %v951_v45, %v1159_v43  ;;  %v955_v46 = vsel %vm953_vm14, %v952_v35, %v1158_v44 }
 0x5dd   : > { %v1063_v47 = vpack.c.bf16 %v954_v37, %v954_v37  ;;  %v1064_v6 = vpack.c.bf16 %v955_v46, %v955_v46 }
 0x5df   : > { %964 = vst [vmem:[%s163_s25] sm:$0xf] %v1063_v47  ;;  %v969_v7 = vsel %vm967_vm2, %v1064_v6, %v968_v38 }
 0x5e0   : > { %970 = vst [vmem:[%s163_s25 + $0x4] sm:$0x1] %v969_v7 }
 0x5e1 PF: > { %s12_s9 = sadd.s32 1, %s1202_s9  }
 0x5e2   : > { %p9_p4 = scmp.ge.s32.totalorder %s12_s9, 4  }
 0x5e4   :  { %11 = sbr.rel (!%p9_p4) target bundleno = 1 (0x1), region = 61 }

// kernel: model_forward.19
= control target key start
LH: loop header
LB: loop body
LE: loop exit
PB: predicated region body
PF: predicated region fallthrough
CT: control target
= control target key end

     0   :  { %vm28_vm0 = vcmask 1041408   ;;  %v593_v43 = vmov 0   ;;  %s764_s0 = inlined_call_operand.vmem [shape: f32[18,128], index: 0, kind: input, shape index: {}]   ;;  %s765_s3 = inlined_call_operand.vmem [shape: bf16[128,512], index: 3, kind: input, shape index: {}]   ;;  %s766_s1 = inlined_call_operand.vmem [shape: f32[1,128], index: 1, kind: input, shape index: {}]   ;;  %s767_s2 = inlined_call_operand.vmem [shape: f32[1,128], index: 2, kind: input, shape index: {}]   ;;  %s768_s4 = inlined_call_operand.vmem [shape: f32[1,512], index: 4, kind: input, shape index: {}]   ;;  %s769_s5 = inlined_call_operand.vmem [shape: bf16[18,256], index: 5, kind: output, shape index: {}]  }
   0x1   :  { %v21_v0 = vld [vmem:[%s764_s0] sm:$0xff]  ;;  %v23_v1 = vld [vmem:[%s764_s0 + $0x10] sm:$0x3]  ;;  %v22_v3 = vld [vmem:[%s764_s0 + $0x8] sm:$0xff]  ;;  %329 = vmatprep.mubr.bf16.mxu0 %v593_v43  ;;  %380 = vmatprep.mubr.bf16.mxu1 %v593_v43 }
   0x2   :  { %24 = vadd.xlane.f32.xlu0 %v21_v0  ;;  %v29_v2 = vsel %vm28_vm0, %v23_v1, 0.0  ;;  %v515_v4 = vld [vmem:[%s765_s3 + $0x4] ss:$16 sps:$4 sm:$0xff]   ;;  %v517_v5 = vld [vmem:[%s765_s3 + $0xc] ss:$16 sps:$4 sm:$0xff]  }
   0x3   :  { %30 = vadd.xlane.f32.xlu1 %v29_v2  ;;  %297 = vmatprep.subr.bf16.mxu0 %v515_v4  ;;  %v519_v6 = vld [vmem:[%s765_s3] ss:$16 sps:$4 sm:$0xff]   ;;  %v520_v7 = vld [vmem:[%s765_s3 + $0x8] ss:$16 sps:$4 sm:$0xff]   ;;  %v521_v8 = vld [vmem:[%s765_s3 + $0x24] ss:$16 sps:$4 sm:$0xff]  }
   0x4   :  { %348 = vmatprep.subr.bf16.mxu1 %v517_v5  ;;  %298 = vmatpush1.bf16.msra.mxu0 %v519_v6  ;;  %v523_v9 = vld [vmem:[%s765_s3 + $0x2c] ss:$16 sps:$4 sm:$0xff]   ;;  %v525_v23 = vld [vmem:[%s765_s3 + $0x20] ss:$16 sps:$4 sm:$0xff]   ;;  %v526_v24 = vld [vmem:[%s765_s3 + $0x28] ss:$16 sps:$4 sm:$0xff]  }
   0x5   :  { %349 = vmatpush1.bf16.msra.mxu1 %v520_v7  ;;  %299 = vmatprep.subr.bf16.mxu0 %v521_v8  ;;  %v527_v25 = vld [vmem:[%s765_s3 + $0x44] ss:$16 sps:$4 sm:$0xff]   ;;  %v529_v26 = vld [vmem:[%s765_s3 + $0x4c] ss:$16 sps:$4 sm:$0xff]   ;;  %v531_v27 = vld [vmem:[%s765_s3 + $0x40] ss:$16 sps:$4 sm:$0xff]  }
   0x6   :  { %26 = vadd.xlane.f32.xlu0 %v22_v3  ;;  %350 = vmatprep.subr.bf16.mxu1 %v523_v9  ;;  %v532_v28 = vld [vmem:[%s765_s3 + $0x48] ss:$16 sps:$4 sm:$0xff]   ;;  %v533_v29 = vld [vmem:[%s765_s3 + $0x64] ss:$16 sps:$4 sm:$0xff]   ;;  %v535_v30 = vld [vmem:[%s765_s3 + $0x6c] ss:$16 sps:$4 sm:$0xff]  }
   0x7   :  { %v537_v31 = vld [vmem:[%s765_s3 + $0x60] ss:$16 sps:$4 sm:$0xff]   ;;  %v538_v32 = vld [vmem:[%s765_s3 + $0x68] ss:$16 sps:$4 sm:$0xff]   ;;  %v539_v33 = vld [vmem:[%s765_s3 + $0x84] ss:$16 sps:$4 sm:$0xff]  }
   0x8   :  { %300 = vmatpush1.bf16.msra.mxu0 %v525_v23  ;;  %v541_v34 = vld [vmem:[%s765_s3 + $0x8c] ss:$16 sps:$4 sm:$0xff]   ;;  %v543_v35 = vld [vmem:[%s765_s3 + $0x80] ss:$16 sps:$4 sm:$0xff]   ;;  %v544_v36 = vld [vmem:[%s765_s3 + $0x88] ss:$16 sps:$4 sm:$0xff]  }
   0x9   :  { %351 = vmatpush1.bf16.msra.mxu1 %v526_v24  ;;  %301 = vmatprep.subr.bf16.mxu0 %v527_v25  ;;  %v545_v37 = vld [vmem:[%s765_s3 + $0xa4] ss:$16 sps:$4 sm:$0xff]   ;;  %v547_v38 = vld [vmem:[%s765_s3 + $0xac] ss:$16 sps:$4 sm:$0xff]   ;;  %v549_v39 = vld [vmem:[%s765_s3 + $0xa0] ss:$16 sps:$4 sm:$0xff]  }
   0xa   :  { %352 = vmatprep.subr.bf16.mxu1 %v529_v26  ;;  %v550_v40 = vld [vmem:[%s765_s3 + $0xa8] ss:$16 sps:$4 sm:$0xff]   ;;  %v551_v41 = vld [vmem:[%s765_s3 + $0xc4] ss:$16 sps:$4 sm:$0xff]   ;;  %v553_v42 = vld [vmem:[%s765_s3 + $0xcc] ss:$16 sps:$4 sm:$0xff]  }
   0xb   :  { %v555_v44 = vld [vmem:[%s765_s3 + $0xc0] ss:$16 sps:$4 sm:$0xff]   ;;  %v556_v45 = vld [vmem:[%s765_s3 + $0xc8] ss:$16 sps:$4 sm:$0xff]   ;;  %v557_v46 = vld [vmem:[%s765_s3 + $0xe4] ss:$16 sps:$4 sm:$0xff]  }
   0xc   :  { %302 = vmatpush1.bf16.msra.mxu0 %v531_v27  ;;  %v559_v47 = vld [vmem:[%s765_s3 + $0xec] ss:$16 sps:$4 sm:$0xff]   ;;  %v561_v48 = vld [vmem:[%s765_s3 + $0xe0] ss:$16 sps:$4 sm:$0xff]   ;;  %v562_v49 = vld [vmem:[%s765_s3 + $0xe8] ss:$16 sps:$4 sm:$0xff]  }
   0xd   :  { %353 = vmatpush1.bf16.msra.mxu1 %v532_v28  ;;  %303 = vmatprep.subr.bf16.mxu0 %v533_v29  ;;  %v468_v61 = vld [vmem:[%s766_s1] ss:$0 sm:$0xff] }
   0xe   :  { %354 = vmatprep.subr.bf16.mxu1 %v535_v30  ;;  %v469_v2 = vld [vmem:[%s767_s2] ss:$0 sm:$0xff] }
  0x10   :  { %304 = vmatpush1.bf16.msra.mxu0 %v537_v31 }
  0x11   :  { %355 = vmatpush1.bf16.msra.mxu1 %v538_v32  ;;  %305 = vmatprep.subr.bf16.mxu0 %v539_v33 }
  0x12   :  { %356 = vmatprep.subr.bf16.mxu1 %v541_v34 }
  0x14   :  { %306 = vmatpush1.bf16.msra.mxu0 %v543_v35 }
  0x15   :  { %357 = vmatpush1.bf16.msra.mxu1 %v544_v36  ;;  %307 = vmatprep.subr.bf16.mxu0 %v545_v37 }
  0x16   :  { %358 = vmatprep.subr.bf16.mxu1 %v547_v38 }
  0x18   :  { %308 = vmatpush1.bf16.msra.mxu0 %v549_v39 }
  0x19   :  { %359 = vmatpush1.bf16.msra.mxu1 %v550_v40  ;;  %309 = vmatprep.subr.bf16.mxu0 %v551_v41 }
  0x1a   :  { %360 = vmatprep.subr.bf16.mxu1 %v553_v42 }
  0x1c   :  { %310 = vmatpush1.bf16.msra.mxu0 %v555_v44 }
  0x1d   :  { %361 = vmatpush1.bf16.msra.mxu1 %v556_v45  ;;  %311 = vmatprep.subr.bf16.mxu0 %v557_v46 }
  0x1e   :  { %362 = vmatprep.subr.bf16.mxu1 %v559_v47 }
  0x20   :  { %312 = vmatpush1.bf16.msra.mxu0 %v561_v48 }
  0x21   :  { %363 = vmatpush1.bf16.msra.mxu1 %v562_v49 }
  0x8f   :  { %v25_v10 = vpop.xlane.xlu0 %24 }
  0x90   :  { %v33_v11 = vmul.f32 0.0078125, %v25_v10  ;;  %v31_v12 = vpop.xlane.xlu1 %30 }
  0x91   :  { %v35_v13 = vmul.f32 0.0078125, %v31_v12 }
  0x92   :  { %v652_v14 = vsub.f32 %v21_v0, %v33_v11  ;;  %v117_v11 = vlaneseq }
  0x93   :  { %v654_v15 = vsub.f32 %v23_v1, %v35_v13  ;;  %v27_v16 = vpop.xlane.xlu0 %26 }
  0x94   :  { %v34_v17 = vmul.f32 0.0078125, %v27_v16  ;;  %v39_v18 = vmul.f32 %v652_v14, %v652_v14  ;;  %v118_v12 = vshrl.u32 %v117_v11, 7 }
  0x95   :  { %v41_v19 = vmul.f32 %v654_v15, %v654_v15 }
  0x96   :  { %v660_v20 = vsub.f32 %v22_v3, %v34_v17  ;;  %42 = vadd.xlane.f32.xlu1 %v39_v18  ;;  %v127_v13 = vsub.s32 2, %v118_v12 }
  0x97   :  { %v46_v21 = vsel %vm28_vm0, %v41_v19, 0.0 }
  0x98   :  { %v40_v22 = vmul.f32 %v660_v20, %v660_v20 }
  0x9a   :  { %47 = vadd.xlane.f32.xlu1 %v46_v21  ;;  %44 = vadd.xlane.f32.xlu0 %v40_v22 }
 0x123   :  { %v43_v50 = vpop.xlane.xlu1 %42 }
 0x124   :  { %v49_v51 = vmul.f32 0.0078125, %v43_v50 }
 0x126   :  { %v52_v52 = vadd.f32 1e-05, %v49_v51 }
 0x127   :  { %v48_v53 = vpop.xlane.xlu1 %47  ;;  %v45_v54 = vpop.xlane.xlu0 %44 }
 0x128   :  { %563 = vrsqrt.f32 %v52_v52  ;;  %v51_v55 = vmul.f32 0.0078125, %v48_v53  ;;  %v50_v56 = vmul.f32 0.0078125, %v45_v54  ;;  %v119_v53 = vsub.s32 0, %v118_v12 }
 0x12a   :  { %v54_v57 = vadd.f32 1e-05, %v51_v55  ;;  %v53_v58 = vadd.f32 1e-05, %v50_v56  ;;  %v123_v55 = vsub.s32 1, %v118_v12 }
 0x12c   :  { %565 = vrsqrt.f32 %v54_v57 }
 0x12d   :  { %567 = vrsqrt.f32 %v53_v58 }
 0x132   :  { %v564_v59 = vpop.eup %563 }
 0x133   :  { %v58_v60 = vmul.f32 %v564_v59, %v652_v14  ;;  %v115_v14 = vld [vmem:[%s768_s4] sm:$0xf] }
 0x134   :  { %v128_v16 = vrot.slane %v115_v14, %v127_v13  ;;  %v120_v57 = vrot.slane %v115_v14, %v119_v53  ;;  %v124_v59 = vrot.slane %v115_v14, %v123_v55 }
 0x135   :  { %v68_v1 = vmul.f32 %v468_v61, %v58_v60 }
 0x136   :  { %v566_v62 = vpop.eup %565 }
 0x137   :  { %v568_v63 = vpop.eup %567  ;;  %v60_v4 = vmul.f32 %v566_v62, %v654_v15  ;;  %v78_v5 = vadd.f32 %v469_v2, %v68_v1  ;;  %v131_v15 = vsub.s32 3, %v118_v12 }
 0x138   :  { %v59_v0 = vmul.f32 %v568_v63, %v660_v20 }
 0x139   :  { %v70_v8 = vmul.f32 %v468_v61, %v60_v4  ;;  %v132_v17 = vrot.slane %v115_v14, %v131_v15 }
 0x13a   :  { %v69_v3 = vmul.f32 %v468_v61, %v59_v0 }
 0x13b   :  { %v80_v9 = vadd.f32 %v469_v2, %v70_v8 }
 0x13c   :  { %v79_v6 = vadd.f32 %v469_v2, %v69_v3 }
 0x13d   :  { %v82_v10 = vpack.c.bf16 %v80_v9, %v80_v9 }
 0x13e   :  { %v81_v7 = vpack.c.bf16 %v79_v6, %v78_v5 }
 0x140   :  { %330 = vmatmul.mubr.bf16.vlgmr.msra.gmra.mrb[0].mxu0 %v81_v7  ;;  %381 = vmatmul.mubr.bf16.vlgmr.msra.gmra.mrb[0].mxu1 %v81_v7 }
 0x141   :  { %339 = vmatprep.mubr.bf16.mxu0 %v593_v43  ;;  %390 = vmatprep.mubr.bf16.mxu1 %v593_v43 }
 0x148   :  { %340 = vmatmul.mubr.bf16.gmra.mrb[4].mxu0 %v82_v10  ;;  %391 = vmatmul.mubr.bf16.gmra.mrb[4].mxu1 %v82_v10 }
 0x213   :  { %v331_v18 = vpop.f32.mrb[0].mxu0  ;;  %v382_v19 = vpop.f32.mrb[0].mxu1 }
 0x214   :  { %v383_v20 = vadd.f32 %v382_v19, %v128_v16  ;;  %v333_v21 = vpop.f32.mrb[1].mxu0  ;;  %v384_v22 = vpop.f32.mrb[1].mxu1  ;;  %v332_v62 = vadd.f32 %v331_v18, %v120_v57 }
 0x215   :  { %v385_v23 = vadd.f32 %v384_v22, %v132_v17  ;;  %v335_v24 = vpop.f32.mrb[2].mxu0  ;;  %v386_v25 = vpop.f32.mrb[2].mxu1  ;;  %v334_v0 = vadd.f32 %v333_v21, %v124_v59 }
 0x216   :  { %v502_v26 = vmul.f32 -1.442695, %v383_v20  ;;  %v387_v27 = vadd.f32 %v386_v25, %v128_v16  ;;  %v337_v28 = vpop.f32.mrb[3].mxu0  ;;  %v388_v29 = vpop.f32.mrb[3].mxu1  ;;  %v336_v3 = vadd.f32 %v335_v24, %v120_v57 }
 0x217   :  { %v503_v30 = vmul.f32 -1.442695, %v385_v23  ;;  %v389_v31 = vadd.f32 %v388_v29, %v132_v17  ;;  %v338_v6 = vadd.f32 %v337_v28, %v124_v59 }
 0x218   :  { %569 = vpow2.f32 %v502_v26  ;;  %v504_v32 = vmul.f32 -1.442695, %v387_v27 }
 0x219   :  { %571 = vpow2.f32 %v503_v30  ;;  %v505_v33 = vmul.f32 -1.442695, %v389_v31 }
 0x21a   :  { %573 = vpow2.f32 %v504_v32 }
 0x21b   :  { %575 = vpow2.f32 %v505_v33  ;;  %v341_v34 = vpop.f32.mrb[4].mxu0  ;;  %v392_v35 = vpop.f32.mrb[4].mxu1 }
 0x21c   :  { %v393_v36 = vadd.f32 %v392_v35, %v128_v16  ;;  %v343_v37 = vpop.f32.mrb[5].mxu0  ;;  %v394_v38 = vpop.f32.mrb[5].mxu1  ;;  %v342_v12 = vadd.f32 %v341_v34, %v120_v57 }
 0x21d   :  { %v395_v39 = vadd.f32 %v394_v38, %v132_v17  ;;  %v345_v40 = vpop.f32.mrb[6].mxu0  ;;  %v396_v41 = vpop.f32.mrb[6].mxu1  ;;  %v344_v14 = vadd.f32 %v343_v37, %v124_v59 }
 0x21e   :  { %v506_v42 = vmul.f32 -1.442695, %v393_v36  ;;  %v346_v43 = vpop.f32.mrb[7].mxu0  ;;  %v397_v44 = vpop.f32.mrb[7].mxu1 }
 0x21f   :  { %v507_v45 = vmul.f32 -1.442695, %v395_v39 }
 0x220   :  { %577 = vpow2.f32 %v506_v42 }
 0x221   :  { %579 = vpow2.f32 %v507_v45 }
 0x222   :  { %v570_v46 = vpop.eup %569 }
 0x223   :  { %v572_v47 = vpop.eup %571  ;;  %v417_v48 = vadd.f32 1.0, %v570_v46 }
 0x224   :  { %v574_v49 = vpop.eup %573  ;;  %v418_v50 = vadd.f32 1.0, %v572_v47 }
 0x225   :  { %v576_v51 = vpop.eup %575  ;;  %581 = vrcp.f32 %v417_v48  ;;  %v419_v52 = vadd.f32 1.0, %v574_v49 }
 0x226   :  { %583 = vrcp.f32 %v418_v50  ;;  %v420_v54 = vadd.f32 1.0, %v576_v51 }
 0x227   :  { %585 = vrcp.f32 %v419_v52 }
 0x228   :  { %587 = vrcp.f32 %v420_v54 }
 0x22a   :  { %v578_v56 = vpop.eup %577 }
 0x22b   :  { %v580_v58 = vpop.eup %579  ;;  %v421_v60 = vadd.f32 1.0, %v578_v56 }
 0x22c   :  { %v422_v61 = vadd.f32 1.0, %v580_v58 }
 0x22d   :  { %589 = vrcp.f32 %v421_v60 }
 0x22e   :  { %591 = vrcp.f32 %v422_v61 }
 0x22f   :  { %v582_v63 = vpop.eup %581 }
 0x230   :  { %v584_v1 = vpop.eup %583  ;;  %v435_v2 = vmul.f32 %v582_v63, %v332_v62 }
 0x231   :  { %v586_v4 = vpop.eup %585  ;;  %v436_v5 = vmul.f32 %v584_v1, %v334_v0 }
 0x232   :  { %v588_v7 = vpop.eup %587  ;;  %v437_v8 = vmul.f32 %v586_v4, %v336_v3 }
 0x233   :  { %v511_v9 = vpack.c.bf16 %v436_v5, %v435_v2  ;;  %v438_v10 = vmul.f32 %v588_v7, %v338_v6 }
 0x235   :  { %461 = vst [vmem:[%s769_s5] sm:$0xff] %v511_v9  ;;  %v512_v11 = vpack.c.bf16 %v438_v10, %v437_v8 }
 0x237   :  { %v590_v13 = vpop.eup %589  ;;  %462 = vst [vmem:[%s769_s5 + $0x8] sm:$0xff] %v512_v11 }
 0x238   :  { %v592_v15 = vpop.eup %591  ;;  %v439_v16 = vmul.f32 %v590_v13, %v342_v12 }
 0x239   :  { %v440_v17 = vmul.f32 %v592_v15, %v344_v14 }
 0x23b   :  { %v513_v18 = vpack.c.bf16 %v440_v17, %v439_v16 }
 0x23d   :  { %463 = vst [vmem:[%s769_s5 + $0x10] sm:$0x11] %v513_v18 }

// kernel: model_forward.21
= control target key start
LH: loop header
LB: loop body
LE: loop exit
PB: predicated region body
PF: predicated region fallthrough
CT: control target
= control target key end

     0   :  { %v32_v5 = vlaneseq  ;;  %s543_s3 = inlined_call_operand.vmem [shape: bf16[256,128], index: 3, kind: input, shape index: {}]   ;;  %s544_s0 = inlined_call_operand.vmem [shape: f32[18,256], index: 0, kind: input, shape index: {}]   ;;  %s545_s1 = inlined_call_operand.vmem [shape: f32[1,256], index: 1, kind: input, shape index: {}]   ;;  %s546_s2 = inlined_call_operand.vmem [shape: f32[1,256], index: 2, kind: input, shape index: {}]   ;;  %s547_s4 = inlined_call_operand.vmem [shape: f32[1,128], index: 4, kind: input, shape index: {}]   ;;  %s548_s5 = inlined_call_operand.vmem [shape: f32[18,128], index: 5, kind: input, shape index: {}]   ;;  %s549_s6 = inlined_call_operand.vmem [shape: f32[18,128], index: 6, kind: output, shape index: {}]  }
   0x1   :  { %v375_v0 = vld [vmem:[%s543_s3 + $0x40] sm:$0xff]   ;;  %v377_v2 = vld [vmem:[%s543_s3 + $0x48] sm:$0xff]   ;;  %v379_v4 = vld [vmem:[%s543_s3 + $0x50] sm:$0xff]  }
   0x2   :  { %v376_v1 = vld [vmem:[%s543_s3] sm:$0xff]   ;;  %331 = vmatprep.subr.bf16.mxu0 %v375_v0  ;;  %359 = vmatprep.subr.bf16.mxu1 %v375_v0  ;;  %v378_v3 = vld [vmem:[%s543_s3 + $0x8] sm:$0xff]   ;;  %v380_v6 = vld [vmem:[%s543_s3 + $0x10] sm:$0xff]   ;;  %v33_v8 = vshrl.u32 %v32_v5, 7 }
   0x3   :  { %332 = vmatpush3.bf16.msra.mxu0 %v376_v1  ;;  %367 = vmatpush3.bf16.msra.mxu1 %v376_v1  ;;  %v381_v7 = vld [vmem:[%s543_s3 + $0x58] sm:$0xff]   ;;  %v383_v10 = vld [vmem:[%s543_s3 + $0x60] sm:$0xff]   ;;  %v385_v14 = vld [vmem:[%s543_s3 + $0x68] sm:$0xff]  }
   0x4   :  { %333 = vmatprep.subr.bf16.mxu0 %v377_v2  ;;  %360 = vmatprep.subr.bf16.mxu1 %v377_v2  ;;  %v382_v9 = vld [vmem:[%s543_s3 + $0x18] sm:$0xff]   ;;  %v34_v11 = vsub.s32 0, %v33_v8  ;;  %v38_v12 = vsub.s32 1, %v33_v8  ;;  %v384_v13 = vld [vmem:[%s543_s3 + $0x20] sm:$0xff]   ;;  %v25_v15 = vld [vmem:[%s544_s0 + $0x8] sm:$0xff] }
   0x5   :  { %v27_v16 = vld [vmem:[%s544_s0 + $0x18] sm:$0xff]  ;;  %v30_v17 = vld [vmem:[%s545_s1] sm:$0x3]  ;;  %v29_v21 = vld [vmem:[%s544_s0 + $0x28] sm:$0x3] }
   0x6   :  { %v35_v18 = vrot.slane %v30_v17, %v34_v11  ;;  %v39_v19 = vrot.slane %v30_v17, %v38_v12  ;;  %v48_v20 = vld [vmem:[%s546_s2] sm:$0x3]  ;;  %v26_v25 = vld [vmem:[%s544_s0 + $0x10] sm:$0xff]  ;;  %v386_v27 = vld [vmem:[%s543_s3 + $0x28] sm:$0xff]  }
   0x7   :  { %334 = vmatpush3.bf16.msra.mxu0 %v378_v3  ;;  %368 = vmatpush3.bf16.msra.mxu1 %v378_v3  ;;  %v24_v22 = vld [vmem:[%s544_s0] sm:$0xff]  ;;  %v53_v23 = vrot.slane %v48_v20, %v34_v11  ;;  %v57_v24 = vrot.slane %v48_v20, %v38_v12  ;;  %v387_v31 = vld [vmem:[%s543_s3 + $0x70] sm:$0xff]   ;;  %v389_v45 = vld [vmem:[%s543_s3 + $0x78] sm:$0xff]  }
   0x8   :  { %335 = vmatprep.subr.bf16.mxu0 %v379_v4  ;;  %361 = vmatprep.subr.bf16.mxu1 %v379_v4  ;;  %v28_v26 = vld [vmem:[%s544_s0 + $0x20] sm:$0x3]  ;;  %v43_v28 = vmul.f32 %v39_v19, %v25_v15  ;;  %v45_v29 = vmul.f32 %v39_v19, %v27_v16  ;;  %v47_v30 = vmul.f32 %v39_v19, %v29_v21  ;;  %v388_v38 = vld [vmem:[%s543_s3 + $0x30] sm:$0xff]   ;;  %v390_v49 = vld [vmem:[%s543_s3 + $0x38] sm:$0xff]  }
   0x9   :  { %v42_v32 = vmul.f32 %v35_v18, %v24_v22  ;;  %v44_v33 = vmul.f32 %v35_v18, %v26_v25  ;;  %v46_v34 = vmul.f32 %v35_v18, %v28_v26  ;;  %v314_v16 = vld [vmem:[%s547_s4] ss:$0 sm:$0xff]  ;;  %v297_v26 = vld [vmem:[%s548_s5 + $0x10] sm:$0x3] }
   0xa   :  { %v61_v35 = vadd.f32 %v57_v24, %v43_v28  ;;  %v63_v36 = vadd.f32 %v57_v24, %v45_v29  ;;  %v65_v37 = vadd.f32 %v57_v24, %v47_v30  ;;  %v295_v21 = vld [vmem:[%s548_s5] sm:$0xff]  ;;  %v296_v30 = vld [vmem:[%s548_s5 + $0x8] sm:$0xff] }
   0xb   :  { %336 = vmatpush3.bf16.msra.mxu0 %v380_v6  ;;  %369 = vmatpush3.bf16.msra.mxu1 %v380_v6  ;;  %v60_v39 = vadd.f32 %v53_v23, %v42_v32  ;;  %v62_v40 = vadd.f32 %v53_v23, %v44_v33  ;;  %v64_v41 = vadd.f32 %v53_v23, %v46_v34 }
   0xc   :  { %337 = vmatprep.subr.bf16.mxu0 %v381_v7  ;;  %362 = vmatprep.subr.bf16.mxu1 %v381_v7  ;;  %v309_v42 = vmul.f32 -1.442695, %v61_v35  ;;  %v311_v43 = vmul.f32 -1.442695, %v63_v36  ;;  %v313_v44 = vmul.f32 -1.442695, %v65_v37 }
   0xd   :  { %v308_v46 = vmul.f32 -1.442695, %v60_v39  ;;  %v310_v47 = vmul.f32 -1.442695, %v62_v40  ;;  %v312_v48 = vmul.f32 -1.442695, %v64_v41 }
   0xe   :  { %391 = vpow2.f32 %v309_v42 }
   0xf   :  { %338 = vmatpush3.bf16.msra.mxu0 %v382_v9  ;;  %370 = vmatpush3.bf16.msra.mxu1 %v382_v9  ;;  %393 = vpow2.f32 %v311_v43 }
  0x10   :  { %339 = vmatprep.subr.bf16.mxu0 %v383_v10  ;;  %363 = vmatprep.subr.bf16.mxu1 %v383_v10  ;;  %395 = vpow2.f32 %v313_v44 }
  0x11   :  { %397 = vpow2.f32 %v308_v46 }
  0x12   :  { %399 = vpow2.f32 %v310_v47 }
  0x13   :  { %340 = vmatpush3.bf16.msra.mxu0 %v384_v13  ;;  %371 = vmatpush3.bf16.msra.mxu1 %v384_v13  ;;  %401 = vpow2.f32 %v312_v48 }
  0x14   :  { %341 = vmatprep.subr.bf16.mxu0 %v385_v14  ;;  %364 = vmatprep.subr.bf16.mxu1 %v385_v14 }
  0x17   :  { %342 = vmatpush3.bf16.msra.mxu0 %v386_v27  ;;  %372 = vmatpush3.bf16.msra.mxu1 %v386_v27 }
  0x18   :  { %343 = vmatprep.subr.bf16.mxu0 %v387_v31  ;;  %365 = vmatprep.subr.bf16.mxu1 %v387_v31  ;;  %v392_v50 = vpop.eup %391 }
  0x19   :  { %v394_v51 = vpop.eup %393  ;;  %v85_v52 = vadd.f32 1.0, %v392_v50 }
  0x1a   :  { %v396_v53 = vpop.eup %395  ;;  %v87_v54 = vadd.f32 1.0, %v394_v51 }
  0x1b   :  { %344 = vmatpush3.bf16.msra.mxu0 %v388_v38  ;;  %373 = vmatpush3.bf16.msra.mxu1 %v388_v38  ;;  %v398_v55 = vpop.eup %397  ;;  %403 = vrcp.f32 %v85_v52  ;;  %v89_v56 = vadd.f32 1.0, %v396_v53 }
  0x1c   :  { %345 = vmatprep.subr.bf16.mxu0 %v389_v45  ;;  %366 = vmatprep.subr.bf16.mxu1 %v389_v45  ;;  %v400_v57 = vpop.eup %399  ;;  %405 = vrcp.f32 %v87_v54  ;;  %v84_v58 = vadd.f32 1.0, %v398_v55 }
  0x1d   :  { %v402_v59 = vpop.eup %401  ;;  %407 = vrcp.f32 %v89_v56  ;;  %v86_v60 = vadd.f32 1.0, %v400_v57 }
  0x1e   :  { %409 = vrcp.f32 %v84_v58  ;;  %v88_v61 = vadd.f32 1.0, %v402_v59 }
  0x1f   :  { %346 = vmatpush3.bf16.msra.mxu0 %v390_v49  ;;  %374 = vmatpush3.bf16.msra.mxu1 %v390_v49  ;;  %411 = vrcp.f32 %v86_v60 }
  0x20   :  { %413 = vrcp.f32 %v88_v61 }
  0x25   :  { %v404_v62 = vpop.eup %403 }
  0x26   :  { %v406_v63 = vpop.eup %405  ;;  %v103_v0 = vmul.f32 %v404_v62, %v61_v35 }
  0x27   :  { %v408_v1 = vpop.eup %407  ;;  %v105_v2 = vmul.f32 %v406_v63, %v63_v36 }
  0x28   :  { %v410_v3 = vpop.eup %409  ;;  %v107_v4 = vmul.f32 %v408_v1, %v65_v37 }
  0x29   :  { %v412_v5 = vpop.eup %411  ;;  %v109_v6 = vpack.c.bf16 %v105_v2, %v103_v0  ;;  %v102_v7 = vmul.f32 %v410_v3, %v60_v39 }
  0x2a   :  { %v414_v8 = vpop.eup %413  ;;  %v111_v9 = vpack.c.bf16 %v107_v4, %v107_v4  ;;  %v104_v10 = vmul.f32 %v412_v5, %v62_v40 }
  0x2b   :  { %279 = vmatprep.mubr.bf16.mxu0 %v109_v6  ;;  %v106_v11 = vmul.f32 %v414_v8, %v64_v41 }
  0x2c   :  { %287 = vmatprep.mubr.bf16.mxu1 %v111_v9  ;;  %v108_v12 = vpack.c.bf16 %v104_v10, %v102_v7 }
  0x2d   :  { %v110_v13 = vpack.c.bf16 %v106_v11, %v106_v11 }
  0x2e   :  { %280 = vmatmul.mubr.bf16.vlgmr.msra.gmra.mrb[0].mxu0 %v108_v12 }
  0x2f   :  { %288 = vmatmul.mubr.bf16.vlgmr.msra.gmra.mrb[0].mxu1 %v110_v13 }
 0x101   :  { %v347_v14 = vpop.f32.mrb[0].mxu0 }
 0x102   :  { %v353_v15 = vpop.f32.mrb[0].mxu1  ;;  %v348_v17 = vpop.f32.mrb[1].mxu0 }
 0x103   :  { %v349_v18 = vadd.f32 %v348_v17, %v347_v14  ;;  %v354_v19 = vpop.f32.mrb[1].mxu1  ;;  %v350_v20 = vpop.f32.mrb[2].mxu0 }
 0x104   :  { %v355_v22 = vadd.f32 %v354_v19, %v353_v15  ;;  %v356_v23 = vpop.f32.mrb[2].mxu1  ;;  %v351_v24 = vpop.f32.mrb[3].mxu0 }
 0x105   :  { %v282_v25 = vadd.f32 %v349_v18, %v314_v16  ;;  %v352_v27 = vadd.f32 %v351_v24, %v350_v20  ;;  %v357_v28 = vpop.f32.mrb[3].mxu1 }
 0x106   :  { %v290_v29 = vadd.f32 %v355_v22, %v314_v16 }
 0x107   :  { %v298_v31 = vadd.f32 %v295_v21, %v282_v25  ;;  %v285_v32 = vadd.f32 %v352_v27, %v314_v16 }
 0x108   :  { %v300_v33 = vadd.f32 %v297_v26, %v290_v29 }
 0x109   :  { %301 = vst [vmem:[%s549_s6] sm:$0xff] %v298_v31  ;;  %v299_v34 = vadd.f32 %v296_v30, %v285_v32 }
 0x10a   :  { %303 = vst [vmem:[%s549_s6 + $0x10] sm:$0x3] %v300_v33 }
 0x10b   :  { %302 = vst [vmem:[%s549_s6 + $0x8] sm:$0xff] %v299_v34 }

// kernel: model_forward.22
= control target key start
LH: loop header
LB: loop body
LE: loop exit
PB: predicated region body
PF: predicated region fallthrough
CT: control target
= control target key end

     0   :  { %vm28_vm0 = vcmask 1041408   ;;  %v694_v43 = vmov 0   ;;  %s922_s0 = inlined_call_operand.vmem [shape: f32[18,128], index: 0, kind: input, shape index: {}]   ;;  %s923_s3 = inlined_call_operand.vmem [shape: bf16[128,512], index: 3, kind: input, shape index: {}]   ;;  %s924_s1 = inlined_call_operand.vmem [shape: f32[1,128], index: 1, kind: input, shape index: {}]   ;;  %s925_s2 = inlined_call_operand.vmem [shape: f32[1,128], index: 2, kind: input, shape index: {}]   ;;  %s926_s4 = inlined_call_operand.vmem [shape: f32[1,512], index: 4, kind: input, shape index: {}]   ;;  %s927_s5 = inlined_call_operand.vmem [shape: bf16[18,512], index: 5, kind: output, shape index: {}]  }
   0x1   :  { %v21_v0 = vld [vmem:[%s922_s0] sm:$0xff]  ;;  %v23_v1 = vld [vmem:[%s922_s0 + $0x10] sm:$0x3]  ;;  %v22_v3 = vld [vmem:[%s922_s0 + $0x8] sm:$0xff]  ;;  %329 = vmatprep.mubr.bf16.mxu0 %v694_v43  ;;  %380 = vmatprep.mubr.bf16.mxu1 %v694_v43 }
   0x2   :  { %24 = vadd.xlane.f32.xlu0 %v21_v0  ;;  %v29_v2 = vsel %vm28_vm0, %v23_v1, 0.0  ;;  %v592_v4 = vld [vmem:[%s923_s3 + $0x4] ss:$16 sps:$4 sm:$0xff]   ;;  %v594_v5 = vld [vmem:[%s923_s3 + $0xc] ss:$16 sps:$4 sm:$0xff]  }
   0x3   :  { %30 = vadd.xlane.f32.xlu1 %v29_v2  ;;  %297 = vmatprep.subr.bf16.mxu0 %v592_v4  ;;  %v596_v6 = vld [vmem:[%s923_s3] ss:$16 sps:$4 sm:$0xff]   ;;  %v597_v7 = vld [vmem:[%s923_s3 + $0x8] ss:$16 sps:$4 sm:$0xff]   ;;  %v598_v8 = vld [vmem:[%s923_s3 + $0x24] ss:$16 sps:$4 sm:$0xff]  }
   0x4   :  { %348 = vmatprep.subr.bf16.mxu1 %v594_v5  ;;  %298 = vmatpush1.bf16.msra.mxu0 %v596_v6  ;;  %v600_v9 = vld [vmem:[%s923_s3 + $0x2c] ss:$16 sps:$4 sm:$0xff]   ;;  %v602_v23 = vld [vmem:[%s923_s3 + $0x20] ss:$16 sps:$4 sm:$0xff]   ;;  %v603_v24 = vld [vmem:[%s923_s3 + $0x28] ss:$16 sps:$4 sm:$0xff]  }
   0x5   :  { %349 = vmatpush1.bf16.msra.mxu1 %v597_v7  ;;  %299 = vmatprep.subr.bf16.mxu0 %v598_v8  ;;  %v604_v25 = vld [vmem:[%s923_s3 + $0x44] ss:$16 sps:$4 sm:$0xff]   ;;  %v606_v26 = vld [vmem:[%s923_s3 + $0x4c] ss:$16 sps:$4 sm:$0xff]   ;;  %v608_v27 = vld [vmem:[%s923_s3 + $0x40] ss:$16 sps:$4 sm:$0xff]  }
   0x6   :  { %26 = vadd.xlane.f32.xlu0 %v22_v3  ;;  %350 = vmatprep.subr.bf16.mxu1 %v600_v9  ;;  %v609_v28 = vld [vmem:[%s923_s3 + $0x48] ss:$16 sps:$4 sm:$0xff]   ;;  %v610_v29 = vld [vmem:[%s923_s3 + $0x64] ss:$16 sps:$4 sm:$0xff]   ;;  %v612_v30 = vld [vmem:[%s923_s3 + $0x6c] ss:$16 sps:$4 sm:$0xff]  }
   0x7   :  { %v614_v31 = vld [vmem:[%s923_s3 + $0x60] ss:$16 sps:$4 sm:$0xff]   ;;  %v615_v32 = vld [vmem:[%s923_s3 + $0x68] ss:$16 sps:$4 sm:$0xff]   ;;  %v616_v33 = vld [vmem:[%s923_s3 + $0x84] ss:$16 sps:$4 sm:$0xff]  }
   0x8   :  { %300 = vmatpush1.bf16.msra.mxu0 %v602_v23  ;;  %v618_v34 = vld [vmem:[%s923_s3 + $0x8c] ss:$16 sps:$4 sm:$0xff]   ;;  %v620_v35 = vld [vmem:[%s923_s3 + $0x80] ss:$16 sps:$4 sm:$0xff]   ;;  %v621_v36 = vld [vmem:[%s923_s3 + $0x88] ss:$16 sps:$4 sm:$0xff]  }
   0x9   :  { %351 = vmatpush1.bf16.msra.mxu1 %v603_v24  ;;  %301 = vmatprep.subr.bf16.mxu0 %v604_v25  ;;  %v622_v37 = vld [vmem:[%s923_s3 + $0xa4] ss:$16 sps:$4 sm:$0xff]   ;;  %v624_v38 = vld [vmem:[%s923_s3 + $0xac] ss:$16 sps:$4 sm:$0xff]   ;;  %v626_v39 = vld [vmem:[%s923_s3 + $0xa0] ss:$16 sps:$4 sm:$0xff]  }
   0xa   :  { %352 = vmatprep.subr.bf16.mxu1 %v606_v26  ;;  %v627_v40 = vld [vmem:[%s923_s3 + $0xa8] ss:$16 sps:$4 sm:$0xff]   ;;  %v628_v41 = vld [vmem:[%s923_s3 + $0xc4] ss:$16 sps:$4 sm:$0xff]   ;;  %v630_v42 = vld [vmem:[%s923_s3 + $0xcc] ss:$16 sps:$4 sm:$0xff]  }
   0xb   :  { %v632_v44 = vld [vmem:[%s923_s3 + $0xc0] ss:$16 sps:$4 sm:$0xff]   ;;  %v633_v45 = vld [vmem:[%s923_s3 + $0xc8] ss:$16 sps:$4 sm:$0xff]   ;;  %v634_v46 = vld [vmem:[%s923_s3 + $0xe4] ss:$16 sps:$4 sm:$0xff]  }
   0xc   :  { %302 = vmatpush1.bf16.msra.mxu0 %v608_v27  ;;  %v636_v47 = vld [vmem:[%s923_s3 + $0xec] ss:$16 sps:$4 sm:$0xff]   ;;  %v638_v48 = vld [vmem:[%s923_s3 + $0xe0] ss:$16 sps:$4 sm:$0xff]   ;;  %v639_v49 = vld [vmem:[%s923_s3 + $0xe8] ss:$16 sps:$4 sm:$0xff]  }
   0xd   :  { %353 = vmatpush1.bf16.msra.mxu1 %v609_v28  ;;  %303 = vmatprep.subr.bf16.mxu0 %v610_v29  ;;  %v533_v61 = vld [vmem:[%s924_s1] ss:$0 sm:$0xff] }
   0xe   :  { %354 = vmatprep.subr.bf16.mxu1 %v612_v30  ;;  %v534_v2 = vld [vmem:[%s925_s2] ss:$0 sm:$0xff] }
  0x10   :  { %304 = vmatpush1.bf16.msra.mxu0 %v614_v31 }
  0x11   :  { %355 = vmatpush1.bf16.msra.mxu1 %v615_v32  ;;  %305 = vmatprep.subr.bf16.mxu0 %v616_v33 }
  0x12   :  { %356 = vmatprep.subr.bf16.mxu1 %v618_v34 }
  0x14   :  { %306 = vmatpush1.bf16.msra.mxu0 %v620_v35 }
  0x15   :  { %357 = vmatpush1.bf16.msra.mxu1 %v621_v36  ;;  %307 = vmatprep.subr.bf16.mxu0 %v622_v37 }
  0x16   :  { %358 = vmatprep.subr.bf16.mxu1 %v624_v38 }
  0x18   :  { %308 = vmatpush1.bf16.msra.mxu0 %v626_v39 }
  0x19   :  { %359 = vmatpush1.bf16.msra.mxu1 %v627_v40  ;;  %309 = vmatprep.subr.bf16.mxu0 %v628_v41 }
  0x1a   :  { %360 = vmatprep.subr.bf16.mxu1 %v630_v42 }
  0x1c   :  { %310 = vmatpush1.bf16.msra.mxu0 %v632_v44 }
  0x1d   :  { %361 = vmatpush1.bf16.msra.mxu1 %v633_v45  ;;  %311 = vmatprep.subr.bf16.mxu0 %v634_v46 }
  0x1e   :  { %362 = vmatprep.subr.bf16.mxu1 %v636_v47 }
  0x20   :  { %312 = vmatpush1.bf16.msra.mxu0 %v638_v48 }
  0x21   :  { %363 = vmatpush1.bf16.msra.mxu1 %v639_v49 }
  0x8f   :  { %v25_v10 = vpop.xlane.xlu0 %24 }
  0x90   :  { %v33_v11 = vmul.f32 0.0078125, %v25_v10  ;;  %v31_v12 = vpop.xlane.xlu1 %30 }
  0x91   :  { %v35_v13 = vmul.f32 0.0078125, %v31_v12 }
  0x92   :  { %v753_v14 = vsub.f32 %v21_v0, %v33_v11  ;;  %v117_v11 = vlaneseq }
  0x93   :  { %v755_v15 = vsub.f32 %v23_v1, %v35_v13  ;;  %v27_v16 = vpop.xlane.xlu0 %26 }
  0x94   :  { %v34_v17 = vmul.f32 0.0078125, %v27_v16  ;;  %v39_v18 = vmul.f32 %v753_v14, %v753_v14  ;;  %v118_v12 = vshrl.u32 %v117_v11, 7 }
  0x95   :  { %v41_v19 = vmul.f32 %v755_v15, %v755_v15 }
  0x96   :  { %v761_v20 = vsub.f32 %v22_v3, %v34_v17  ;;  %42 = vadd.xlane.f32.xlu1 %v39_v18  ;;  %v119_v13 = vsub.s32 0, %v118_v12  ;;  %v123_v16 = vsub.s32 1, %v118_v12  ;;  %v131_v17 = vsub.s32 3, %v118_v12 }
  0x97   :  { %v46_v21 = vsel %vm28_vm0, %v41_v19, 0.0 }
  0x98   :  { %v40_v22 = vmul.f32 %v761_v20, %v761_v20 }
  0x9a   :  { %47 = vadd.xlane.f32.xlu1 %v46_v21  ;;  %44 = vadd.xlane.f32.xlu0 %v40_v22 }
 0x123   :  { %v43_v50 = vpop.xlane.xlu1 %42 }
 0x124   :  { %v49_v51 = vmul.f32 0.0078125, %v43_v50 }
 0x126   :  { %v52_v52 = vadd.f32 1e-05, %v49_v51 }
 0x127   :  { %v48_v53 = vpop.xlane.xlu1 %47  ;;  %v45_v54 = vpop.xlane.xlu0 %44 }
 0x128   :  { %640 = vrsqrt.f32 %v52_v52  ;;  %v51_v55 = vmul.f32 0.0078125, %v48_v53  ;;  %v50_v56 = vmul.f32 0.0078125, %v45_v54 }
 0x12a   :  { %v54_v57 = vadd.f32 1e-05, %v51_v55  ;;  %v53_v58 = vadd.f32 1e-05, %v50_v56 }
 0x12c   :  { %642 = vrsqrt.f32 %v54_v57 }
 0x12d   :  { %644 = vrsqrt.f32 %v53_v58 }
 0x132   :  { %v641_v59 = vpop.eup %640 }
 0x133   :  { %v58_v60 = vmul.f32 %v641_v59, %v753_v14  ;;  %v127_v14 = vsub.s32 2, %v118_v12 }
 0x135   :  { %v68_v1 = vmul.f32 %v533_v61, %v58_v60 }
 0x136   :  { %v643_v62 = vpop.eup %642 }
 0x137   :  { %v645_v63 = vpop.eup %644  ;;  %v60_v4 = vmul.f32 %v643_v62, %v755_v15  ;;  %v78_v5 = vadd.f32 %v534_v2, %v68_v1  ;;  %v115_v15 = vld [vmem:[%s926_s4] sm:$0xf] }
 0x138   :  { %v59_v0 = vmul.f32 %v645_v63, %v761_v20  ;;  %v120_v18 = vrot.slane %v115_v15, %v119_v13  ;;  %v128_v19 = vrot.slane %v115_v15, %v127_v14  ;;  %v124_v20 = vrot.slane %v115_v15, %v123_v16 }
 0x139   :  { %v70_v8 = vmul.f32 %v533_v61, %v60_v4  ;;  %v132_v21 = vrot.slane %v115_v15, %v131_v17 }
 0x13a   :  { %v69_v3 = vmul.f32 %v533_v61, %v59_v0 }
 0x13b   :  { %v80_v9 = vadd.f32 %v534_v2, %v70_v8 }
 0x13c   :  { %v79_v6 = vadd.f32 %v534_v2, %v69_v3 }
 0x13d   :  { %v82_v10 = vpack.c.bf16 %v80_v9, %v80_v9 }
 0x13e   :  { %v81_v7 = vpack.c.bf16 %v79_v6, %v78_v5 }
 0x140   :  { %330 = vmatmul.mubr.bf16.vlgmr.msra.gmra.mrb[0].mxu0 %v81_v7  ;;  %381 = vmatmul.mubr.bf16.vlgmr.msra.gmra.mrb[0].mxu1 %v81_v7 }
 0x141   :  { %339 = vmatprep.mubr.bf16.mxu0 %v694_v43  ;;  %390 = vmatprep.mubr.bf16.mxu1 %v694_v43 }
 0x148   :  { %340 = vmatmul.mubr.bf16.gmra.mrb[4].mxu0 %v82_v10  ;;  %391 = vmatmul.mubr.bf16.gmra.mrb[4].mxu1 %v82_v10 }
 0x213   :  { %v331_v22 = vpop.f32.mrb[0].mxu0  ;;  %v382_v23 = vpop.f32.mrb[0].mxu1 }
 0x214   :  { %v856_v24 = vadd.f32 %v331_v22, %v120_v18  ;;  %v858_v25 = vadd.f32 %v382_v23, %v128_v19  ;;  %v333_v26 = vpop.f32.mrb[1].mxu0  ;;  %v384_v27 = vpop.f32.mrb[1].mxu1 }
 0x215   :  { %v860_v28 = vadd.f32 %v333_v26, %v124_v20  ;;  %v862_v29 = vadd.f32 %v384_v27, %v132_v21  ;;  %v335_v30 = vpop.f32.mrb[2].mxu0  ;;  %v386_v31 = vpop.f32.mrb[2].mxu1 }
 0x216   :  { %v567_v32 = vmul.f32 -1.442695, %v856_v24  ;;  %v569_v33 = vmul.f32 -1.442695, %v858_v25  ;;  %v866_v34 = vadd.f32 %v335_v30, %v120_v18  ;;  %v868_v35 = vadd.f32 %v386_v31, %v128_v19  ;;  %v337_v36 = vpop.f32.mrb[3].mxu0  ;;  %v388_v37 = vpop.f32.mrb[3].mxu1 }
 0x217   :  { %v568_v38 = vmul.f32 -1.442695, %v860_v28  ;;  %v570_v39 = vmul.f32 -1.442695, %v862_v29  ;;  %v872_v40 = vadd.f32 %v337_v36, %v124_v20  ;;  %v874_v41 = vadd.f32 %v388_v37, %v132_v21 }
 0x218   :  { %646 = vpow2.f32 %v567_v32  ;;  %v571_v42 = vmul.f32 -1.442695, %v866_v34  ;;  %v573_v43 = vmul.f32 -1.442695, %v868_v35 }
 0x219   :  { %648 = vpow2.f32 %v569_v33  ;;  %v572_v44 = vmul.f32 -1.442695, %v872_v40  ;;  %v574_v45 = vmul.f32 -1.442695, %v874_v41 }
 0x21a   :  { %650 = vpow2.f32 %v568_v38 }
 0x21b   :  { %652 = vpow2.f32 %v570_v39  ;;  %v341_v46 = vpop.f32.mrb[4].mxu0  ;;  %v392_v47 = vpop.f32.mrb[4].mxu1 }
 0x21c   :  { %654 = vpow2.f32 %v571_v42  ;;  %v880_v48 = vadd.f32 %v341_v46, %v120_v18  ;;  %v882_v49 = vadd.f32 %v392_v47, %v128_v19  ;;  %v343_v50 = vpop.f32.mrb[5].mxu0  ;;  %v394_v51 = vpop.f32.mrb[5].mxu1 }
 0x21d   :  { %656 = vpow2.f32 %v573_v43  ;;  %v884_v52 = vadd.f32 %v343_v50, %v124_v20  ;;  %v886_v53 = vadd.f32 %v394_v51, %v132_v21  ;;  %v345_v54 = vpop.f32.mrb[6].mxu0  ;;  %v396_v55 = vpop.f32.mrb[6].mxu1 }
 0x21e   :  { %658 = vpow2.f32 %v572_v44  ;;  %v575_v56 = vmul.f32 -1.442695, %v880_v48  ;;  %v577_v57 = vmul.f32 -1.442695, %v882_v49  ;;  %v346_v58 = vpop.f32.mrb[7].mxu0  ;;  %v397_v59 = vpop.f32.mrb[7].mxu1 }
 0x21f   :  { %660 = vpow2.f32 %v574_v45  ;;  %v576_v60 = vmul.f32 -1.442695, %v884_v52  ;;  %v578_v61 = vmul.f32 -1.442695, %v886_v53 }
 0x220   :  { %662 = vpow2.f32 %v575_v56 }
 0x221   :  { %664 = vpow2.f32 %v577_v57 }
 0x222   :  { %v647_v62 = vpop.eup %646  ;;  %666 = vpow2.f32 %v576_v60 }
 0x223   :  { %v649_v63 = vpop.eup %648  ;;  %v435_v0 = vadd.f32 1.0, %v647_v62  ;;  %668 = vpow2.f32 %v578_v61 }
 0x224   :  { %v651_v1 = vpop.eup %650  ;;  %v437_v2 = vadd.f32 1.0, %v649_v63 }
 0x225   :  { %v653_v3 = vpop.eup %652  ;;  %670 = vrcp.f32 %v435_v0  ;;  %v436_v4 = vadd.f32 1.0, %v651_v1 }
 0x226   :  { %v655_v5 = vpop.eup %654  ;;  %672 = vrcp.f32 %v437_v2  ;;  %v438_v6 = vadd.f32 1.0, %v653_v3 }
 0x227   :  { %v657_v7 = vpop.eup %656  ;;  %674 = vrcp.f32 %v436_v4  ;;  %v439_v8 = vadd.f32 1.0, %v655_v5 }
 0x228   :  { %v659_v9 = vpop.eup %658  ;;  %676 = vrcp.f32 %v438_v6  ;;  %v441_v10 = vadd.f32 1.0, %v657_v7 }
 0x229   :  { %v661_v11 = vpop.eup %660  ;;  %678 = vrcp.f32 %v439_v8  ;;  %v440_v12 = vadd.f32 1.0, %v659_v9 }
 0x22a   :  { %v663_v13 = vpop.eup %662  ;;  %680 = vrcp.f32 %v441_v10  ;;  %v442_v14 = vadd.f32 1.0, %v661_v11 }
 0x22b   :  { %v665_v15 = vpop.eup %664  ;;  %682 = vrcp.f32 %v440_v12  ;;  %v443_v16 = vadd.f32 1.0, %v663_v13 }
 0x22c   :  { %v667_v17 = vpop.eup %666  ;;  %684 = vrcp.f32 %v442_v14  ;;  %v445_v18 = vadd.f32 1.0, %v665_v15 }
 0x22d   :  { %v669_v19 = vpop.eup %668  ;;  %686 = vrcp.f32 %v443_v16  ;;  %v444_v20 = vadd.f32 1.0, %v667_v17 }
 0x22e   :  { %688 = vrcp.f32 %v445_v18  ;;  %v446_v21 = vadd.f32 1.0, %v669_v19 }
 0x22f   :  { %v671_v22 = vpop.eup %670  ;;  %690 = vrcp.f32 %v444_v20 }
 0x230   :  { %v673_v23 = vpop.eup %672  ;;  %v471_v26 = vmul.f32 %v671_v22, %v856_v24  ;;  %692 = vrcp.f32 %v446_v21 }
 0x231   :  { %v675_v27 = vpop.eup %674  ;;  %v473_v30 = vmul.f32 %v673_v23, %v858_v25 }
 0x232   :  { %v677_v31 = vpop.eup %676  ;;  %v472_v32 = vmul.f32 %v675_v27, %v860_v28 }
 0x233   :  { %v679_v33 = vpop.eup %678  ;;  %v474_v36 = vmul.f32 %v677_v31, %v862_v29 }
 0x234   :  { %v681_v37 = vpop.eup %680  ;;  %v585_v38 = vpack.c.bf16 %v472_v32, %v471_v26  ;;  %v475_v39 = vmul.f32 %v679_v33, %v866_v34 }
 0x235   :  { %v683_v42 = vpop.eup %682  ;;  %v586_v43 = vpack.c.bf16 %v474_v36, %v473_v30  ;;  %v477_v44 = vmul.f32 %v681_v37, %v868_v35 }
 0x236   :  { %v685_v45 = vpop.eup %684  ;;  %523 = vst [vmem:[%s927_s5] sm:$0xff] %v585_v38  ;;  %v476_v24 = vmul.f32 %v683_v42, %v872_v40 }
 0x237   :  { %v687_v25 = vpop.eup %686  ;;  %524 = vst [vmem:[%s927_s5 + $0x8] sm:$0xff] %v586_v43  ;;  %v478_v28 = vmul.f32 %v685_v45, %v874_v41 }
 0x238   :  { %v689_v29 = vpop.eup %688  ;;  %v587_v34 = vpack.c.bf16 %v476_v24, %v475_v39  ;;  %v479_v46 = vmul.f32 %v687_v25, %v880_v48 }
 0x239   :  { %v691_v47 = vpop.eup %690  ;;  %v588_v35 = vpack.c.bf16 %v478_v28, %v477_v44  ;;  %v481_v50 = vmul.f32 %v689_v29, %v882_v49 }
 0x23a   :  { %v693_v51 = vpop.eup %692  ;;  %525 = vst [vmem:[%s927_s5 + $0x10] sm:$0xff] %v587_v34  ;;  %v480_v40 = vmul.f32 %v691_v47, %v884_v52 }
 0x23b   :  { %526 = vst [vmem:[%s927_s5 + $0x18] sm:$0xff] %v588_v35  ;;  %v482_v41 = vmul.f32 %v693_v51, %v886_v53 }
 0x23c   :  { %v589_v54 = vpack.c.bf16 %v480_v40, %v479_v46 }
 0x23d   :  { %v590_v55 = vpack.c.bf16 %v482_v41, %v481_v50 }
 0x23e   :  { %527 = vst [vmem:[%s927_s5 + $0x20] sm:$0x11] %v589_v54 }
 0x23f   :  { %528 = vst [vmem:[%s927_s5 + $0x28] sm:$0x11] %v590_v55 }

// kernel: model_forward.20
= control target key start
LH: loop header
LB: loop body
LE: loop exit
PB: predicated region body
PF: predicated region fallthrough
CT: control target
= control target key end

     0   :  { %s988_s15 = smov 0   ;;  %s1225_s0 = inlined_call_operand.vmem [shape: bf16[2,24,256], index: 0, kind: input, shape index: {}]   ;;  %s1226_s1 = inlined_call_operand.vmem [shape: f32[16,256], index: 1, kind: input, shape index: {}]   ;;  %s1227_s2 = inlined_call_operand.vmem [shape: f32[1,256], index: 2, kind: input, shape index: {}]   ;;  %s1228_s3 = inlined_call_operand.vmem [shape: f32[2,9,256], index: 3, kind: output, shape index: {0}]   ;;  %s1229_s4 = inlined_call_operand.vmem [shape: f32[2,2,256], index: 4, kind: output, shape index: {1}]  }
   0x1 LB: > { %s916_s16 = sadd.s32 4294967295, %s961_s15   ;;  %p920_p0 = scmp.ge.s32.totalorder %s961_s15, 1  ;;  %s961_s15 = sphi %s988_s15, %s15_s15  }
   0x2   : > { %p165_p1 = scmp.lt.s32.totalorder %s961_s15, 3 }
   0x4   : > { %p166_p2 = pnand %p920_p0, %p165_p1 }
   0x5   : > { %p196_p3 = scmp.lt.s32.totalorder (!%p166_p2), %s916_s16, 1  ;;  %v220_v0 = vlaneseq (!%p166_p2)  ;;  %v218_v1 = vld [vmem:[%s1226_s1] ss:$8 sm:$0x3] (!%p166_p2)  ;;  %vm259_vm0 = vcmask (!%p166_p2), 1046528   ;;  %vm295_vm1 = vcmask (!%p166_p2), 1045504  }
   0x6   : > { %169 = sbr.rel (%p166_p2) target bundleno = 104 (0x68), region = 32  ;;  %v926_v3 = vld [vmem:[%s1226_s1 + $0x1] ss:$8 sm:$0x3] (!%p166_p2)  ;;  %vm331_vm2 = vcmask (!%p166_p2), 1044480   ;;  %vm367_vm3 = vcmask (!%p166_p2), 1043456  }
   0x7   : > { %v221_v2 = vshrl.u32 (!%p166_p2), %v220_v0, 7  ;;  %v927_v4 = vld [vmem:[%s1226_s1 + $0x2] ss:$8 sm:$0x3] (!%p166_p2)  ;;  %vm403_vm4 = vcmask (!%p166_p2), 1042432   ;;  %vm439_vm5 = vcmask (!%p166_p2), 1041408  }
   0x8   : > { %v928_v7 = vld [vmem:[%s1226_s1 + $0x3] ss:$8 sm:$0x3] (!%p166_p2)  ;;  %v929_v12 = vld [vmem:[%s1226_s1 + $0x4] ss:$8 sm:$0x3] (!%p166_p2) }
   0x9   : > { %v1008_v5 = vsub.s32 (!%p166_p2), 0, %v221_v2  ;;  %v1010_v6 = vsub.s32 (!%p166_p2), 1, %v221_v2  ;;  %v930_v13 = vld [vmem:[%s1226_s1 + $0x5] ss:$8 sm:$0x3] (!%p166_p2)  ;;  %vm475_vm6 = vcmask (!%p166_p2), 1040384  }
   0xb   : > { %v223_v8 = vrot.slane (!%p166_p2), %v218_v1, %v1008_v5  ;;  %v227_v9 = vrot.slane (!%p166_p2), %v218_v1, %v1010_v6  ;;  %v244_v10 = vrot.slane (!%p166_p2), %v926_v3, %v1008_v5  ;;  %v248_v11 = vrot.slane (!%p166_p2), %v926_v3, %v1010_v6 }
   0xc   : > { %v280_v16 = vrot.slane (!%p166_p2), %v927_v4, %v1008_v5  ;;  %v284_v17 = vrot.slane (!%p166_p2), %v927_v4, %v1010_v6  ;;  %v316_v18 = vrot.slane (!%p166_p2), %v928_v7, %v1008_v5  ;;  %v320_v19 = vrot.slane (!%p166_p2), %v928_v7, %v1010_v6 }
   0xd   : > { %s1231_s16 = smov (!%p196_p3, %s916_s16), 1  ;;  %v352_v24 = vrot.slane %v929_v12, %v1008_v5  ;;  %v356_v25 = vrot.slane %v929_v12, %v1010_v6  ;;  %v1047_v26 = vrot.slane %v930_v13, %v1008_v5  ;;  %v1050_v27 = vrot.slane %v930_v13, %v1010_v6 }
   0xe   : > { %s946_s23 = smul.u32 24, %s1231_s16  ;;  %s944_s5 = sshll.u32 %s1231_s16, 5 }
   0xf   : > { %s205_s8 = scalar_lea.vmem %s1228_s3, %s944_s5  ;;  %s945_s9 = sshll.u32 %s1231_s16, 2 }
  0x10   : > { %s1018_s28 = scalar_lea.vmem %s1225_s0, %s946_s23  ;;  %s210_s12 = scalar_lea.vmem %s1229_s4, %s945_s9 }
  0x11   : > { %v211_v14 = vld [vmem:[%s1018_s28] sm:$0xff]  ;;  %v212_v15 = vld [vmem:[%s1018_s28 + $0x8] sm:$0xff] }
  0x12   : > { %v1036_v20 = vunpack.c.l.bf16 %v211_v14  ;;  %v1038_v21 = vunpack.c.h.bf16 %v211_v14  ;;  %v1040_v22 = vunpack.c.l.bf16 %v212_v15  ;;  %v1042_v23 = vunpack.c.h.bf16 %v212_v15 }
  0x14   : > { %v230_v28 = vmul.f32 %v223_v8, %v1036_v20  ;;  %v231_v29 = vmul.f32 %v227_v9, %v1038_v21  ;;  %v232_v30 = vmul.f32 %v223_v8, %v1040_v22  ;;  %v233_v31 = vmul.f32 %v227_v9, %v1042_v23 }
  0x15   : > { %v251_v32 = vmul.f32 %v244_v10, %v1036_v20  ;;  %v252_v33 = vmul.f32 %v248_v11, %v1038_v21  ;;  %v253_v34 = vmul.f32 %v244_v10, %v1040_v22  ;;  %v254_v35 = vmul.f32 %v248_v11, %v1042_v23 }
  0x16   : > { %v287_v36 = vmul.f32 %v280_v16, %v1036_v20  ;;  %v288_v37 = vmul.f32 %v284_v17, %v1038_v21  ;;  %v289_v38 = vmul.f32 %v280_v16, %v1040_v22  ;;  %v290_v39 = vmul.f32 %v284_v17, %v1042_v23 }
  0x17   : > { %v260_v40 = vrot.slane %v251_v32, 1  ;;  %v261_v41 = vrot.slane %v253_v34, 1  ;;  %v263_v42 = vrot.slane %v252_v33, 1  ;;  %v264_v43 = vrot.slane %v254_v35, 1 }
  0x18   : > { %v296_v44 = vrot.slane %v287_v36, 2  ;;  %v297_v45 = vrot.slane %v289_v38, 2  ;;  %v299_v46 = vrot.slane %v288_v37, 2  ;;  %v300_v47 = vrot.slane %v290_v39, 2 }
  0x19   : > { %v262_v48 = vsel %vm259_vm0, %v260_v40, %v261_v41  ;;  %v265_v49 = vsel %vm259_vm0, %v263_v42, %v264_v43  ;;  %v272_v50 = vadd.f32 %v261_v41, %v232_v30  ;;  %v273_v51 = vadd.f32 %v264_v43, %v233_v31  ;;  %v932_v33 = vld [vmem:[%s1226_s1 + $0x7] ss:$8 sm:$0x3] }
  0x1a   : > { %v270_v52 = vadd.f32 %v262_v48, %v230_v28  ;;  %v271_v53 = vadd.f32 %v265_v49, %v231_v29  ;;  %v298_v54 = vsel %vm295_vm1, %v296_v44, %v297_v45  ;;  %v301_v55 = vsel %vm295_vm1, %v299_v46, %v300_v47 }
  0x1b   : > { %v308_v56 = vadd.f32 %v297_v45, %v272_v50  ;;  %v309_v57 = vadd.f32 %v300_v47, %v273_v51  ;;  %v323_v58 = vmul.f32 %v316_v18, %v1036_v20  ;;  %v324_v59 = vmul.f32 %v320_v19, %v1038_v21 }
  0x1c   : > { %v306_v60 = vadd.f32 %v298_v54, %v270_v52  ;;  %v307_v61 = vadd.f32 %v301_v55, %v271_v53  ;;  %v325_v62 = vmul.f32 %v316_v18, %v1040_v22  ;;  %v326_v63 = vmul.f32 %v320_v19, %v1042_v23  ;;  %v213_v52 = vld [vmem:[%s1018_s28 + $0x10] sm:$0xff] }
  0x1d   : > { %v332_v0 = vrot.slane %v323_v58, 3  ;;  %v335_v1 = vrot.slane %v324_v59, 3  ;;  %v359_v2 = vmul.f32 %v352_v24, %v1036_v20  ;;  %v360_v3 = vmul.f32 %v356_v25, %v1038_v21 }
  0x1e   : > { %v333_v4 = vrot.slane %v325_v62, 3  ;;  %v336_v7 = vrot.slane %v326_v63, 3  ;;  %v361_v8 = vmul.f32 %v352_v24, %v1040_v22  ;;  %v362_v9 = vmul.f32 %v356_v25, %v1042_v23  ;;  %v931_v25 = vld [vmem:[%s1226_s1 + $0x6] ss:$8 sm:$0x3] }
  0x1f   : > { %v368_v10 = vrot.slane %v359_v2, 4  ;;  %v371_v11 = vrot.slane %v360_v3, 4  ;;  %v395_v12 = vmul.f32 %v1047_v26, %v1036_v20  ;;  %v396_v13 = vmul.f32 %v1050_v27, %v1038_v21 }
  0x20   : > { %v334_v14 = vsel %vm331_vm2, %v332_v0, %v333_v4  ;;  %v337_v15 = vsel %vm331_vm2, %v335_v1, %v336_v7  ;;  %v344_v16 = vadd.f32 %v333_v4, %v308_v56  ;;  %v345_v17 = vadd.f32 %v336_v7, %v309_v57 }
  0x21   : > { %v342_v18 = vadd.f32 %v334_v14, %v306_v60  ;;  %v343_v19 = vadd.f32 %v337_v15, %v307_v61  ;;  %v369_v28 = vrot.slane %v361_v8, 4  ;;  %v372_v24 = vrot.slane %v362_v9, 4 }
  0x22   : > { %v397_v29 = vmul.f32 %v1047_v26, %v1040_v22  ;;  %v398_v30 = vmul.f32 %v1050_v27, %v1042_v23  ;;  %v404_v31 = vrot.slane %v395_v12, 5  ;;  %v407_v32 = vrot.slane %v396_v13, 5 }
  0x23   : > { %v370_v34 = vsel %vm367_vm3, %v368_v10, %v369_v28  ;;  %v373_v35 = vsel %vm367_vm3, %v371_v11, %v372_v24  ;;  %v380_v36 = vadd.f32 %v369_v28, %v344_v16  ;;  %v381_v37 = vadd.f32 %v372_v24, %v345_v17  ;;  %v934_v10 = vld [vmem:[%s1226_s1 + $0x11] ss:$8 sm:$0x3] }
  0x24   : > { %v378_v38 = vadd.f32 %v370_v34, %v342_v18  ;;  %v379_v39 = vadd.f32 %v373_v35, %v343_v19  ;;  %v405_v26 = vrot.slane %v397_v29, 5  ;;  %v408_v40 = vrot.slane %v398_v30, 5 }
  0x25   : > { %v424_v27 = vrot.slane %v931_v25, %v1008_v5  ;;  %v428_v41 = vrot.slane %v931_v25, %v1010_v6  ;;  %v460_v42 = vrot.slane %v932_v33, %v1008_v5  ;;  %v464_v43 = vrot.slane %v932_v33, %v1010_v6 }
  0x26   : > { %v406_v44 = vsel %vm403_vm4, %v404_v31, %v405_v26  ;;  %v409_v45 = vsel %vm403_vm4, %v407_v32, %v408_v40  ;;  %v416_v46 = vadd.f32 %v405_v26, %v380_v36  ;;  %v417_v47 = vadd.f32 %v408_v40, %v381_v37  ;;  %v935_v37 = vld [vmem:[%s1226_s1 + $0x12] ss:$8 sm:$0x3] }
  0x27   : > { %v414_v48 = vadd.f32 %v406_v44, %v378_v38  ;;  %v415_v49 = vadd.f32 %v409_v45, %v379_v39  ;;  %v431_v50 = vmul.f32 %v424_v27, %v1036_v20  ;;  %v432_v51 = vmul.f32 %v428_v41, %v1038_v21  ;;  %v936_v38 = vld [vmem:[%s1226_s1 + $0x13] ss:$8 sm:$0x3] }
  0x28   : > { %v433_v53 = vmul.f32 %v424_v27, %v1040_v22  ;;  %v434_v54 = vmul.f32 %v428_v41, %v1042_v23  ;;  %v467_v55 = vmul.f32 %v460_v42, %v1036_v20  ;;  %v468_v56 = vmul.f32 %v464_v43, %v1038_v21  ;;  %v933_v20 = vld [vmem:[%s1226_s1 + $0x10] ss:$8 sm:$0x3] }
  0x29   : > { %v440_v57 = vrot.slane %v431_v50, 6  ;;  %v443_v58 = vrot.slane %v432_v51, 6  ;;  %v469_v59 = vmul.f32 %v460_v42, %v1040_v22  ;;  %v470_v60 = vmul.f32 %v464_v43, %v1042_v23 }
  0x2a   : > { %v441_v61 = vrot.slane %v433_v53, 6  ;;  %v444_v62 = vrot.slane %v434_v54, 6  ;;  %v476_v63 = vrot.slane %v467_v55, 7  ;;  %v479_v0 = vrot.slane %v468_v56, 7 }
  0x2b   : > { %v477_v1 = vrot.slane %v469_v59, 7  ;;  %v480_v2 = vrot.slane %v470_v60, 7  ;;  %v1109_v3 = vunpack.c.l.bf16 %v213_v52  ;;  %v1111_v4 = vunpack.c.h.bf16 %v213_v52 }
  0x2c   : > { %v442_v21 = vsel %vm439_vm5, %v440_v57, %v441_v61  ;;  %v445_v7 = vsel %vm439_vm5, %v443_v58, %v444_v62  ;;  %v452_v8 = vadd.f32 %v441_v61, %v416_v46  ;;  %v453_v9 = vadd.f32 %v444_v62, %v417_v47  ;;  %v937_v61 = vld [vmem:[%s1226_s1 + $0x14] ss:$8 sm:$0x3] }
  0x2d   : > { %v450_v11 = vadd.f32 %v442_v21, %v414_v48  ;;  %v451_v12 = vadd.f32 %v445_v7, %v415_v49  ;;  %v478_v13 = vsel %vm475_vm6, %v476_v63, %v477_v1  ;;  %v481_v14 = vsel %vm475_vm6, %v479_v0, %v480_v2 }
  0x2e   : > { %v488_v15 = vadd.f32 %v477_v1, %v452_v8  ;;  %v489_v16 = vadd.f32 %v480_v2, %v453_v9  ;;  %v498_v17 = vrot.slane %v933_v20, %v1008_v5  ;;  %v502_v18 = vrot.slane %v933_v20, %v1010_v6 }
  0x2f   : > { %v486_v19 = vadd.f32 %v478_v13, %v450_v11  ;;  %v487_v28 = vadd.f32 %v481_v14, %v451_v12  ;;  %v519_v24 = vrot.slane %v934_v10, %v1008_v5  ;;  %v523_v25 = vrot.slane %v934_v10, %v1010_v6 }
  0x30   : > { %v505_v29 = vmul.f32 %v498_v17, %v1040_v22  ;;  %v506_v30 = vmul.f32 %v502_v18, %v1042_v23  ;;  %v507_v31 = vmul.f32 %v498_v17, %v1109_v3  ;;  %v508_v32 = vmul.f32 %v502_v18, %v1111_v4 }
  0x31   : > { %v526_v33 = vmul.f32 %v519_v24, %v1040_v22  ;;  %v527_v34 = vmul.f32 %v523_v25, %v1042_v23  ;;  %v528_v35 = vmul.f32 %v519_v24, %v1109_v3  ;;  %v529_v36 = vmul.f32 %v523_v25, %v1111_v4 }
  0x32   : > { %v509_v39 = vadd.f32 %v505_v29, %v486_v19  ;;  %v510_v26 = vadd.f32 %v506_v30, %v487_v28  ;;  %v511_v40 = vadd.f32 %v507_v31, %v488_v15  ;;  %v512_v27 = vadd.f32 %v508_v32, %v489_v16  ;;  %v938_v28 = vld [vmem:[%s1226_s1 + $0x15] ss:$8 sm:$0x3]  ;;  %v939_v31 = vld [vmem:[%s1226_s1 + $0x16] ss:$8 sm:$0x3] }
  0x33   : > { %v534_v41 = vrot.slane %v526_v33, 1  ;;  %v535_v42 = vrot.slane %v528_v35, 1  ;;  %v537_v43 = vrot.slane %v527_v34, 1  ;;  %v538_v44 = vrot.slane %v529_v36, 1 }
  0x34   : > { %v554_v45 = vrot.slane %v935_v37, %v1008_v5  ;;  %v558_v46 = vrot.slane %v935_v37, %v1010_v6  ;;  %v589_v47 = vrot.slane %v936_v38, %v1008_v5  ;;  %v593_v48 = vrot.slane %v936_v38, %v1010_v6 }
  0x35   : > { %v536_v49 = vsel %vm259_vm0, %v534_v41, %v535_v42  ;;  %v539_v50 = vsel %vm259_vm0, %v537_v43, %v538_v44  ;;  %v546_v51 = vadd.f32 %v535_v42, %v511_v40  ;;  %v547_v52 = vadd.f32 %v538_v44, %v512_v27 }
  0x36   : > { %v544_v53 = vadd.f32 %v536_v49, %v509_v39  ;;  %v545_v54 = vadd.f32 %v539_v50, %v510_v26  ;;  %v561_v55 = vmul.f32 %v554_v45, %v1040_v22  ;;  %v562_v56 = vmul.f32 %v558_v46, %v1042_v23 }
  0x37   : > { %v563_v57 = vmul.f32 %v554_v45, %v1109_v3  ;;  %v564_v58 = vmul.f32 %v558_v46, %v1111_v4  ;;  %v596_v59 = vmul.f32 %v589_v47, %v1040_v22  ;;  %v597_v60 = vmul.f32 %v593_v48, %v1042_v23 }
  0x38   : > { %v569_v62 = vrot.slane %v561_v55, 2  ;;  %v572_v63 = vrot.slane %v562_v56, 2  ;;  %v598_v0 = vmul.f32 %v589_v47, %v1109_v3  ;;  %v599_v1 = vmul.f32 %v593_v48, %v1111_v4 }
  0x39   : > { %v570_v2 = vrot.slane %v563_v57, 2  ;;  %v573_v20 = vrot.slane %v564_v58, 2  ;;  %v604_v21 = vrot.slane %v596_v59, 3  ;;  %v607_v7 = vrot.slane %v597_v60, 3 }
  0x3a   : > { %v605_v8 = vrot.slane %v598_v0, 3  ;;  %v608_v9 = vrot.slane %v599_v1, 3  ;;  %v624_v10 = vrot.slane %v937_v61, %v1008_v5  ;;  %v628_v11 = vrot.slane %v937_v61, %v1010_v6  ;;  %v940_v61 = vld [vmem:[%s1226_s1 + $0x17] ss:$8 sm:$0x3] }
  0x3b   : > { %v571_v12 = vsel %vm295_vm1, %v569_v62, %v570_v2  ;;  %v574_v13 = vsel %vm295_vm1, %v572_v63, %v573_v20  ;;  %v581_v14 = vadd.f32 %v570_v2, %v546_v51  ;;  %v582_v15 = vadd.f32 %v573_v20, %v547_v52 }
  0x3c   : > { %v579_v16 = vadd.f32 %v571_v12, %v544_v53  ;;  %v580_v17 = vadd.f32 %v574_v13, %v545_v54  ;;  %v606_v18 = vsel %vm331_vm2, %v604_v21, %v605_v8  ;;  %v609_v19 = vsel %vm331_vm2, %v607_v7, %v608_v9 }
  0x3d   : > { %v616_v24 = vadd.f32 %v605_v8, %v581_v14  ;;  %v617_v25 = vadd.f32 %v608_v9, %v582_v15  ;;  %v631_v29 = vmul.f32 %v624_v10, %v1040_v22  ;;  %v632_v30 = vmul.f32 %v628_v11, %v1042_v23  ;;  %v758_v15 = vld [vmem:[%s1227_s2] sm:$0x3] }
  0x3e   : > { %v614_v32 = vadd.f32 %v606_v18, %v579_v16  ;;  %v615_v33 = vadd.f32 %v609_v19, %v580_v17  ;;  %v633_v34 = vmul.f32 %v624_v10, %v1109_v3  ;;  %v634_v35 = vmul.f32 %v628_v11, %v1111_v4 }
  0x3f   : > { %v639_v36 = vrot.slane %v631_v29, 4  ;;  %v642_v37 = vrot.slane %v632_v30, 4  ;;  %v659_v38 = vrot.slane %v938_v28, %v1008_v5  ;;  %v663_v39 = vrot.slane %v938_v28, %v1010_v6 }
  0x40   : > { %v640_v26 = vrot.slane %v633_v34, 4  ;;  %v643_v40 = vrot.slane %v634_v35, 4  ;;  %v694_v27 = vrot.slane %v939_v31, %v1008_v5  ;;  %v698_v41 = vrot.slane %v939_v31, %v1010_v6 }
  0x41   : > { %v666_v42 = vmul.f32 %v659_v38, %v1040_v22  ;;  %v667_v43 = vmul.f32 %v663_v39, %v1042_v23  ;;  %v668_v44 = vmul.f32 %v659_v38, %v1109_v3  ;;  %v669_v45 = vmul.f32 %v663_v39, %v1111_v4 }
  0x42   : > { %v641_v46 = vsel %vm367_vm3, %v639_v36, %v640_v26  ;;  %v644_v47 = vsel %vm367_vm3, %v642_v37, %v643_v40  ;;  %v651_v48 = vadd.f32 %v640_v26, %v616_v24  ;;  %v652_v49 = vadd.f32 %v643_v40, %v617_v25 }
  0x43   : > { %v649_v50 = vadd.f32 %v641_v46, %v614_v32  ;;  %v650_v51 = vadd.f32 %v644_v47, %v615_v33  ;;  %v674_v52 = vrot.slane %v666_v42, 5  ;;  %v675_v53 = vrot.slane %v668_v44, 5 }
  0x44   : > { %v677_v54 = vrot.slane %v667_v43, 5  ;;  %v678_v55 = vrot.slane %v669_v45, 5  ;;  %v701_v56 = vmul.f32 %v694_v27, %v1040_v22  ;;  %v702_v57 = vmul.f32 %v698_v41, %v1042_v23 }
  0x45   : > { %v676_v58 = vsel %vm403_vm4, %v674_v52, %v675_v53  ;;  %v703_v59 = vmul.f32 %v694_v27, %v1109_v3  ;;  %v704_v60 = vmul.f32 %v698_v41, %v1111_v4  ;;  %v686_v63 = vadd.f32 %v675_v53, %v651_v48 }
  0x46   : > { %v679_v62 = vsel %vm403_vm4, %v677_v54, %v678_v55  ;;  %v709_v0 = vrot.slane %v701_v56, 6  ;;  %v687_v1 = vadd.f32 %v678_v55, %v652_v49  ;;  %v712_v20 = vrot.slane %v702_v57, 6 }
  0x47   : > { %v710_v2 = vrot.slane %v703_v59, 6  ;;  %v713_v21 = vrot.slane %v704_v60, 6  ;;  %v684_v7 = vadd.f32 %v676_v58, %v649_v50  ;;  %v685_v8 = vadd.f32 %v679_v62, %v650_v51 }
  0x48   : > { %v729_v9 = vrot.slane %v940_v61, %v1008_v5  ;;  %v733_v10 = vrot.slane %v940_v61, %v1010_v6 }
  0x49   : > { %v711_v11 = vsel %vm439_vm5, %v709_v0, %v710_v2  ;;  %v714_v12 = vsel %vm439_vm5, %v712_v20, %v713_v21  ;;  %v721_v16 = vadd.f32 %v710_v2, %v686_v63  ;;  %v722_v17 = vadd.f32 %v713_v21, %v687_v1 }
  0x4a   : > { %v736_v13 = vmul.f32 %v729_v9, %v1040_v22  ;;  %v737_v14 = vmul.f32 %v733_v10, %v1042_v23  ;;  %v738_v18 = vmul.f32 %v729_v9, %v1109_v3  ;;  %v739_v19 = vmul.f32 %v733_v10, %v1111_v4 }
  0x4b   : > { %v719_v28 = vadd.f32 %v711_v11, %v684_v7  ;;  %v720_v24 = vadd.f32 %v714_v12, %v685_v8  ;;  %v763_v22 = vrot.slane %v758_v15, %v1008_v5  ;;  %v767_v23 = vrot.slane %v758_v15, %v1010_v6 }
  0x4c   : > { %v744_v25 = vrot.slane %v736_v13, 7  ;;  %v747_v29 = vrot.slane %v737_v14, 7  ;;  %v745_v30 = vrot.slane %v738_v18, 7  ;;  %v748_v31 = vrot.slane %v739_v19, 7 }
  0x4e   : > { %v746_v32 = vsel %vm475_vm6, %v744_v25, %v745_v30  ;;  %v749_v33 = vsel %vm475_vm6, %v747_v29, %v748_v31  ;;  %v756_v34 = vadd.f32 %v745_v30, %v721_v16  ;;  %v757_v35 = vadd.f32 %v748_v31, %v722_v17 }
  0x4f   : > { %v754_v3 = vadd.f32 %v746_v32, %v719_v28  ;;  %v755_v4 = vadd.f32 %v749_v33, %v720_v24 }
  0x50   : > { %v772_v36 = vadd.f32 %v763_v22, %v756_v34  ;;  %v773_v37 = vadd.f32 %v767_v23, %v757_v35 }
  0x51   : > { %v770_v38 = vadd.f32 %v763_v22, %v754_v3  ;;  %v771_v39 = vadd.f32 %v767_v23, %v755_v4 }
  0x52   : > { %776 = vst [vmem:[%s205_s8 + $0x10] sm:$0x1] %v772_v36  ;;  %777 = vst [vmem:[%s205_s8 + $0x18] sm:$0x1] %v773_v37  ;;  %v778_v5 = vsel %vm475_vm6, %v772_v36, 0.0  ;;  %v786_v6 = vsel %vm475_vm6, %v773_v37, 0.0  ;;  %v796_v26 = vmul.f32 %v772_v36, %v772_v36  ;;  %v797_v40 = vmul.f32 %v773_v37, %v773_v37 }
  0x53   : > { %774 = vst [vmem:[%s205_s8] sm:$0xff] %v770_v38  ;;  %775 = vst [vmem:[%s205_s8 + $0x8] sm:$0xff] %v771_v39  ;;  %v779_v27 = vadd.f32 %v778_v5, %v770_v38  ;;  %v787_v41 = vadd.f32 %v786_v6, %v771_v39  ;;  %v794_v42 = vmul.f32 %v770_v38, %v770_v38 }
  0x54   : > { %v795_v43 = vmul.f32 %v771_v39, %v771_v39  ;;  %v798_v44 = vsel %vm475_vm6, %v796_v26, 0.0  ;;  %v806_v45 = vsel %vm475_vm6, %v797_v40, 0.0 }
  0x55   : > { %v780_v46 = vrot.slane %v779_v27, 4  ;;  %v788_v47 = vrot.slane %v787_v41, 4  ;;  %v799_v48 = vadd.f32 %v798_v44, %v794_v42 }
  0x56   : > { %v807_v49 = vadd.f32 %v806_v45, %v795_v43 }
  0x57   : > { %v781_v50 = vadd.f32 %v780_v46, %v779_v27  ;;  %v789_v51 = vadd.f32 %v788_v47, %v787_v41  ;;  %v800_v52 = vrot.slane %v799_v48, 4 }
  0x58   : > { %v808_v53 = vrot.slane %v807_v49, 4 }
  0x59   : > { %v782_v54 = vrot.slane %v781_v50, 2  ;;  %v790_v55 = vrot.slane %v789_v51, 2  ;;  %v801_v56 = vadd.f32 %v800_v52, %v799_v48 }
  0x5a   : > { %v809_v57 = vadd.f32 %v808_v53, %v807_v49 }
  0x5b   : > { %v783_v58 = vadd.f32 %v782_v54, %v781_v50  ;;  %v791_v59 = vadd.f32 %v790_v55, %v789_v51  ;;  %v802_v60 = vrot.slane %v801_v56, 2 }
  0x5c   : > { %v810_v61 = vrot.slane %v809_v57, 2 }
  0x5d   : > { %v784_v62 = vrot.slane %v783_v58, 1  ;;  %v792_v63 = vrot.slane %v791_v59, 1  ;;  %v803_v0 = vadd.f32 %v802_v60, %v801_v56 }
  0x5e   : > { %v811_v1 = vadd.f32 %v810_v61, %v809_v57 }
  0x5f   : > { %v785_v2 = vadd.f32 %v784_v62, %v783_v58  ;;  %v793_v20 = vadd.f32 %v792_v63, %v791_v59  ;;  %v804_v21 = vrot.slane %v803_v0, 1 }
  0x60   : > { %v812_v7 = vrot.slane %v811_v1, 1 }
  0x61   : > { %v805_v8 = vadd.f32 %v804_v21, %v803_v0 }
  0x62   : > { %v813_v9 = vadd.f32 %v812_v7, %v811_v1 }
  0x63   : > { %v814_v10 = vsel %vm475_vm6, %v785_v2, %v805_v8 }
  0x64   : > { %v815_v11 = vsel %vm475_vm6, %v793_v20, %v813_v9 }
  0x65   : > { %v818_v12 = vcombine.low %v814_v10, %v815_v11 }
  0x67   : > { %941 = vst.sshfl [vmem:[%s210_s12] sm:$0x33 pattern:$0x76325410] %v818_v12 }
  0x68 PF: > { %s15_s15 = sadd.s32 1, %s961_s15  }
  0x69   : > { %p12_p4 = scmp.ge.s32.totalorder %s15_s15, 4  }
  0x6b   :  { %14 = sbr.rel (!%p12_p4) target bundleno = 1 (0x1), region = 89 }

// kernel: model_forward.23
= control target key start
LH: loop header
LB: loop body
LE: loop exit
PB: predicated region body
PF: predicated region fallthrough
CT: control target
= control target key end

     0   :  { %vm436_vm0 = vcmask 1041408   ;;  %s821_s1 = inlined_call_operand.vmem [shape: bf16[512,128], index: 1, kind: input, shape index: {}]   ;;  %s822_s0 = inlined_call_operand.vmem [shape: bf16[18,512], index: 0, kind: input, shape index: {}]   ;;  %s823_s2 = inlined_call_operand.vmem [shape: f32[1,128], index: 2, kind: input, shape index: {}]   ;;  %s824_s3 = inlined_call_operand.vmem [shape: f32[18,128], index: 3, kind: input, shape index: {}]   ;;  %s825_s4 = inlined_call_operand.vmem [shape: f32[1,128], index: 4, kind: input, shape index: {}]   ;;  %s826_s5 = inlined_call_operand.vmem [shape: f32[1,128], index: 5, kind: input, shape index: {}]   ;;  %s827_s6 = inlined_call_operand.vmem [shape: f32[18,128], index: 6, kind: output, shape index: {}]  }
   0x1   :  { %v595_v0 = vld [vmem:[%s821_s1 + $0x40] sm:$0xff]   ;;  %v599_v4 = vld [vmem:[%s821_s1 + $0x48] sm:$0xff]   ;;  %v603_v8 = vld [vmem:[%s821_s1 + $0x50] sm:$0xff]  }
   0x2   :  { %v596_v1 = vld [vmem:[%s821_s1 + $0xc0] sm:$0xff]   ;;  %539 = vmatprep.subr.bf16.mxu0 %v595_v0  ;;  %v600_v5 = vld [vmem:[%s821_s1 + $0xc8] sm:$0xff]   ;;  %v604_v9 = vld [vmem:[%s821_s1 + $0xd0] sm:$0xff]  }
   0x3   :  { %v597_v2 = vld [vmem:[%s821_s1] sm:$0xff]   ;;  %567 = vmatprep.subr.bf16.mxu1 %v596_v1  ;;  %v601_v6 = vld [vmem:[%s821_s1 + $0x8] sm:$0xff]   ;;  %v605_v10 = vld [vmem:[%s821_s1 + $0x10] sm:$0xff]  }
   0x4   :  { %v598_v3 = vld [vmem:[%s821_s1 + $0x80] sm:$0xff]   ;;  %540 = vmatpush3.bf16.msra.mxu0 %v597_v2  ;;  %v602_v7 = vld [vmem:[%s821_s1 + $0x88] sm:$0xff]   ;;  %v606_v11 = vld [vmem:[%s821_s1 + $0x90] sm:$0xff]  }
   0x5   :  { %568 = vmatpush3.bf16.msra.mxu1 %v598_v3  ;;  %541 = vmatprep.subr.bf16.mxu0 %v599_v4  ;;  %v607_v12 = vld [vmem:[%s821_s1 + $0x58] sm:$0xff]   ;;  %v611_v16 = vld [vmem:[%s821_s1 + $0x60] sm:$0xff]   ;;  %v615_v20 = vld [vmem:[%s821_s1 + $0x68] sm:$0xff]  }
   0x6   :  { %569 = vmatprep.subr.bf16.mxu1 %v600_v5  ;;  %v608_v13 = vld [vmem:[%s821_s1 + $0xd8] sm:$0xff]   ;;  %v612_v17 = vld [vmem:[%s821_s1 + $0xe0] sm:$0xff]   ;;  %v616_v21 = vld [vmem:[%s821_s1 + $0xe8] sm:$0xff]  }
   0x7   :  { %v609_v14 = vld [vmem:[%s821_s1 + $0x18] sm:$0xff]   ;;  %v613_v18 = vld [vmem:[%s821_s1 + $0x20] sm:$0xff]   ;;  %v617_v22 = vld [vmem:[%s821_s1 + $0x28] sm:$0xff]  }
   0x8   :  { %542 = vmatpush3.bf16.msra.mxu0 %v601_v6  ;;  %v610_v15 = vld [vmem:[%s821_s1 + $0x98] sm:$0xff]   ;;  %v614_v19 = vld [vmem:[%s821_s1 + $0xa0] sm:$0xff]   ;;  %v618_v23 = vld [vmem:[%s821_s1 + $0xa8] sm:$0xff]  }
   0x9   :  { %570 = vmatpush3.bf16.msra.mxu1 %v602_v7  ;;  %543 = vmatprep.subr.bf16.mxu0 %v603_v8  ;;  %v619_v24 = vld [vmem:[%s821_s1 + $0x70] sm:$0xff]   ;;  %v623_v28 = vld [vmem:[%s821_s1 + $0x78] sm:$0xff]   ;;  %v28_v36 = vld [vmem:[%s822_s0 + $0x20] sm:$0x11] }
   0xa   :  { %571 = vmatprep.subr.bf16.mxu1 %v604_v9  ;;  %v620_v25 = vld [vmem:[%s821_s1 + $0xf0] sm:$0xff]   ;;  %v624_v29 = vld [vmem:[%s821_s1 + $0xf8] sm:$0xff]   ;;  %v502_v37 = vcombine.high %v28_v36, %v28_v36  ;;  %v29_v38 = vld [vmem:[%s822_s0 + $0x28] sm:$0x11]  ;;  %v501_v40 = vcombine.low %v28_v36, %v28_v36 }
   0xb   :  { %v621_v26 = vld [vmem:[%s821_s1 + $0x30] sm:$0xff]   ;;  %v625_v30 = vld [vmem:[%s821_s1 + $0x38] sm:$0xff]   ;;  %v504_v39 = vcombine.high %v29_v38, %v29_v38  ;;  %v503_v41 = vcombine.low %v29_v38, %v29_v38  ;;  %v496_v44 = vld [vmem:[%s823_s2] ss:$0 sm:$0xff] }
   0xc   :  { %544 = vmatpush3.bf16.msra.mxu0 %v605_v10  ;;  %v622_v27 = vld [vmem:[%s821_s1 + $0xb0] sm:$0xff]   ;;  %v626_v31 = vld [vmem:[%s821_s1 + $0xb8] sm:$0xff]   ;;  %v424_v62 = vld [vmem:[%s824_s3 + $0x8] sm:$0xff] }
   0xd   :  { %572 = vmatpush3.bf16.msra.mxu1 %v606_v11  ;;  %545 = vmatprep.subr.bf16.mxu0 %v607_v12  ;;  %v627_v32 = vld [vmem:[%s822_s0] ss:$16 sps:$4 sm:$0xff]   ;;  %v629_v33 = vld [vmem:[%s822_s0 + $0x4] ss:$16 sps:$4 sm:$0xff]   ;;  %v630_v34 = vld [vmem:[%s822_s0 + $0x8] ss:$16 sps:$4 sm:$0xff]  }
   0xe   :  { %573 = vmatprep.subr.bf16.mxu1 %v608_v13  ;;  %v632_v35 = vld [vmem:[%s822_s0 + $0xc] ss:$16 sps:$4 sm:$0xff]   ;;  %359 = vmatprep.mubr.bf16.mxu0 %v629_v33  ;;  %v425_v10 = vld [vmem:[%s824_s3 + $0x10] sm:$0x3] }
   0xf   :  { %407 = vmatprep.mubr.bf16.mxu1 %v632_v35 }
  0x10   :  { %546 = vmatpush3.bf16.msra.mxu0 %v609_v14 }
  0x11   :  { %574 = vmatpush3.bf16.msra.mxu1 %v610_v15  ;;  %547 = vmatprep.subr.bf16.mxu0 %v611_v16  ;;  %v423_v15 = vld [vmem:[%s824_s3] sm:$0xff] }
  0x12   :  { %575 = vmatprep.subr.bf16.mxu1 %v612_v17 }
  0x14   :  { %548 = vmatpush3.bf16.msra.mxu0 %v613_v18 }
  0x15   :  { %576 = vmatpush3.bf16.msra.mxu1 %v614_v19  ;;  %549 = vmatprep.subr.bf16.mxu0 %v615_v20 }
  0x16   :  { %577 = vmatprep.subr.bf16.mxu1 %v616_v21 }
  0x18   :  { %550 = vmatpush3.bf16.msra.mxu0 %v617_v22 }
  0x19   :  { %578 = vmatpush3.bf16.msra.mxu1 %v618_v23  ;;  %551 = vmatprep.subr.bf16.mxu0 %v619_v24 }
  0x1a   :  { %579 = vmatprep.subr.bf16.mxu1 %v620_v25 }
  0x1c   :  { %552 = vmatpush3.bf16.msra.mxu0 %v621_v26 }
  0x1d   :  { %580 = vmatpush3.bf16.msra.mxu1 %v622_v27  ;;  %553 = vmatprep.subr.bf16.mxu0 %v623_v28 }
  0x1e   :  { %581 = vmatprep.subr.bf16.mxu1 %v624_v29 }
  0x20   :  { %554 = vmatpush3.bf16.msra.mxu0 %v625_v30 }
  0x21   :  { %582 = vmatpush3.bf16.msra.mxu1 %v626_v31 }
  0x23   :  { %360 = vmatmul.mubr.bf16.vlgmr.msra.gmra.mrb[0].mxu0 %v627_v32 }
  0x24   :  { %408 = vmatmul.mubr.bf16.vlgmr.msra.gmra.mrb[0].mxu1 %v630_v34  ;;  %367 = vmatprep.mubr.bf16.mxu0 %v502_v37  ;;  %v537_v37 = vld [vmem:[%s825_s4] ss:$0 sm:$0xff] }
  0x25   :  { %415 = vmatprep.mubr.bf16.mxu1 %v504_v39 }
  0x2b   :  { %368 = vmatmul.mubr.bf16.gmra.mrb[4].mxu0 %v501_v40 }
  0x2c   :  { %416 = vmatmul.mubr.bf16.gmra.mrb[4].mxu1 %v503_v41  ;;  %v538_v41 = vld [vmem:[%s826_s5] ss:$0 sm:$0xff] }
  0xf6   :  { %v555_v42 = vpop.f32.mrb[0].mxu0 }
  0xf7   :  { %v583_v43 = vpop.f32.mrb[0].mxu1  ;;  %v556_v45 = vpop.f32.mrb[1].mxu0 }
  0xf8   :  { %v557_v46 = vadd.f32 %v556_v45, %v555_v42  ;;  %v584_v47 = vpop.f32.mrb[1].mxu1  ;;  %v558_v48 = vpop.f32.mrb[2].mxu0 }
  0xf9   :  { %v585_v49 = vadd.f32 %v584_v47, %v583_v43  ;;  %v586_v50 = vpop.f32.mrb[2].mxu1  ;;  %v559_v51 = vpop.f32.mrb[3].mxu0 }
  0xfa   :  { %v362_v52 = vadd.f32 %v557_v46, %v496_v44  ;;  %v560_v53 = vadd.f32 %v559_v51, %v558_v48  ;;  %v587_v54 = vpop.f32.mrb[3].mxu1 }
  0xfb   :  { %v588_v55 = vadd.f32 %v587_v54, %v586_v50 }
  0xfc   :  { %v410_v56 = vadd.f32 %v585_v49, %v362_v52  ;;  %v365_v57 = vadd.f32 %v560_v53, %v496_v44 }
  0xfe   :  { %v413_v58 = vadd.f32 %v588_v55, %v365_v57  ;;  %v561_v59 = vpop.f32.mrb[4].mxu0  ;;  %v426_v13 = vmul.f32 0.5, %v410_v56 }
  0xff   :  { %v589_v60 = vpop.f32.mrb[4].mxu1  ;;  %v562_v61 = vpop.f32.mrb[5].mxu0 }
 0x100   :  { %v427_v63 = vmul.f32 0.5, %v413_v58  ;;  %v563_v0 = vadd.f32 %v562_v61, %v561_v59  ;;  %v590_v1 = vpop.f32.mrb[5].mxu1  ;;  %v564_v2 = vpop.f32.mrb[6].mxu0  ;;  %v429_v16 = vadd.f32 %v426_v13, %v423_v15 }
 0x101   :  { %v591_v3 = vadd.f32 %v590_v1, %v589_v60  ;;  %v592_v4 = vpop.f32.mrb[6].mxu1  ;;  %v565_v5 = vpop.f32.mrb[7].mxu0 }
 0x102   :  { %v370_v6 = vadd.f32 %v563_v0, %v496_v44  ;;  %v593_v7 = vpop.f32.mrb[7].mxu1  ;;  %v430_v8 = vadd.f32 %v427_v63, %v424_v62 }
 0x104   :  { %v418_v9 = vadd.f32 %v591_v3, %v370_v6  ;;  %434 = vadd.xlane.f32.xlu1 %v430_v8 }
 0x106   :  { %v428_v11 = vmul.f32 0.5, %v418_v9 }
 0x108   :  { %v431_v12 = vadd.f32 %v428_v11, %v425_v10 }
 0x10a   :  { %v437_v14 = vsel %vm436_vm0, %v431_v12, 0.0 }
 0x10b   :  { %438 = vadd.xlane.f32.xlu0 %v437_v14 }
 0x10f   :  { %432 = vadd.xlane.f32.xlu0 %v429_v16 }
 0x191   :  { %v435_v17 = vpop.xlane.xlu1 %434 }
 0x192   :  { %v442_v18 = vmul.f32 0.0078125, %v435_v17 }
 0x194   :  { %v445_v19 = vsub.f32 %v430_v8, %v442_v18 }
 0x196   :  { %v448_v20 = vmul.f32 %v445_v19, %v445_v19 }
 0x198   :  { %v439_v21 = vpop.xlane.xlu0 %438  ;;  %452 = vadd.xlane.f32.xlu0 %v448_v20 }
 0x199   :  { %v443_v22 = vmul.f32 0.0078125, %v439_v21 }
 0x19b   :  { %v446_v25 = vsub.f32 %v431_v12, %v443_v22 }
 0x19c   :  { %v433_v23 = vpop.xlane.xlu0 %432 }
 0x19d   :  { %v441_v24 = vmul.f32 0.0078125, %v433_v23  ;;  %v449_v28 = vmul.f32 %v446_v25, %v446_v25 }
 0x19f   :  { %v444_v26 = vsub.f32 %v429_v16, %v441_v24  ;;  %v454_v29 = vsel %vm436_vm0, %v449_v28, 0.0 }
 0x1a1   :  { %v447_v27 = vmul.f32 %v444_v26, %v444_v26 }
 0x1a3   :  { %450 = vadd.xlane.f32.xlu1 %v447_v27 }
 0x1a7   :  { %455 = vadd.xlane.f32.xlu1 %v454_v29 }
 0x225   :  { %v453_v30 = vpop.xlane.xlu0 %452 }
 0x226   :  { %v458_v31 = vmul.f32 0.0078125, %v453_v30 }
 0x228   :  { %v461_v32 = vadd.f32 1e-05, %v458_v31 }
 0x22a   :  { %637 = vrsqrt.f32 %v461_v32 }
 0x230   :  { %v451_v33 = vpop.xlane.xlu1 %450 }
 0x231   :  { %v457_v34 = vmul.f32 0.0078125, %v451_v33 }
 0x233   :  { %v460_v35 = vadd.f32 1e-05, %v457_v34 }
 0x234   :  { %v638_v36 = vpop.eup %637  ;;  %v456_v38 = vpop.xlane.xlu1 %455 }
 0x235   :  { %v467_v39 = vmul.f32 %v638_v36, %v445_v19  ;;  %639 = vrsqrt.f32 %v460_v35  ;;  %v459_v40 = vmul.f32 0.0078125, %v456_v38 }
 0x237   :  { %v477_v42 = vmul.f32 %v537_v37, %v467_v39  ;;  %v462_v43 = vadd.f32 1e-05, %v459_v40 }
 0x239   :  { %v487_v44 = vadd.f32 %v538_v41, %v477_v42  ;;  %641 = vrsqrt.f32 %v462_v43 }
 0x23b   :  { %490 = vst [vmem:[%s827_s6 + $0x8] sm:$0xff] %v487_v44 }
 0x23f   :  { %v640_v45 = vpop.eup %639 }
 0x240   :  { %v466_v46 = vmul.f32 %v640_v45, %v444_v26 }
 0x242   :  { %v476_v47 = vmul.f32 %v537_v37, %v466_v46 }
 0x243   :  { %v642_v48 = vpop.eup %641 }
 0x244   :  { %v486_v49 = vadd.f32 %v538_v41, %v476_v47  ;;  %v468_v50 = vmul.f32 %v642_v48, %v446_v25 }
 0x246   :  { %489 = vst [vmem:[%s827_s6] sm:$0xff] %v486_v49  ;;  %v478_v51 = vmul.f32 %v537_v37, %v468_v50 }
 0x248   :  { %v488_v52 = vadd.f32 %v538_v41, %v478_v51 }
 0x24a   :  { %491 = vst [vmem:[%s827_s6 + $0x10] sm:$0x3] %v488_v52 }

</bundles_post_ra>
